<compile_context>
chip_gen: v7x
topology: tpu7x:2x2x1
jax: 0.10.0
libtpu: 0.0.40
codegen_flags: <defaults>
</compile_context>

<pallas_src>
import jax
import jax.numpy as jnp
from jax.experimental import pallas as pl
from jax.experimental.pallas import tpu as pltpu

# --- hyperparameters from the PyTorch script --------------------------------
INPUT_SIZE = 16            # input feature size (model arg; small choice)
HIDDEN = 64                # hidden_size
NUM_HEADS = 4
NUM_LAYERS = 2
HEAD_DIM = HIDDEN // NUM_HEADS
SCALE = 1.0 / (HEAD_DIM ** 0.5)
EPS = 1e-5                 # nn.LayerNorm default

NUM_ATTN = 1 + NUM_LAYERS  # standalone self_attention + one MHA per encoder layer

# --- square-weight pack (16, HIDDEN, HIDDEN) layout --------------------------
W_QKV_BASE = 0                      # 3*a + {0:q, 1:k, 2:v}    for attention a
W_OUT_BASE = 3 * NUM_ATTN           # + a                       attention out proj
W_FFN_BASE = W_OUT_BASE + NUM_ATTN  # + 2*l + {0:ff1, 1:ff2}    per encoder layer
NUM_SQ = W_FFN_BASE + 2 * NUM_LAYERS

# --- small-vector pack (rows, HIDDEN) layout ---------------------------------
ROW_EMB_B = 0
ROW_ATTN_BASE = 1                   # + 4*a + {0:q_b, 1:k_b, 2:v_b, 3:out_b}
ROW_LAYER_BASE = 1 + 4 * NUM_ATTN   # + 6*l + {0:ff1_b,1:ff2_b,2:n1_g,3:n1_b,4:n2_g,5:n2_b}
NUM_SMALL_ROWS = ROW_LAYER_BASE + 6 * NUM_LAYERS


# --- in-kernel helpers -------------------------------------------------------
def _layernorm(h, gamma, beta):
    mu = jnp.mean(h, axis=-1, keepdims=True)
    var = jnp.mean((h - mu) ** 2, axis=-1, keepdims=True)
    return (h - mu) * jax.lax.rsqrt(var + EPS) * gamma + beta


def _mha(h, bt, seq, w_sq_ref, small_ref, attn_idx):
    """nn.MultiheadAttention (eval mode) on a (bt*seq, HIDDEN) activation slab."""
    brow = ROW_ATTN_BASE + 4 * attn_idx

    def proj(i):
        w = w_sq_ref[W_QKV_BASE + 3 * attn_idx + i]                 # (H, H), lazy load
        p = jnp.dot(h, w, preferred_element_type=jnp.float32)
        return (p + small_ref[brow + i:brow + i + 1, :]).reshape(bt, seq, HIDDEN)

    q = proj(0)                                                     # (bt, S, H)
    k = proj(1)
    v = proj(2)

    outs = []
    for n in range(NUM_HEADS):                                      # tiny per-head S x S part
        lo, hi = n * HEAD_DIM, (n + 1) * HEAD_DIM
        qn, kn, vn = q[:, :, lo:hi], k[:, :, lo:hi], v[:, :, lo:hi]
        s = jnp.einsum("bqd,bkd->bqk", qn * SCALE, kn,
                       preferred_element_type=jnp.float32)          # (bt, S, S)
        s = s - jnp.max(s, axis=-1, keepdims=True)
        e = jnp.exp(s)
        p = e * pl.reciprocal(jnp.sum(e, axis=-1, keepdims=True), approx=True)
        outs.append(jnp.einsum("bqk,bkd->bqd", p, vn,
                               preferred_element_type=jnp.float32))  # (bt, S, hd)

    o = jnp.concatenate(outs, axis=-1).reshape(bt * seq, HIDDEN)    # concat heads
    w_o = w_sq_ref[W_OUT_BASE + attn_idx]                           # (H, H)
    return (jnp.dot(o, w_o, preferred_element_type=jnp.float32)
            + small_ref[brow + 3:brow + 4, :])                      # (bt*S, H)


def _encoder_layer(h, bt, seq, l, w_sq_ref, small_ref):
    """nn.TransformerEncoderLayer (post-norm, relu, eval mode). h: (bt*S, H)."""
    lbase = ROW_LAYER_BASE + 6 * l
    a = _mha(h, bt, seq, w_sq_ref, small_ref, 1 + l)
    h = _layernorm(h + a,
                   small_ref[lbase + 2:lbase + 3, :],
                   small_ref[lbase + 3:lbase + 4, :])
    ff = jnp.dot(h, w_sq_ref[W_FFN_BASE + 2 * l],
                 preferred_element_type=jnp.float32) + small_ref[lbase + 0:lbase + 1, :]
    ff = jnp.maximum(ff, 0.0)
    ff = jnp.dot(ff, w_sq_ref[W_FFN_BASE + 2 * l + 1],
                 preferred_element_type=jnp.float32) + small_ref[lbase + 1:lbase + 2, :]
    h = _layernorm(h + ff,
                   small_ref[lbase + 4:lbase + 5, :],
                   small_ref[lbase + 5:lbase + 6, :])
    return h


# --- the Pallas kernel: Bt batch elements per grid step ----------------------
def transformer_kernel(x_ref, w_emb_ref, w_sq_ref, small_ref, out_ref):
    bt, seq, feat = x_ref.shape
    x = x_ref[...].reshape(bt * seq, feat)                          # (Bt*S, F)
    h = jnp.dot(x, w_emb_ref[...],
                preferred_element_type=jnp.float32) + small_ref[0:1, :]   # (Bt*S, H)
    # x, _ = self_attention(x, x, x)  (no residual in the PyTorch forward)
    h = _mha(h, bt, seq, w_sq_ref, small_ref, 0)
    for l in range(NUM_LAYERS):                                     # TransformerEncoder
        h = _encoder_layer(h, bt, seq, l, w_sq_ref, small_ref)
    # mean over the sequence axis -> one lane-dense (Bt, H) store per step
    out_ref[0] = jnp.mean(h.reshape(bt, seq, HIDDEN), axis=1)


# --- wrapper -----------------------------------------------------------------
@jax.jit
def transformer_forward(x, packed):
    (w_emb, w_sq, small, w_final, b_final) = packed
    B, S, F = x.shape

    # Fat grid steps: 1 step for small B, exactly 2 steps otherwise (v7x megacore).
    num_steps = 1 if B < 4 else 2
    Bt = (B + num_steps - 1) // num_steps
    B_pad = Bt * num_steps
    if B_pad != B:
        x = jnp.pad(x, ((0, B_pad - B), (0, 0), (0, 0)))

    def const_spec(a):
        zeros = (0,) * a.ndim
        return pl.BlockSpec(a.shape, lambda b, zeros=zeros: zeros)  # VMEM-resident weights

    pooled = pl.pallas_call(
        transformer_kernel,
        out_shape=jax.ShapeDtypeStruct((num_steps, Bt, HIDDEN), jnp.float32),
        grid=(num_steps,),
        in_specs=[
            pl.BlockSpec((Bt, S, F), lambda b: (b, 0, 0)),          # per-step batch slab
            const_spec(w_emb),
            const_spec(w_sq),
            const_spec(small),
        ],
        out_specs=pl.BlockSpec((1, Bt, HIDDEN), lambda b: (b, 0, 0)),
        compiler_params=pltpu.CompilerParams(
            dimension_semantics=("parallel",)),
    )(x, w_emb, w_sq, small)

    pooled = pooled.reshape(B_pad, HIDDEN)[:B]
    y = pooled @ w_final + b_final          # tiny (H,1) projection outside the kernel
    return y.reshape(B)                     # matches x.squeeze() for batch > 1


# --- deterministic parameters in PyTorch layout ------------------------------
def make_torch_params(key):
    def nrm(k, shape):
        return 0.05 * jax.random.normal(k, shape, jnp.float32)

    keys = iter(jax.random.split(key, 32))
    p = {
        "emb_w": nrm(next(keys), (HIDDEN, INPUT_SIZE)),
        "emb_b": nrm(next(keys), (HIDDEN,)),
        "sa_in_w": nrm(next(keys), (3 * HIDDEN, HIDDEN)),
        "sa_in_b": nrm(next(keys), (3 * HIDDEN,)),
        "sa_out_w": nrm(next(keys), (HIDDEN, HIDDEN)),
        "sa_out_b": nrm(next(keys), (HIDDEN,)),
        "layers": [],
        "out_w": None, "out_b": None,
    }
    for _ in range(NUM_LAYERS):
        p["layers"].append({
            "in_w": nrm(next(keys), (3 * HIDDEN, HIDDEN)),
            "in_b": nrm(next(keys), (3 * HIDDEN,)),
            "out_w": nrm(next(keys), (HIDDEN, HIDDEN)),
            "out_b": nrm(next(keys), (HIDDEN,)),
            "ff1_w": nrm(next(keys), (HIDDEN, HIDDEN)),
            "ff1_b": nrm(next(keys), (HIDDEN,)),
            "ff2_w": nrm(next(keys), (HIDDEN, HIDDEN)),
            "ff2_b": nrm(next(keys), (HIDDEN,)),
            "n1_g": jnp.ones((HIDDEN,), jnp.float32),
            "n1_b": jnp.zeros((HIDDEN,), jnp.float32),
            "n2_g": jnp.ones((HIDDEN,), jnp.float32),
            "n2_b": jnp.zeros((HIDDEN,), jnp.float32),
        })
    p["out_w"] = nrm(next(keys), (1, HIDDEN))
    p["out_b"] = nrm(next(keys), (1,))
    return p


# --- wrapper-side packing: split / transpose / stack (free, trace time) ------
def pack_params(p):
    attn_modules = [(p["sa_in_w"], p["sa_in_b"], p["sa_out_w"], p["sa_out_b"])] + \
                   [(lp["in_w"], lp["in_b"], lp["out_w"], lp["out_b"])
                    for lp in p["layers"]]

    w_sq = []
    # q/k/v weights, kernel does activation @ W  => store in_proj chunk transposed
    for in_w, _, _, _ in attn_modules:
        for i in range(3):
            w_sq.append(in_w[i * HIDDEN:(i + 1) * HIDDEN, :].T)     # (H_in, H_out)
    # attention output projections
    for _, _, out_w, _ in attn_modules:
        w_sq.append(out_w.T)
    # FFN weights
    for lp in p["layers"]:
        w_sq.append(lp["ff1_w"].T)
        w_sq.append(lp["ff2_w"].T)
    w_sq = jnp.stack(w_sq)                                          # (16, H, H)
    assert w_sq.shape[0] == NUM_SQ

    small = [p["emb_b"]]
    for _, in_b, _, out_b in attn_modules:
        for i in range(3):
            small.append(in_b[i * HIDDEN:(i + 1) * HIDDEN])
        small.append(out_b)
    for lp in p["layers"]:
        small += [lp["ff1_b"], lp["ff2_b"],
                  lp["n1_g"], lp["n1_b"], lp["n2_g"], lp["n2_b"]]
    small = jnp.stack(small)                                        # (25, H)
    assert small.shape[0] == NUM_SMALL_ROWS

    return (p["emb_w"].T,                                           # (IN, H)
            w_sq,                                                   # (16, H, H)
            small,                                                  # (25, H)
            p["out_w"].T,                                           # (H, 1)
            p["out_b"])                                             # (1,)


# --- pure-JAX reference (straight translation of the PyTorch forward) --------
@jax.jit
def reference_forward(x, p):
    B = x.shape[0]
    h = x @ p["emb_w"].T + p["emb_b"]                               # (B, S, H)
    h = jnp.transpose(h, (1, 0, 2))                                 # (S, B, H) seq-first

    def mha(h, in_w, in_b, out_w, out_b):
        S_, B_, H_ = h.shape
        qkv = h @ in_w.T + in_b                                     # (S, B, 3H)
        q, k, v = jnp.split(qkv, 3, axis=-1)

        def split_heads(t):
            return t.reshape(S_, B_, NUM_HEADS, HEAD_DIM).transpose(1, 2, 0, 3)

        q, k, v = map(split_heads, (q, k, v))                       # (B, nh, S, hd)
        s = jnp.einsum("bnqd,bnkd->bnqk", q * SCALE, k)
        w = jax.nn.softmax(s, axis=-1)
        o = jnp.einsum("bnqk,bnkd->bnqd", w, v)                     # (B, nh, S, hd)
        o = o.transpose(2, 0, 1, 3).reshape(S_, B_, H_)             # (S, B, H)
        return o @ out_w.T + out_b

    def ln(h, g, b):
        mu = h.mean(-1, keepdims=True)
        var = ((h - mu) ** 2).mean(-1, keepdims=True)
        return (h - mu) / jnp.sqrt(var + EPS) * g + b

    h = mha(h, p["sa_in_w"], p["sa_in_b"], p["sa_out_w"], p["sa_out_b"])
    for lp in p["layers"]:
        a = mha(h, lp["in_w"], lp["in_b"], lp["out_w"], lp["out_b"])
        h = ln(h + a, lp["n1_g"], lp["n1_b"])
        ff = jnp.maximum(h @ lp["ff1_w"].T + lp["ff1_b"], 0.0) @ lp["ff2_w"].T + lp["ff2_b"]
        h = ln(h + ff, lp["n2_g"], lp["n2_b"])
    pooled = h.mean(axis=0)                                         # (B, H)
    y = pooled @ p["out_w"].T + p["out_b"]                          # (B, 1)
    return y.reshape(B)


if __name__ == "__main__":
    B, S = 2, 8
    key = jax.random.PRNGKey(0)
    kx, kp = jax.random.split(key)
    x = jax.random.normal(kx, (B, S, INPUT_SIZE), jnp.float32)

    torch_params = make_torch_params(kp)
    packed = pack_params(torch_params)

    y = transformer_forward(x, packed)
    jax.block_until_ready(y)
    assert y.shape == (B,) and y.dtype == jnp.float32

    y_ref = reference_forward(x, torch_params)
    jax.block_until_ready(y_ref)
    err = float(jnp.max(jnp.abs(y - y_ref)))
    assert err < 1e-2, f"kernel vs pure-JAX reference mismatch: max |diff| = {err}"

    print("KERNEL_OK")
</pallas_src>

<mosaic_0001>
module attributes {stable_mosaic.version = 11 : i64} {
  func.func @transformer_kernel(%arg0: i32, %arg1: memref<2x8x16xf32, #tpu.memory_space<vmem>>, %arg2: memref<16x64xf32, #tpu.memory_space<vmem>>, %arg3: memref<16x64x64xf32, #tpu.memory_space<vmem>>, %arg4: memref<25x64xf32, #tpu.memory_space<vmem>>, %arg5: memref<1x2x64xf32, #tpu.memory_space<vmem>>) attributes {dimension_semantics = [#tpu.dimension_semantics<parallel>], iteration_bounds = array<i64: 1>, scalar_prefetch = 0 : i64, scratch_operands = 0 : i64, tpu.core_type = #tpu.core_type<tc>, window_params = [{transform_indices = @transform_0, window_bounds = array<i64: 2, 8, 16>}, {pipeline_mode = #tpu.pipeline_mode<synchronous>, transform_indices = @transform_1, window_bounds = array<i64: 16, 64>}, {pipeline_mode = #tpu.pipeline_mode<synchronous>, transform_indices = @transform_2, window_bounds = array<i64: 16, 64, 64>}, {pipeline_mode = #tpu.pipeline_mode<synchronous>, transform_indices = @transform_3, window_bounds = array<i64: 25, 64>}, {transform_indices = @transform_4, window_bounds = array<i64: 1, 2, 64>}]} {
    %c0 = arith.constant 0 : index
    %c0_0 = arith.constant 0 : index
    %c0_1 = arith.constant 0 : index
    %0 = vector.load %arg1[%c0, %c0_0, %c0_1] : memref<2x8x16xf32, #tpu.memory_space<vmem>>, vector<2x8x16xf32>
    %1 = vector.shape_cast %0 : vector<2x8x16xf32> to vector<16x16xf32>
    %c0_2 = arith.constant 0 : index
    %c0_3 = arith.constant 0 : index
    %2 = vector.load %arg2[%c0_2, %c0_3] : memref<16x64xf32, #tpu.memory_space<vmem>>, vector<16x64xf32>
    %cst = arith.constant dense<0.000000e+00> : vector<16x64xf32>
    %3 = tpu.matmul %1, %2, %cst {dimension_numbers = #tpu.dot_dimension_numbers<[1], [0], [0], [1], [0, 0, 1, 1], [], []>} : vector<16x16xf32>, vector<16x64xf32>, vector<16x64xf32> -> vector<16x64xf32>
    %c0_4 = arith.constant 0 : index
    %c0_5 = arith.constant 0 : index
    %4 = vector.load %arg4[%c0_4, %c0_5] : memref<25x64xf32, #tpu.memory_space<vmem>>, vector<1x64xf32>
    %5 = vector.broadcast %4 : vector<1x64xf32> to vector<16x64xf32>
    %6 = arith.addf %3, %5 : vector<16x64xf32>
    %c0_6 = arith.constant 0 : index
    %c0_7 = arith.constant 0 : index
    %c0_8 = arith.constant 0 : index
    %7 = vector.load %arg3[%c0_6, %c0_7, %c0_8] : memref<16x64x64xf32, #tpu.memory_space<vmem>>, vector<1x64x64xf32>
    %8 = vector.shape_cast %7 : vector<1x64x64xf32> to vector<64x64xf32>
    %cst_9 = arith.constant dense<0.000000e+00> : vector<16x64xf32>
    %9 = tpu.matmul %6, %8, %cst_9 {dimension_numbers = #tpu.dot_dimension_numbers<[1], [0], [0], [1], [0, 0, 1, 1], [], []>} : vector<16x64xf32>, vector<64x64xf32>, vector<16x64xf32> -> vector<16x64xf32>
    %c1 = arith.constant 1 : index
    %c0_10 = arith.constant 0 : index
    %10 = vector.load %arg4[%c1, %c0_10] : memref<25x64xf32, #tpu.memory_space<vmem>>, vector<1x64xf32>
    %11 = vector.broadcast %10 : vector<1x64xf32> to vector<16x64xf32>
    %12 = arith.addf %9, %11 : vector<16x64xf32>
    %13 = vector.shape_cast %12 : vector<16x64xf32> to vector<2x8x64xf32>
    %c1_11 = arith.constant 1 : index
    %c0_12 = arith.constant 0 : index
    %c0_13 = arith.constant 0 : index
    %14 = vector.load %arg3[%c1_11, %c0_12, %c0_13] : memref<16x64x64xf32, #tpu.memory_space<vmem>>, vector<1x64x64xf32>
    %15 = vector.shape_cast %14 : vector<1x64x64xf32> to vector<64x64xf32>
    %cst_14 = arith.constant dense<0.000000e+00> : vector<16x64xf32>
    %16 = tpu.matmul %6, %15, %cst_14 {dimension_numbers = #tpu.dot_dimension_numbers<[1], [0], [0], [1], [0, 0, 1, 1], [], []>} : vector<16x64xf32>, vector<64x64xf32>, vector<16x64xf32> -> vector<16x64xf32>
    %c2 = arith.constant 2 : index
    %c0_15 = arith.constant 0 : index
    %17 = vector.load %arg4[%c2, %c0_15] : memref<25x64xf32, #tpu.memory_space<vmem>>, vector<1x64xf32>
    %18 = vector.broadcast %17 : vector<1x64xf32> to vector<16x64xf32>
    %19 = arith.addf %16, %18 : vector<16x64xf32>
    %20 = vector.shape_cast %19 : vector<16x64xf32> to vector<2x8x64xf32>
    %c2_16 = arith.constant 2 : index
    %c0_17 = arith.constant 0 : index
    %c0_18 = arith.constant 0 : index
    %21 = vector.load %arg3[%c2_16, %c0_17, %c0_18] : memref<16x64x64xf32, #tpu.memory_space<vmem>>, vector<1x64x64xf32>
    %22 = vector.shape_cast %21 : vector<1x64x64xf32> to vector<64x64xf32>
    %cst_19 = arith.constant dense<0.000000e+00> : vector<16x64xf32>
    %23 = tpu.matmul %6, %22, %cst_19 {dimension_numbers = #tpu.dot_dimension_numbers<[1], [0], [0], [1], [0, 0, 1, 1], [], []>} : vector<16x64xf32>, vector<64x64xf32>, vector<16x64xf32> -> vector<16x64xf32>
    %c3 = arith.constant 3 : index
    %c0_20 = arith.constant 0 : index
    %24 = vector.load %arg4[%c3, %c0_20] : memref<25x64xf32, #tpu.memory_space<vmem>>, vector<1x64xf32>
    %25 = vector.broadcast %24 : vector<1x64xf32> to vector<16x64xf32>
    %26 = arith.addf %23, %25 : vector<16x64xf32>
    %27 = vector.shape_cast %26 : vector<16x64xf32> to vector<2x8x64xf32>
    %28 = vector.extract_strided_slice %13 {offsets = [0, 0, 0], sizes = [2, 8, 16], strides = [1, 1, 1]} : vector<2x8x64xf32> to vector<2x8x16xf32>
    %29 = vector.extract_strided_slice %20 {offsets = [0, 0, 0], sizes = [2, 8, 16], strides = [1, 1, 1]} : vector<2x8x64xf32> to vector<2x8x16xf32>
    %30 = vector.extract_strided_slice %27 {offsets = [0, 0, 0], sizes = [2, 8, 16], strides = [1, 1, 1]} : vector<2x8x64xf32> to vector<2x8x16xf32>
    %cst_21 = arith.constant 2.500000e-01 : f32
    %31 = vector.broadcast %cst_21 : f32 to vector<2x8x16xf32>
    %32 = arith.mulf %28, %31 : vector<2x8x16xf32>
    "tpu.trace_start"() <{level = 10 : i32, message = "bqd,bkd->bqk"}> : () -> ()
    %cst_22 = arith.constant dense<0.000000e+00> : vector<2x8x8xf32>
    %33 = tpu.matmul %32, %29, %cst_22 {dimension_numbers = #tpu.dot_dimension_numbers<[2], [2], [1], [1], [0, 0, 0, 1, 1, 1], [0], [0]>} : vector<2x8x16xf32>, vector<2x8x16xf32>, vector<2x8x8xf32> -> vector<2x8x8xf32>
    "tpu.trace_stop"() : () -> ()
    %cst_23 = arith.constant dense<0xFF800000> : vector<2x8xf32>
    %34 = vector.multi_reduction <maximumf>, %33, %cst_23 [2] : vector<2x8x8xf32> to vector<2x8xf32>
    %35 = vector.shape_cast %34 : vector<2x8xf32> to vector<2x8x1xf32>
    %36 = vector.broadcast %35 : vector<2x8x1xf32> to vector<2x8x8xf32>
    %37 = arith.subf %33, %36 : vector<2x8x8xf32>
    %38 = math.exp %37 : vector<2x8x8xf32>
    %cst_24 = arith.constant dense<0.000000e+00> : vector<2x8xf32>
    %39 = vector.multi_reduction <add>, %38, %cst_24 [2] : vector<2x8x8xf32> to vector<2x8xf32>
    %40 = vector.shape_cast %39 : vector<2x8xf32> to vector<2x8x1xf32>
    %41 = tpu.reciprocal %40 {approx = true} : vector<2x8x1xf32> -> vector<2x8x1xf32>
    %42 = vector.broadcast %41 : vector<2x8x1xf32> to vector<2x8x8xf32>
    %43 = arith.mulf %38, %42 : vector<2x8x8xf32>
    "tpu.trace_start"() <{level = 10 : i32, message = "bqk,bkd->bqd"}> : () -> ()
    %cst_25 = arith.constant dense<0.000000e+00> : vector<2x8x16xf32>
    %44 = tpu.matmul %43, %30, %cst_25 {dimension_numbers = #tpu.dot_dimension_numbers<[2], [1], [1], [2], [0, 0, 0, 1, 1, 2], [0], [0]>} : vector<2x8x8xf32>, vector<2x8x16xf32>, vector<2x8x16xf32> -> vector<2x8x16xf32>
    "tpu.trace_stop"() : () -> ()
    %45 = vector.extract_strided_slice %13 {offsets = [0, 0, 16], sizes = [2, 8, 16], strides = [1, 1, 1]} : vector<2x8x64xf32> to vector<2x8x16xf32>
    %46 = vector.extract_strided_slice %20 {offsets = [0, 0, 16], sizes = [2, 8, 16], strides = [1, 1, 1]} : vector<2x8x64xf32> to vector<2x8x16xf32>
    %47 = vector.extract_strided_slice %27 {offsets = [0, 0, 16], sizes = [2, 8, 16], strides = [1, 1, 1]} : vector<2x8x64xf32> to vector<2x8x16xf32>
    %cst_26 = arith.constant 2.500000e-01 : f32
    %48 = vector.broadcast %cst_26 : f32 to vector<2x8x16xf32>
    %49 = arith.mulf %45, %48 : vector<2x8x16xf32>
    "tpu.trace_start"() <{level = 10 : i32, message = "bqd,bkd->bqk"}> : () -> ()
    %cst_27 = arith.constant dense<0.000000e+00> : vector<2x8x8xf32>
    %50 = tpu.matmul %49, %46, %cst_27 {dimension_numbers = #tpu.dot_dimension_numbers<[2], [2], [1], [1], [0, 0, 0, 1, 1, 1], [0], [0]>} : vector<2x8x16xf32>, vector<2x8x16xf32>, vector<2x8x8xf32> -> vector<2x8x8xf32>
    "tpu.trace_stop"() : () -> ()
    %cst_28 = arith.constant dense<0xFF800000> : vector<2x8xf32>
    %51 = vector.multi_reduction <maximumf>, %50, %cst_28 [2] : vector<2x8x8xf32> to vector<2x8xf32>
    %52 = vector.shape_cast %51 : vector<2x8xf32> to vector<2x8x1xf32>
    %53 = vector.broadcast %52 : vector<2x8x1xf32> to vector<2x8x8xf32>
    %54 = arith.subf %50, %53 : vector<2x8x8xf32>
    %55 = math.exp %54 : vector<2x8x8xf32>
    %cst_29 = arith.constant dense<0.000000e+00> : vector<2x8xf32>
    %56 = vector.multi_reduction <add>, %55, %cst_29 [2] : vector<2x8x8xf32> to vector<2x8xf32>
    %57 = vector.shape_cast %56 : vector<2x8xf32> to vector<2x8x1xf32>
    %58 = tpu.reciprocal %57 {approx = true} : vector<2x8x1xf32> -> vector<2x8x1xf32>
    %59 = vector.broadcast %58 : vector<2x8x1xf32> to vector<2x8x8xf32>
    %60 = arith.mulf %55, %59 : vector<2x8x8xf32>
    "tpu.trace_start"() <{level = 10 : i32, message = "bqk,bkd->bqd"}> : () -> ()
    %cst_30 = arith.constant dense<0.000000e+00> : vector<2x8x16xf32>
    %61 = tpu.matmul %60, %47, %cst_30 {dimension_numbers = #tpu.dot_dimension_numbers<[2], [1], [1], [2], [0, 0, 0, 1, 1, 2], [0], [0]>} : vector<2x8x8xf32>, vector<2x8x16xf32>, vector<2x8x16xf32> -> vector<2x8x16xf32>
    "tpu.trace_stop"() : () -> ()
    %62 = vector.extract_strided_slice %13 {offsets = [0, 0, 32], sizes = [2, 8, 16], strides = [1, 1, 1]} : vector<2x8x64xf32> to vector<2x8x16xf32>
    %63 = vector.extract_strided_slice %20 {offsets = [0, 0, 32], sizes = [2, 8, 16], strides = [1, 1, 1]} : vector<2x8x64xf32> to vector<2x8x16xf32>
    %64 = vector.extract_strided_slice %27 {offsets = [0, 0, 32], sizes = [2, 8, 16], strides = [1, 1, 1]} : vector<2x8x64xf32> to vector<2x8x16xf32>
    %cst_31 = arith.constant 2.500000e-01 : f32
    %65 = vector.broadcast %cst_31 : f32 to vector<2x8x16xf32>
    %66 = arith.mulf %62, %65 : vector<2x8x16xf32>
    "tpu.trace_start"() <{level = 10 : i32, message = "bqd,bkd->bqk"}> : () -> ()
    %cst_32 = arith.constant dense<0.000000e+00> : vector<2x8x8xf32>
    %67 = tpu.matmul %66, %63, %cst_32 {dimension_numbers = #tpu.dot_dimension_numbers<[2], [2], [1], [1], [0, 0, 0, 1, 1, 1], [0], [0]>} : vector<2x8x16xf32>, vector<2x8x16xf32>, vector<2x8x8xf32> -> vector<2x8x8xf32>
    "tpu.trace_stop"() : () -> ()
    %cst_33 = arith.constant dense<0xFF800000> : vector<2x8xf32>
    %68 = vector.multi_reduction <maximumf>, %67, %cst_33 [2] : vector<2x8x8xf32> to vector<2x8xf32>
    %69 = vector.shape_cast %68 : vector<2x8xf32> to vector<2x8x1xf32>
    %70 = vector.broadcast %69 : vector<2x8x1xf32> to vector<2x8x8xf32>
    %71 = arith.subf %67, %70 : vector<2x8x8xf32>
    %72 = math.exp %71 : vector<2x8x8xf32>
    %cst_34 = arith.constant dense<0.000000e+00> : vector<2x8xf32>
    %73 = vector.multi_reduction <add>, %72, %cst_34 [2] : vector<2x8x8xf32> to vector<2x8xf32>
    %74 = vector.shape_cast %73 : vector<2x8xf32> to vector<2x8x1xf32>
    %75 = tpu.reciprocal %74 {approx = true} : vector<2x8x1xf32> -> vector<2x8x1xf32>
    %76 = vector.broadcast %75 : vector<2x8x1xf32> to vector<2x8x8xf32>
    %77 = arith.mulf %72, %76 : vector<2x8x8xf32>
    "tpu.trace_start"() <{level = 10 : i32, message = "bqk,bkd->bqd"}> : () -> ()
    %cst_35 = arith.constant dense<0.000000e+00> : vector<2x8x16xf32>
    %78 = tpu.matmul %77, %64, %cst_35 {dimension_numbers = #tpu.dot_dimension_numbers<[2], [1], [1], [2], [0, 0, 0, 1, 1, 2], [0], [0]>} : vector<2x8x8xf32>, vector<2x8x16xf32>, vector<2x8x16xf32> -> vector<2x8x16xf32>
    "tpu.trace_stop"() : () -> ()
    %79 = vector.extract_strided_slice %13 {offsets = [0, 0, 48], sizes = [2, 8, 16], strides = [1, 1, 1]} : vector<2x8x64xf32> to vector<2x8x16xf32>
    %80 = vector.extract_strided_slice %20 {offsets = [0, 0, 48], sizes = [2, 8, 16], strides = [1, 1, 1]} : vector<2x8x64xf32> to vector<2x8x16xf32>
    %81 = vector.extract_strided_slice %27 {offsets = [0, 0, 48], sizes = [2, 8, 16], strides = [1, 1, 1]} : vector<2x8x64xf32> to vector<2x8x16xf32>
    %cst_36 = arith.constant 2.500000e-01 : f32
    %82 = vector.broadcast %cst_36 : f32 to vector<2x8x16xf32>
    %83 = arith.mulf %79, %82 : vector<2x8x16xf32>
    "tpu.trace_start"() <{level = 10 : i32, message = "bqd,bkd->bqk"}> : () -> ()
    %cst_37 = arith.constant dense<0.000000e+00> : vector<2x8x8xf32>
    %84 = tpu.matmul %83, %80, %cst_37 {dimension_numbers = #tpu.dot_dimension_numbers<[2], [2], [1], [1], [0, 0, 0, 1, 1, 1], [0], [0]>} : vector<2x8x16xf32>, vector<2x8x16xf32>, vector<2x8x8xf32> -> vector<2x8x8xf32>
    "tpu.trace_stop"() : () -> ()
    %cst_38 = arith.constant dense<0xFF800000> : vector<2x8xf32>
    %85 = vector.multi_reduction <maximumf>, %84, %cst_38 [2] : vector<2x8x8xf32> to vector<2x8xf32>
    %86 = vector.shape_cast %85 : vector<2x8xf32> to vector<2x8x1xf32>
    %87 = vector.broadcast %86 : vector<2x8x1xf32> to vector<2x8x8xf32>
    %88 = arith.subf %84, %87 : vector<2x8x8xf32>
    %89 = math.exp %88 : vector<2x8x8xf32>
    %cst_39 = arith.constant dense<0.000000e+00> : vector<2x8xf32>
    %90 = vector.multi_reduction <add>, %89, %cst_39 [2] : vector<2x8x8xf32> to vector<2x8xf32>
    %91 = vector.shape_cast %90 : vector<2x8xf32> to vector<2x8x1xf32>
    %92 = tpu.reciprocal %91 {approx = true} : vector<2x8x1xf32> -> vector<2x8x1xf32>
    %93 = vector.broadcast %92 : vector<2x8x1xf32> to vector<2x8x8xf32>
    %94 = arith.mulf %89, %93 : vector<2x8x8xf32>
    "tpu.trace_start"() <{level = 10 : i32, message = "bqk,bkd->bqd"}> : () -> ()
    %cst_40 = arith.constant dense<0.000000e+00> : vector<2x8x16xf32>
    %95 = tpu.matmul %94, %81, %cst_40 {dimension_numbers = #tpu.dot_dimension_numbers<[2], [1], [1], [2], [0, 0, 0, 1, 1, 2], [0], [0]>} : vector<2x8x8xf32>, vector<2x8x16xf32>, vector<2x8x16xf32> -> vector<2x8x16xf32>
    "tpu.trace_stop"() : () -> ()
    %96 = tpu.concatenate %44, %61, %78, %95 in 2 : vector<2x8x16xf32>, vector<2x8x16xf32>, vector<2x8x16xf32>, vector<2x8x16xf32> -> vector<2x8x64xf32>
    %97 = vector.shape_cast %96 : vector<2x8x64xf32> to vector<16x64xf32>
    %c9 = arith.constant 9 : index
    %c0_41 = arith.constant 0 : index
    %c0_42 = arith.constant 0 : index
    %98 = vector.load %arg3[%c9, %c0_41, %c0_42] : memref<16x64x64xf32, #tpu.memory_space<vmem>>, vector<1x64x64xf32>
    %99 = vector.shape_cast %98 : vector<1x64x64xf32> to vector<64x64xf32>
    %cst_43 = arith.constant dense<0.000000e+00> : vector<16x64xf32>
    %100 = tpu.matmul %97, %99, %cst_43 {dimension_numbers = #tpu.dot_dimension_numbers<[1], [0], [0], [1], [0, 0, 1, 1], [], []>} : vector<16x64xf32>, vector<64x64xf32>, vector<16x64xf32> -> vector<16x64xf32>
    %c4 = arith.constant 4 : index
    %c0_44 = arith.constant 0 : index
    %101 = vector.load %arg4[%c4, %c0_44] : memref<25x64xf32, #tpu.memory_space<vmem>>, vector<1x64xf32>
    %102 = vector.broadcast %101 : vector<1x64xf32> to vector<16x64xf32>
    %103 = arith.addf %100, %102 : vector<16x64xf32>
    %c3_45 = arith.constant 3 : index
    %c0_46 = arith.constant 0 : index
    %c0_47 = arith.constant 0 : index
    %104 = vector.load %arg3[%c3_45, %c0_46, %c0_47] : memref<16x64x64xf32, #tpu.memory_space<vmem>>, vector<1x64x64xf32>
    %105 = vector.shape_cast %104 : vector<1x64x64xf32> to vector<64x64xf32>
    %cst_48 = arith.constant dense<0.000000e+00> : vector<16x64xf32>
    %106 = tpu.matmul %103, %105, %cst_48 {dimension_numbers = #tpu.dot_dimension_numbers<[1], [0], [0], [1], [0, 0, 1, 1], [], []>} : vector<16x64xf32>, vector<64x64xf32>, vector<16x64xf32> -> vector<16x64xf32>
    %c5 = arith.constant 5 : index
    %c0_49 = arith.constant 0 : index
    %107 = vector.load %arg4[%c5, %c0_49] : memref<25x64xf32, #tpu.memory_space<vmem>>, vector<1x64xf32>
    %108 = vector.broadcast %107 : vector<1x64xf32> to vector<16x64xf32>
    %109 = arith.addf %106, %108 : vector<16x64xf32>
    %110 = vector.shape_cast %109 : vector<16x64xf32> to vector<2x8x64xf32>
    %c4_50 = arith.constant 4 : index
    %c0_51 = arith.constant 0 : index
    %c0_52 = arith.constant 0 : index
    %111 = vector.load %arg3[%c4_50, %c0_51, %c0_52] : memref<16x64x64xf32, #tpu.memory_space<vmem>>, vector<1x64x64xf32>
    %112 = vector.shape_cast %111 : vector<1x64x64xf32> to vector<64x64xf32>
    %cst_53 = arith.constant dense<0.000000e+00> : vector<16x64xf32>
    %113 = tpu.matmul %103, %112, %cst_53 {dimension_numbers = #tpu.dot_dimension_numbers<[1], [0], [0], [1], [0, 0, 1, 1], [], []>} : vector<16x64xf32>, vector<64x64xf32>, vector<16x64xf32> -> vector<16x64xf32>
    %c6 = arith.constant 6 : index
    %c0_54 = arith.constant 0 : index
    %114 = vector.load %arg4[%c6, %c0_54] : memref<25x64xf32, #tpu.memory_space<vmem>>, vector<1x64xf32>
    %115 = vector.broadcast %114 : vector<1x64xf32> to vector<16x64xf32>
    %116 = arith.addf %113, %115 : vector<16x64xf32>
    %117 = vector.shape_cast %116 : vector<16x64xf32> to vector<2x8x64xf32>
    %c5_55 = arith.constant 5 : index
    %c0_56 = arith.constant 0 : index
    %c0_57 = arith.constant 0 : index
    %118 = vector.load %arg3[%c5_55, %c0_56, %c0_57] : memref<16x64x64xf32, #tpu.memory_space<vmem>>, vector<1x64x64xf32>
    %119 = vector.shape_cast %118 : vector<1x64x64xf32> to vector<64x64xf32>
    %cst_58 = arith.constant dense<0.000000e+00> : vector<16x64xf32>
    %120 = tpu.matmul %103, %119, %cst_58 {dimension_numbers = #tpu.dot_dimension_numbers<[1], [0], [0], [1], [0, 0, 1, 1], [], []>} : vector<16x64xf32>, vector<64x64xf32>, vector<16x64xf32> -> vector<16x64xf32>
    %c7 = arith.constant 7 : index
    %c0_59 = arith.constant 0 : index
    %121 = vector.load %arg4[%c7, %c0_59] : memref<25x64xf32, #tpu.memory_space<vmem>>, vector<1x64xf32>
    %122 = vector.broadcast %121 : vector<1x64xf32> to vector<16x64xf32>
    %123 = arith.addf %120, %122 : vector<16x64xf32>
    %124 = vector.shape_cast %123 : vector<16x64xf32> to vector<2x8x64xf32>
    %125 = vector.extract_strided_slice %110 {offsets = [0, 0, 0], sizes = [2, 8, 16], strides = [1, 1, 1]} : vector<2x8x64xf32> to vector<2x8x16xf32>
    %126 = vector.extract_strided_slice %117 {offsets = [0, 0, 0], sizes = [2, 8, 16], strides = [1, 1, 1]} : vector<2x8x64xf32> to vector<2x8x16xf32>
    %127 = vector.extract_strided_slice %124 {offsets = [0, 0, 0], sizes = [2, 8, 16], strides = [1, 1, 1]} : vector<2x8x64xf32> to vector<2x8x16xf32>
    %cst_60 = arith.constant 2.500000e-01 : f32
    %128 = vector.broadcast %cst_60 : f32 to vector<2x8x16xf32>
    %129 = arith.mulf %125, %128 : vector<2x8x16xf32>
    "tpu.trace_start"() <{level = 10 : i32, message = "bqd,bkd->bqk"}> : () -> ()
    %cst_61 = arith.constant dense<0.000000e+00> : vector<2x8x8xf32>
    %130 = tpu.matmul %129, %126, %cst_61 {dimension_numbers = #tpu.dot_dimension_numbers<[2], [2], [1], [1], [0, 0, 0, 1, 1, 1], [0], [0]>} : vector<2x8x16xf32>, vector<2x8x16xf32>, vector<2x8x8xf32> -> vector<2x8x8xf32>
    "tpu.trace_stop"() : () -> ()
    %cst_62 = arith.constant dense<0xFF800000> : vector<2x8xf32>
    %131 = vector.multi_reduction <maximumf>, %130, %cst_62 [2] : vector<2x8x8xf32> to vector<2x8xf32>
    %132 = vector.shape_cast %131 : vector<2x8xf32> to vector<2x8x1xf32>
    %133 = vector.broadcast %132 : vector<2x8x1xf32> to vector<2x8x8xf32>
    %134 = arith.subf %130, %133 : vector<2x8x8xf32>
    %135 = math.exp %134 : vector<2x8x8xf32>
    %cst_63 = arith.constant dense<0.000000e+00> : vector<2x8xf32>
    %136 = vector.multi_reduction <add>, %135, %cst_63 [2] : vector<2x8x8xf32> to vector<2x8xf32>
    %137 = vector.shape_cast %136 : vector<2x8xf32> to vector<2x8x1xf32>
    %138 = tpu.reciprocal %137 {approx = true} : vector<2x8x1xf32> -> vector<2x8x1xf32>
    %139 = vector.broadcast %138 : vector<2x8x1xf32> to vector<2x8x8xf32>
    %140 = arith.mulf %135, %139 : vector<2x8x8xf32>
    "tpu.trace_start"() <{level = 10 : i32, message = "bqk,bkd->bqd"}> : () -> ()
    %cst_64 = arith.constant dense<0.000000e+00> : vector<2x8x16xf32>
    %141 = tpu.matmul %140, %127, %cst_64 {dimension_numbers = #tpu.dot_dimension_numbers<[2], [1], [1], [2], [0, 0, 0, 1, 1, 2], [0], [0]>} : vector<2x8x8xf32>, vector<2x8x16xf32>, vector<2x8x16xf32> -> vector<2x8x16xf32>
    "tpu.trace_stop"() : () -> ()
    %142 = vector.extract_strided_slice %110 {offsets = [0, 0, 16], sizes = [2, 8, 16], strides = [1, 1, 1]} : vector<2x8x64xf32> to vector<2x8x16xf32>
    %143 = vector.extract_strided_slice %117 {offsets = [0, 0, 16], sizes = [2, 8, 16], strides = [1, 1, 1]} : vector<2x8x64xf32> to vector<2x8x16xf32>
    %144 = vector.extract_strided_slice %124 {offsets = [0, 0, 16], sizes = [2, 8, 16], strides = [1, 1, 1]} : vector<2x8x64xf32> to vector<2x8x16xf32>
    %cst_65 = arith.constant 2.500000e-01 : f32
    %145 = vector.broadcast %cst_65 : f32 to vector<2x8x16xf32>
    %146 = arith.mulf %142, %145 : vector<2x8x16xf32>
    "tpu.trace_start"() <{level = 10 : i32, message = "bqd,bkd->bqk"}> : () -> ()
    %cst_66 = arith.constant dense<0.000000e+00> : vector<2x8x8xf32>
    %147 = tpu.matmul %146, %143, %cst_66 {dimension_numbers = #tpu.dot_dimension_numbers<[2], [2], [1], [1], [0, 0, 0, 1, 1, 1], [0], [0]>} : vector<2x8x16xf32>, vector<2x8x16xf32>, vector<2x8x8xf32> -> vector<2x8x8xf32>
    "tpu.trace_stop"() : () -> ()
    %cst_67 = arith.constant dense<0xFF800000> : vector<2x8xf32>
    %148 = vector.multi_reduction <maximumf>, %147, %cst_67 [2] : vector<2x8x8xf32> to vector<2x8xf32>
    %149 = vector.shape_cast %148 : vector<2x8xf32> to vector<2x8x1xf32>
    %150 = vector.broadcast %149 : vector<2x8x1xf32> to vector<2x8x8xf32>
    %151 = arith.subf %147, %150 : vector<2x8x8xf32>
    %152 = math.exp %151 : vector<2x8x8xf32>
    %cst_68 = arith.constant dense<0.000000e+00> : vector<2x8xf32>
    %153 = vector.multi_reduction <add>, %152, %cst_68 [2] : vector<2x8x8xf32> to vector<2x8xf32>
    %154 = vector.shape_cast %153 : vector<2x8xf32> to vector<2x8x1xf32>
    %155 = tpu.reciprocal %154 {approx = true} : vector<2x8x1xf32> -> vector<2x8x1xf32>
    %156 = vector.broadcast %155 : vector<2x8x1xf32> to vector<2x8x8xf32>
    %157 = arith.mulf %152, %156 : vector<2x8x8xf32>
    "tpu.trace_start"() <{level = 10 : i32, message = "bqk,bkd->bqd"}> : () -> ()
    %cst_69 = arith.constant dense<0.000000e+00> : vector<2x8x16xf32>
    %158 = tpu.matmul %157, %144, %cst_69 {dimension_numbers = #tpu.dot_dimension_numbers<[2], [1], [1], [2], [0, 0, 0, 1, 1, 2], [0], [0]>} : vector<2x8x8xf32>, vector<2x8x16xf32>, vector<2x8x16xf32> -> vector<2x8x16xf32>
    "tpu.trace_stop"() : () -> ()
    %159 = vector.extract_strided_slice %110 {offsets = [0, 0, 32], sizes = [2, 8, 16], strides = [1, 1, 1]} : vector<2x8x64xf32> to vector<2x8x16xf32>
    %160 = vector.extract_strided_slice %117 {offsets = [0, 0, 32], sizes = [2, 8, 16], strides = [1, 1, 1]} : vector<2x8x64xf32> to vector<2x8x16xf32>
    %161 = vector.extract_strided_slice %124 {offsets = [0, 0, 32], sizes = [2, 8, 16], strides = [1, 1, 1]} : vector<2x8x64xf32> to vector<2x8x16xf32>
    %cst_70 = arith.constant 2.500000e-01 : f32
    %162 = vector.broadcast %cst_70 : f32 to vector<2x8x16xf32>
    %163 = arith.mulf %159, %162 : vector<2x8x16xf32>
    "tpu.trace_start"() <{level = 10 : i32, message = "bqd,bkd->bqk"}> : () -> ()
    %cst_71 = arith.constant dense<0.000000e+00> : vector<2x8x8xf32>
    %164 = tpu.matmul %163, %160, %cst_71 {dimension_numbers = #tpu.dot_dimension_numbers<[2], [2], [1], [1], [0, 0, 0, 1, 1, 1], [0], [0]>} : vector<2x8x16xf32>, vector<2x8x16xf32>, vector<2x8x8xf32> -> vector<2x8x8xf32>
    "tpu.trace_stop"() : () -> ()
    %cst_72 = arith.constant dense<0xFF800000> : vector<2x8xf32>
    %165 = vector.multi_reduction <maximumf>, %164, %cst_72 [2] : vector<2x8x8xf32> to vector<2x8xf32>
    %166 = vector.shape_cast %165 : vector<2x8xf32> to vector<2x8x1xf32>
    %167 = vector.broadcast %166 : vector<2x8x1xf32> to vector<2x8x8xf32>
    %168 = arith.subf %164, %167 : vector<2x8x8xf32>
    %169 = math.exp %168 : vector<2x8x8xf32>
    %cst_73 = arith.constant dense<0.000000e+00> : vector<2x8xf32>
    %170 = vector.multi_reduction <add>, %169, %cst_73 [2] : vector<2x8x8xf32> to vector<2x8xf32>
    %171 = vector.shape_cast %170 : vector<2x8xf32> to vector<2x8x1xf32>
    %172 = tpu.reciprocal %171 {approx = true} : vector<2x8x1xf32> -> vector<2x8x1xf32>
    %173 = vector.broadcast %172 : vector<2x8x1xf32> to vector<2x8x8xf32>
    %174 = arith.mulf %169, %173 : vector<2x8x8xf32>
    "tpu.trace_start"() <{level = 10 : i32, message = "bqk,bkd->bqd"}> : () -> ()
    %cst_74 = arith.constant dense<0.000000e+00> : vector<2x8x16xf32>
    %175 = tpu.matmul %174, %161, %cst_74 {dimension_numbers = #tpu.dot_dimension_numbers<[2], [1], [1], [2], [0, 0, 0, 1, 1, 2], [0], [0]>} : vector<2x8x8xf32>, vector<2x8x16xf32>, vector<2x8x16xf32> -> vector<2x8x16xf32>
    "tpu.trace_stop"() : () -> ()
    %176 = vector.extract_strided_slice %110 {offsets = [0, 0, 48], sizes = [2, 8, 16], strides = [1, 1, 1]} : vector<2x8x64xf32> to vector<2x8x16xf32>
    %177 = vector.extract_strided_slice %117 {offsets = [0, 0, 48], sizes = [2, 8, 16], strides = [1, 1, 1]} : vector<2x8x64xf32> to vector<2x8x16xf32>
    %178 = vector.extract_strided_slice %124 {offsets = [0, 0, 48], sizes = [2, 8, 16], strides = [1, 1, 1]} : vector<2x8x64xf32> to vector<2x8x16xf32>
    %cst_75 = arith.constant 2.500000e-01 : f32
    %179 = vector.broadcast %cst_75 : f32 to vector<2x8x16xf32>
    %180 = arith.mulf %176, %179 : vector<2x8x16xf32>
    "tpu.trace_start"() <{level = 10 : i32, message = "bqd,bkd->bqk"}> : () -> ()
    %cst_76 = arith.constant dense<0.000000e+00> : vector<2x8x8xf32>
    %181 = tpu.matmul %180, %177, %cst_76 {dimension_numbers = #tpu.dot_dimension_numbers<[2], [2], [1], [1], [0, 0, 0, 1, 1, 1], [0], [0]>} : vector<2x8x16xf32>, vector<2x8x16xf32>, vector<2x8x8xf32> -> vector<2x8x8xf32>
    "tpu.trace_stop"() : () -> ()
    %cst_77 = arith.constant dense<0xFF800000> : vector<2x8xf32>
    %182 = vector.multi_reduction <maximumf>, %181, %cst_77 [2] : vector<2x8x8xf32> to vector<2x8xf32>
    %183 = vector.shape_cast %182 : vector<2x8xf32> to vector<2x8x1xf32>
    %184 = vector.broadcast %183 : vector<2x8x1xf32> to vector<2x8x8xf32>
    %185 = arith.subf %181, %184 : vector<2x8x8xf32>
    %186 = math.exp %185 : vector<2x8x8xf32>
    %cst_78 = arith.constant dense<0.000000e+00> : vector<2x8xf32>
    %187 = vector.multi_reduction <add>, %186, %cst_78 [2] : vector<2x8x8xf32> to vector<2x8xf32>
    %188 = vector.shape_cast %187 : vector<2x8xf32> to vector<2x8x1xf32>
    %189 = tpu.reciprocal %188 {approx = true} : vector<2x8x1xf32> -> vector<2x8x1xf32>
    %190 = vector.broadcast %189 : vector<2x8x1xf32> to vector<2x8x8xf32>
    %191 = arith.mulf %186, %190 : vector<2x8x8xf32>
    "tpu.trace_start"() <{level = 10 : i32, message = "bqk,bkd->bqd"}> : () -> ()
    %cst_79 = arith.constant dense<0.000000e+00> : vector<2x8x16xf32>
    %192 = tpu.matmul %191, %178, %cst_79 {dimension_numbers = #tpu.dot_dimension_numbers<[2], [1], [1], [2], [0, 0, 0, 1, 1, 2], [0], [0]>} : vector<2x8x8xf32>, vector<2x8x16xf32>, vector<2x8x16xf32> -> vector<2x8x16xf32>
    "tpu.trace_stop"() : () -> ()
    %193 = tpu.concatenate %141, %158, %175, %192 in 2 : vector<2x8x16xf32>, vector<2x8x16xf32>, vector<2x8x16xf32>, vector<2x8x16xf32> -> vector<2x8x64xf32>
    %194 = vector.shape_cast %193 : vector<2x8x64xf32> to vector<16x64xf32>
    %c10 = arith.constant 10 : index
    %c0_80 = arith.constant 0 : index
    %c0_81 = arith.constant 0 : index
    %195 = vector.load %arg3[%c10, %c0_80, %c0_81] : memref<16x64x64xf32, #tpu.memory_space<vmem>>, vector<1x64x64xf32>
    %196 = vector.shape_cast %195 : vector<1x64x64xf32> to vector<64x64xf32>
    %cst_82 = arith.constant dense<0.000000e+00> : vector<16x64xf32>
    %197 = tpu.matmul %194, %196, %cst_82 {dimension_numbers = #tpu.dot_dimension_numbers<[1], [0], [0], [1], [0, 0, 1, 1], [], []>} : vector<16x64xf32>, vector<64x64xf32>, vector<16x64xf32> -> vector<16x64xf32>
    %c8 = arith.constant 8 : index
    %c0_83 = arith.constant 0 : index
    %198 = vector.load %arg4[%c8, %c0_83] : memref<25x64xf32, #tpu.memory_space<vmem>>, vector<1x64xf32>
    %199 = vector.broadcast %198 : vector<1x64xf32> to vector<16x64xf32>
    %200 = arith.addf %197, %199 : vector<16x64xf32>
    %201 = arith.addf %103, %200 : vector<16x64xf32>
    %c15 = arith.constant 15 : index
    %c0_84 = arith.constant 0 : index
    %202 = vector.load %arg4[%c15, %c0_84] : memref<25x64xf32, #tpu.memory_space<vmem>>, vector<1x64xf32>
    %c16 = arith.constant 16 : index
    %c0_85 = arith.constant 0 : index
    %203 = vector.load %arg4[%c16, %c0_85] : memref<25x64xf32, #tpu.memory_space<vmem>>, vector<1x64xf32>
    %cst_86 = arith.constant dense<0.000000e+00> : vector<16xf32>
    %204 = vector.multi_reduction <add>, %201, %cst_86 [1] : vector<16x64xf32> to vector<16xf32>
    %205 = vector.shape_cast %204 : vector<16xf32> to vector<16x1xf32>
    %cst_87 = arith.constant 6.400000e+01 : f32
    %206 = vector.broadcast %cst_87 : f32 to vector<16x1xf32>
    %207 = arith.divf %205, %206 : vector<16x1xf32>
    %208 = vector.broadcast %207 : vector<16x1xf32> to vector<16x64xf32>
    %209 = arith.subf %201, %208 : vector<16x64xf32>
    %210 = arith.mulf %209, %209 : vector<16x64xf32>
    %cst_88 = arith.constant dense<0.000000e+00> : vector<16xf32>
    %211 = vector.multi_reduction <add>, %210, %cst_88 [1] : vector<16x64xf32> to vector<16xf32>
    %212 = vector.shape_cast %211 : vector<16xf32> to vector<16x1xf32>
    %cst_89 = arith.constant 6.400000e+01 : f32
    %213 = vector.broadcast %cst_89 : f32 to vector<16x1xf32>
    %214 = arith.divf %212, %213 : vector<16x1xf32>
    %215 = vector.broadcast %207 : vector<16x1xf32> to vector<16x64xf32>
    %216 = arith.subf %201, %215 : vector<16x64xf32>
    %cst_90 = arith.constant 9.99999974E-6 : f32
    %217 = vector.broadcast %cst_90 : f32 to vector<16x1xf32>
    %218 = arith.addf %214, %217 : vector<16x1xf32>
    %219 = math.rsqrt %218 : vector<16x1xf32>
    %220 = vector.broadcast %219 : vector<16x1xf32> to vector<16x64xf32>
    %221 = arith.mulf %216, %220 : vector<16x64xf32>
    %222 = vector.broadcast %202 : vector<1x64xf32> to vector<16x64xf32>
    %223 = arith.mulf %221, %222 : vector<16x64xf32>
    %224 = vector.broadcast %203 : vector<1x64xf32> to vector<16x64xf32>
    %225 = arith.addf %223, %224 : vector<16x64xf32>
    %c12 = arith.constant 12 : index
    %c0_91 = arith.constant 0 : index
    %c0_92 = arith.constant 0 : index
    %226 = vector.load %arg3[%c12, %c0_91, %c0_92] : memref<16x64x64xf32, #tpu.memory_space<vmem>>, vector<1x64x64xf32>
    %227 = vector.shape_cast %226 : vector<1x64x64xf32> to vector<64x64xf32>
    %cst_93 = arith.constant dense<0.000000e+00> : vector<16x64xf32>
    %228 = tpu.matmul %225, %227, %cst_93 {dimension_numbers = #tpu.dot_dimension_numbers<[1], [0], [0], [1], [0, 0, 1, 1], [], []>} : vector<16x64xf32>, vector<64x64xf32>, vector<16x64xf32> -> vector<16x64xf32>
    %c13 = arith.constant 13 : index
    %c0_94 = arith.constant 0 : index
    %229 = vector.load %arg4[%c13, %c0_94] : memref<25x64xf32, #tpu.memory_space<vmem>>, vector<1x64xf32>
    %230 = vector.broadcast %229 : vector<1x64xf32> to vector<16x64xf32>
    %231 = arith.addf %228, %230 : vector<16x64xf32>
    %cst_95 = arith.constant 0.000000e+00 : f32
    %232 = vector.broadcast %cst_95 : f32 to vector<16x64xf32>
    %233 = arith.maximumf %231, %232 : vector<16x64xf32>
    %c13_96 = arith.constant 13 : index
    %c0_97 = arith.constant 0 : index
    %c0_98 = arith.constant 0 : index
    %234 = vector.load %arg3[%c13_96, %c0_97, %c0_98] : memref<16x64x64xf32, #tpu.memory_space<vmem>>, vector<1x64x64xf32>
    %235 = vector.shape_cast %234 : vector<1x64x64xf32> to vector<64x64xf32>
    %cst_99 = arith.constant dense<0.000000e+00> : vector<16x64xf32>
    %236 = tpu.matmul %233, %235, %cst_99 {dimension_numbers = #tpu.dot_dimension_numbers<[1], [0], [0], [1], [0, 0, 1, 1], [], []>} : vector<16x64xf32>, vector<64x64xf32>, vector<16x64xf32> -> vector<16x64xf32>
    %c14 = arith.constant 14 : index
    %c0_100 = arith.constant 0 : index
    %237 = vector.load %arg4[%c14, %c0_100] : memref<25x64xf32, #tpu.memory_space<vmem>>, vector<1x64xf32>
    %238 = vector.broadcast %237 : vector<1x64xf32> to vector<16x64xf32>
    %239 = arith.addf %236, %238 : vector<16x64xf32>
    %240 = arith.addf %225, %239 : vector<16x64xf32>
    %c17 = arith.constant 17 : index
    %c0_101 = arith.constant 0 : index
    %241 = vector.load %arg4[%c17, %c0_101] : memref<25x64xf32, #tpu.memory_space<vmem>>, vector<1x64xf32>
    %c18 = arith.constant 18 : index
    %c0_102 = arith.constant 0 : index
    %242 = vector.load %arg4[%c18, %c0_102] : memref<25x64xf32, #tpu.memory_space<vmem>>, vector<1x64xf32>
    %cst_103 = arith.constant dense<0.000000e+00> : vector<16xf32>
    %243 = vector.multi_reduction <add>, %240, %cst_103 [1] : vector<16x64xf32> to vector<16xf32>
    %244 = vector.shape_cast %243 : vector<16xf32> to vector<16x1xf32>
    %cst_104 = arith.constant 6.400000e+01 : f32
    %245 = vector.broadcast %cst_104 : f32 to vector<16x1xf32>
    %246 = arith.divf %244, %245 : vector<16x1xf32>
    %247 = vector.broadcast %246 : vector<16x1xf32> to vector<16x64xf32>
    %248 = arith.subf %240, %247 : vector<16x64xf32>
    %249 = arith.mulf %248, %248 : vector<16x64xf32>
    %cst_105 = arith.constant dense<0.000000e+00> : vector<16xf32>
    %250 = vector.multi_reduction <add>, %249, %cst_105 [1] : vector<16x64xf32> to vector<16xf32>
    %251 = vector.shape_cast %250 : vector<16xf32> to vector<16x1xf32>
    %cst_106 = arith.constant 6.400000e+01 : f32
    %252 = vector.broadcast %cst_106 : f32 to vector<16x1xf32>
    %253 = arith.divf %251, %252 : vector<16x1xf32>
    %254 = vector.broadcast %246 : vector<16x1xf32> to vector<16x64xf32>
    %255 = arith.subf %240, %254 : vector<16x64xf32>
    %cst_107 = arith.constant 9.99999974E-6 : f32
    %256 = vector.broadcast %cst_107 : f32 to vector<16x1xf32>
    %257 = arith.addf %253, %256 : vector<16x1xf32>
    %258 = math.rsqrt %257 : vector<16x1xf32>
    %259 = vector.broadcast %258 : vector<16x1xf32> to vector<16x64xf32>
    %260 = arith.mulf %255, %259 : vector<16x64xf32>
    %261 = vector.broadcast %241 : vector<1x64xf32> to vector<16x64xf32>
    %262 = arith.mulf %260, %261 : vector<16x64xf32>
    %263 = vector.broadcast %242 : vector<1x64xf32> to vector<16x64xf32>
    %264 = arith.addf %262, %263 : vector<16x64xf32>
    %c6_108 = arith.constant 6 : index
    %c0_109 = arith.constant 0 : index
    %c0_110 = arith.constant 0 : index
    %265 = vector.load %arg3[%c6_108, %c0_109, %c0_110] : memref<16x64x64xf32, #tpu.memory_space<vmem>>, vector<1x64x64xf32>
    %266 = vector.shape_cast %265 : vector<1x64x64xf32> to vector<64x64xf32>
    %cst_111 = arith.constant dense<0.000000e+00> : vector<16x64xf32>
    %267 = tpu.matmul %264, %266, %cst_111 {dimension_numbers = #tpu.dot_dimension_numbers<[1], [0], [0], [1], [0, 0, 1, 1], [], []>} : vector<16x64xf32>, vector<64x64xf32>, vector<16x64xf32> -> vector<16x64xf32>
    %c9_112 = arith.constant 9 : index
    %c0_113 = arith.constant 0 : index
    %268 = vector.load %arg4[%c9_112, %c0_113] : memref<25x64xf32, #tpu.memory_space<vmem>>, vector<1x64xf32>
    %269 = vector.broadcast %268 : vector<1x64xf32> to vector<16x64xf32>
    %270 = arith.addf %267, %269 : vector<16x64xf32>
    %271 = vector.shape_cast %270 : vector<16x64xf32> to vector<2x8x64xf32>
    %c7_114 = arith.constant 7 : index
    %c0_115 = arith.constant 0 : index
    %c0_116 = arith.constant 0 : index
    %272 = vector.load %arg3[%c7_114, %c0_115, %c0_116] : memref<16x64x64xf32, #tpu.memory_space<vmem>>, vector<1x64x64xf32>
    %273 = vector.shape_cast %272 : vector<1x64x64xf32> to vector<64x64xf32>
    %cst_117 = arith.constant dense<0.000000e+00> : vector<16x64xf32>
    %274 = tpu.matmul %264, %273, %cst_117 {dimension_numbers = #tpu.dot_dimension_numbers<[1], [0], [0], [1], [0, 0, 1, 1], [], []>} : vector<16x64xf32>, vector<64x64xf32>, vector<16x64xf32> -> vector<16x64xf32>
    %c10_118 = arith.constant 10 : index
    %c0_119 = arith.constant 0 : index
    %275 = vector.load %arg4[%c10_118, %c0_119] : memref<25x64xf32, #tpu.memory_space<vmem>>, vector<1x64xf32>
    %276 = vector.broadcast %275 : vector<1x64xf32> to vector<16x64xf32>
    %277 = arith.addf %274, %276 : vector<16x64xf32>
    %278 = vector.shape_cast %277 : vector<16x64xf32> to vector<2x8x64xf32>
    %c8_120 = arith.constant 8 : index
    %c0_121 = arith.constant 0 : index
    %c0_122 = arith.constant 0 : index
    %279 = vector.load %arg3[%c8_120, %c0_121, %c0_122] : memref<16x64x64xf32, #tpu.memory_space<vmem>>, vector<1x64x64xf32>
    %280 = vector.shape_cast %279 : vector<1x64x64xf32> to vector<64x64xf32>
    %cst_123 = arith.constant dense<0.000000e+00> : vector<16x64xf32>
    %281 = tpu.matmul %264, %280, %cst_123 {dimension_numbers = #tpu.dot_dimension_numbers<[1], [0], [0], [1], [0, 0, 1, 1], [], []>} : vector<16x64xf32>, vector<64x64xf32>, vector<16x64xf32> -> vector<16x64xf32>
    %c11 = arith.constant 11 : index
    %c0_124 = arith.constant 0 : index
    %282 = vector.load %arg4[%c11, %c0_124] : memref<25x64xf32, #tpu.memory_space<vmem>>, vector<1x64xf32>
    %283 = vector.broadcast %282 : vector<1x64xf32> to vector<16x64xf32>
    %284 = arith.addf %281, %283 : vector<16x64xf32>
    %285 = vector.shape_cast %284 : vector<16x64xf32> to vector<2x8x64xf32>
    %286 = vector.extract_strided_slice %271 {offsets = [0, 0, 0], sizes = [2, 8, 16], strides = [1, 1, 1]} : vector<2x8x64xf32> to vector<2x8x16xf32>
    %287 = vector.extract_strided_slice %278 {offsets = [0, 0, 0], sizes = [2, 8, 16], strides = [1, 1, 1]} : vector<2x8x64xf32> to vector<2x8x16xf32>
    %288 = vector.extract_strided_slice %285 {offsets = [0, 0, 0], sizes = [2, 8, 16], strides = [1, 1, 1]} : vector<2x8x64xf32> to vector<2x8x16xf32>
    %cst_125 = arith.constant 2.500000e-01 : f32
    %289 = vector.broadcast %cst_125 : f32 to vector<2x8x16xf32>
    %290 = arith.mulf %286, %289 : vector<2x8x16xf32>
    "tpu.trace_start"() <{level = 10 : i32, message = "bqd,bkd->bqk"}> : () -> ()
    %cst_126 = arith.constant dense<0.000000e+00> : vector<2x8x8xf32>
    %291 = tpu.matmul %290, %287, %cst_126 {dimension_numbers = #tpu.dot_dimension_numbers<[2], [2], [1], [1], [0, 0, 0, 1, 1, 1], [0], [0]>} : vector<2x8x16xf32>, vector<2x8x16xf32>, vector<2x8x8xf32> -> vector<2x8x8xf32>
    "tpu.trace_stop"() : () -> ()
    %cst_127 = arith.constant dense<0xFF800000> : vector<2x8xf32>
    %292 = vector.multi_reduction <maximumf>, %291, %cst_127 [2] : vector<2x8x8xf32> to vector<2x8xf32>
    %293 = vector.shape_cast %292 : vector<2x8xf32> to vector<2x8x1xf32>
    %294 = vector.broadcast %293 : vector<2x8x1xf32> to vector<2x8x8xf32>
    %295 = arith.subf %291, %294 : vector<2x8x8xf32>
    %296 = math.exp %295 : vector<2x8x8xf32>
    %cst_128 = arith.constant dense<0.000000e+00> : vector<2x8xf32>
    %297 = vector.multi_reduction <add>, %296, %cst_128 [2] : vector<2x8x8xf32> to vector<2x8xf32>
    %298 = vector.shape_cast %297 : vector<2x8xf32> to vector<2x8x1xf32>
    %299 = tpu.reciprocal %298 {approx = true} : vector<2x8x1xf32> -> vector<2x8x1xf32>
    %300 = vector.broadcast %299 : vector<2x8x1xf32> to vector<2x8x8xf32>
    %301 = arith.mulf %296, %300 : vector<2x8x8xf32>
    "tpu.trace_start"() <{level = 10 : i32, message = "bqk,bkd->bqd"}> : () -> ()
    %cst_129 = arith.constant dense<0.000000e+00> : vector<2x8x16xf32>
    %302 = tpu.matmul %301, %288, %cst_129 {dimension_numbers = #tpu.dot_dimension_numbers<[2], [1], [1], [2], [0, 0, 0, 1, 1, 2], [0], [0]>} : vector<2x8x8xf32>, vector<2x8x16xf32>, vector<2x8x16xf32> -> vector<2x8x16xf32>
    "tpu.trace_stop"() : () -> ()
    %303 = vector.extract_strided_slice %271 {offsets = [0, 0, 16], sizes = [2, 8, 16], strides = [1, 1, 1]} : vector<2x8x64xf32> to vector<2x8x16xf32>
    %304 = vector.extract_strided_slice %278 {offsets = [0, 0, 16], sizes = [2, 8, 16], strides = [1, 1, 1]} : vector<2x8x64xf32> to vector<2x8x16xf32>
    %305 = vector.extract_strided_slice %285 {offsets = [0, 0, 16], sizes = [2, 8, 16], strides = [1, 1, 1]} : vector<2x8x64xf32> to vector<2x8x16xf32>
    %cst_130 = arith.constant 2.500000e-01 : f32
    %306 = vector.broadcast %cst_130 : f32 to vector<2x8x16xf32>
    %307 = arith.mulf %303, %306 : vector<2x8x16xf32>
    "tpu.trace_start"() <{level = 10 : i32, message = "bqd,bkd->bqk"}> : () -> ()
    %cst_131 = arith.constant dense<0.000000e+00> : vector<2x8x8xf32>
    %308 = tpu.matmul %307, %304, %cst_131 {dimension_numbers = #tpu.dot_dimension_numbers<[2], [2], [1], [1], [0, 0, 0, 1, 1, 1], [0], [0]>} : vector<2x8x16xf32>, vector<2x8x16xf32>, vector<2x8x8xf32> -> vector<2x8x8xf32>
    "tpu.trace_stop"() : () -> ()
    %cst_132 = arith.constant dense<0xFF800000> : vector<2x8xf32>
    %309 = vector.multi_reduction <maximumf>, %308, %cst_132 [2] : vector<2x8x8xf32> to vector<2x8xf32>
    %310 = vector.shape_cast %309 : vector<2x8xf32> to vector<2x8x1xf32>
    %311 = vector.broadcast %310 : vector<2x8x1xf32> to vector<2x8x8xf32>
    %312 = arith.subf %308, %311 : vector<2x8x8xf32>
    %313 = math.exp %312 : vector<2x8x8xf32>
    %cst_133 = arith.constant dense<0.000000e+00> : vector<2x8xf32>
    %314 = vector.multi_reduction <add>, %313, %cst_133 [2] : vector<2x8x8xf32> to vector<2x8xf32>
    %315 = vector.shape_cast %314 : vector<2x8xf32> to vector<2x8x1xf32>
    %316 = tpu.reciprocal %315 {approx = true} : vector<2x8x1xf32> -> vector<2x8x1xf32>
    %317 = vector.broadcast %316 : vector<2x8x1xf32> to vector<2x8x8xf32>
    %318 = arith.mulf %313, %317 : vector<2x8x8xf32>
    "tpu.trace_start"() <{level = 10 : i32, message = "bqk,bkd->bqd"}> : () -> ()
    %cst_134 = arith.constant dense<0.000000e+00> : vector<2x8x16xf32>
    %319 = tpu.matmul %318, %305, %cst_134 {dimension_numbers = #tpu.dot_dimension_numbers<[2], [1], [1], [2], [0, 0, 0, 1, 1, 2], [0], [0]>} : vector<2x8x8xf32>, vector<2x8x16xf32>, vector<2x8x16xf32> -> vector<2x8x16xf32>
    "tpu.trace_stop"() : () -> ()
    %320 = vector.extract_strided_slice %271 {offsets = [0, 0, 32], sizes = [2, 8, 16], strides = [1, 1, 1]} : vector<2x8x64xf32> to vector<2x8x16xf32>
    %321 = vector.extract_strided_slice %278 {offsets = [0, 0, 32], sizes = [2, 8, 16], strides = [1, 1, 1]} : vector<2x8x64xf32> to vector<2x8x16xf32>
    %322 = vector.extract_strided_slice %285 {offsets = [0, 0, 32], sizes = [2, 8, 16], strides = [1, 1, 1]} : vector<2x8x64xf32> to vector<2x8x16xf32>
    %cst_135 = arith.constant 2.500000e-01 : f32
    %323 = vector.broadcast %cst_135 : f32 to vector<2x8x16xf32>
    %324 = arith.mulf %320, %323 : vector<2x8x16xf32>
    "tpu.trace_start"() <{level = 10 : i32, message = "bqd,bkd->bqk"}> : () -> ()
    %cst_136 = arith.constant dense<0.000000e+00> : vector<2x8x8xf32>
    %325 = tpu.matmul %324, %321, %cst_136 {dimension_numbers = #tpu.dot_dimension_numbers<[2], [2], [1], [1], [0, 0, 0, 1, 1, 1], [0], [0]>} : vector<2x8x16xf32>, vector<2x8x16xf32>, vector<2x8x8xf32> -> vector<2x8x8xf32>
    "tpu.trace_stop"() : () -> ()
    %cst_137 = arith.constant dense<0xFF800000> : vector<2x8xf32>
    %326 = vector.multi_reduction <maximumf>, %325, %cst_137 [2] : vector<2x8x8xf32> to vector<2x8xf32>
    %327 = vector.shape_cast %326 : vector<2x8xf32> to vector<2x8x1xf32>
    %328 = vector.broadcast %327 : vector<2x8x1xf32> to vector<2x8x8xf32>
    %329 = arith.subf %325, %328 : vector<2x8x8xf32>
    %330 = math.exp %329 : vector<2x8x8xf32>
    %cst_138 = arith.constant dense<0.000000e+00> : vector<2x8xf32>
    %331 = vector.multi_reduction <add>, %330, %cst_138 [2] : vector<2x8x8xf32> to vector<2x8xf32>
    %332 = vector.shape_cast %331 : vector<2x8xf32> to vector<2x8x1xf32>
    %333 = tpu.reciprocal %332 {approx = true} : vector<2x8x1xf32> -> vector<2x8x1xf32>
    %334 = vector.broadcast %333 : vector<2x8x1xf32> to vector<2x8x8xf32>
    %335 = arith.mulf %330, %334 : vector<2x8x8xf32>
    "tpu.trace_start"() <{level = 10 : i32, message = "bqk,bkd->bqd"}> : () -> ()
    %cst_139 = arith.constant dense<0.000000e+00> : vector<2x8x16xf32>
    %336 = tpu.matmul %335, %322, %cst_139 {dimension_numbers = #tpu.dot_dimension_numbers<[2], [1], [1], [2], [0, 0, 0, 1, 1, 2], [0], [0]>} : vector<2x8x8xf32>, vector<2x8x16xf32>, vector<2x8x16xf32> -> vector<2x8x16xf32>
    "tpu.trace_stop"() : () -> ()
    %337 = vector.extract_strided_slice %271 {offsets = [0, 0, 48], sizes = [2, 8, 16], strides = [1, 1, 1]} : vector<2x8x64xf32> to vector<2x8x16xf32>
    %338 = vector.extract_strided_slice %278 {offsets = [0, 0, 48], sizes = [2, 8, 16], strides = [1, 1, 1]} : vector<2x8x64xf32> to vector<2x8x16xf32>
    %339 = vector.extract_strided_slice %285 {offsets = [0, 0, 48], sizes = [2, 8, 16], strides = [1, 1, 1]} : vector<2x8x64xf32> to vector<2x8x16xf32>
    %cst_140 = arith.constant 2.500000e-01 : f32
    %340 = vector.broadcast %cst_140 : f32 to vector<2x8x16xf32>
    %341 = arith.mulf %337, %340 : vector<2x8x16xf32>
    "tpu.trace_start"() <{level = 10 : i32, message = "bqd,bkd->bqk"}> : () -> ()
    %cst_141 = arith.constant dense<0.000000e+00> : vector<2x8x8xf32>
    %342 = tpu.matmul %341, %338, %cst_141 {dimension_numbers = #tpu.dot_dimension_numbers<[2], [2], [1], [1], [0, 0, 0, 1, 1, 1], [0], [0]>} : vector<2x8x16xf32>, vector<2x8x16xf32>, vector<2x8x8xf32> -> vector<2x8x8xf32>
    "tpu.trace_stop"() : () -> ()
    %cst_142 = arith.constant dense<0xFF800000> : vector<2x8xf32>
    %343 = vector.multi_reduction <maximumf>, %342, %cst_142 [2] : vector<2x8x8xf32> to vector<2x8xf32>
    %344 = vector.shape_cast %343 : vector<2x8xf32> to vector<2x8x1xf32>
    %345 = vector.broadcast %344 : vector<2x8x1xf32> to vector<2x8x8xf32>
    %346 = arith.subf %342, %345 : vector<2x8x8xf32>
    %347 = math.exp %346 : vector<2x8x8xf32>
    %cst_143 = arith.constant dense<0.000000e+00> : vector<2x8xf32>
    %348 = vector.multi_reduction <add>, %347, %cst_143 [2] : vector<2x8x8xf32> to vector<2x8xf32>
    %349 = vector.shape_cast %348 : vector<2x8xf32> to vector<2x8x1xf32>
    %350 = tpu.reciprocal %349 {approx = true} : vector<2x8x1xf32> -> vector<2x8x1xf32>
    %351 = vector.broadcast %350 : vector<2x8x1xf32> to vector<2x8x8xf32>
    %352 = arith.mulf %347, %351 : vector<2x8x8xf32>
    "tpu.trace_start"() <{level = 10 : i32, message = "bqk,bkd->bqd"}> : () -> ()
    %cst_144 = arith.constant dense<0.000000e+00> : vector<2x8x16xf32>
    %353 = tpu.matmul %352, %339, %cst_144 {dimension_numbers = #tpu.dot_dimension_numbers<[2], [1], [1], [2], [0, 0, 0, 1, 1, 2], [0], [0]>} : vector<2x8x8xf32>, vector<2x8x16xf32>, vector<2x8x16xf32> -> vector<2x8x16xf32>
    "tpu.trace_stop"() : () -> ()
    %354 = tpu.concatenate %302, %319, %336, %353 in 2 : vector<2x8x16xf32>, vector<2x8x16xf32>, vector<2x8x16xf32>, vector<2x8x16xf32> -> vector<2x8x64xf32>
    %355 = vector.shape_cast %354 : vector<2x8x64xf32> to vector<16x64xf32>
    %c11_145 = arith.constant 11 : index
    %c0_146 = arith.constant 0 : index
    %c0_147 = arith.constant 0 : index
    %356 = vector.load %arg3[%c11_145, %c0_146, %c0_147] : memref<16x64x64xf32, #tpu.memory_space<vmem>>, vector<1x64x64xf32>
    %357 = vector.shape_cast %356 : vector<1x64x64xf32> to vector<64x64xf32>
    %cst_148 = arith.constant dense<0.000000e+00> : vector<16x64xf32>
    %358 = tpu.matmul %355, %357, %cst_148 {dimension_numbers = #tpu.dot_dimension_numbers<[1], [0], [0], [1], [0, 0, 1, 1], [], []>} : vector<16x64xf32>, vector<64x64xf32>, vector<16x64xf32> -> vector<16x64xf32>
    %c12_149 = arith.constant 12 : index
    %c0_150 = arith.constant 0 : index
    %359 = vector.load %arg4[%c12_149, %c0_150] : memref<25x64xf32, #tpu.memory_space<vmem>>, vector<1x64xf32>
    %360 = vector.broadcast %359 : vector<1x64xf32> to vector<16x64xf32>
    %361 = arith.addf %358, %360 : vector<16x64xf32>
    %362 = arith.addf %264, %361 : vector<16x64xf32>
    %c21 = arith.constant 21 : index
    %c0_151 = arith.constant 0 : index
    %363 = vector.load %arg4[%c21, %c0_151] : memref<25x64xf32, #tpu.memory_space<vmem>>, vector<1x64xf32>
    %c22 = arith.constant 22 : index
    %c0_152 = arith.constant 0 : index
    %364 = vector.load %arg4[%c22, %c0_152] : memref<25x64xf32, #tpu.memory_space<vmem>>, vector<1x64xf32>
    %cst_153 = arith.constant dense<0.000000e+00> : vector<16xf32>
    %365 = vector.multi_reduction <add>, %362, %cst_153 [1] : vector<16x64xf32> to vector<16xf32>
    %366 = vector.shape_cast %365 : vector<16xf32> to vector<16x1xf32>
    %cst_154 = arith.constant 6.400000e+01 : f32
    %367 = vector.broadcast %cst_154 : f32 to vector<16x1xf32>
    %368 = arith.divf %366, %367 : vector<16x1xf32>
    %369 = vector.broadcast %368 : vector<16x1xf32> to vector<16x64xf32>
    %370 = arith.subf %362, %369 : vector<16x64xf32>
    %371 = arith.mulf %370, %370 : vector<16x64xf32>
    %cst_155 = arith.constant dense<0.000000e+00> : vector<16xf32>
    %372 = vector.multi_reduction <add>, %371, %cst_155 [1] : vector<16x64xf32> to vector<16xf32>
    %373 = vector.shape_cast %372 : vector<16xf32> to vector<16x1xf32>
    %cst_156 = arith.constant 6.400000e+01 : f32
    %374 = vector.broadcast %cst_156 : f32 to vector<16x1xf32>
    %375 = arith.divf %373, %374 : vector<16x1xf32>
    %376 = vector.broadcast %368 : vector<16x1xf32> to vector<16x64xf32>
    %377 = arith.subf %362, %376 : vector<16x64xf32>
    %cst_157 = arith.constant 9.99999974E-6 : f32
    %378 = vector.broadcast %cst_157 : f32 to vector<16x1xf32>
    %379 = arith.addf %375, %378 : vector<16x1xf32>
    %380 = math.rsqrt %379 : vector<16x1xf32>
    %381 = vector.broadcast %380 : vector<16x1xf32> to vector<16x64xf32>
    %382 = arith.mulf %377, %381 : vector<16x64xf32>
    %383 = vector.broadcast %363 : vector<1x64xf32> to vector<16x64xf32>
    %384 = arith.mulf %382, %383 : vector<16x64xf32>
    %385 = vector.broadcast %364 : vector<1x64xf32> to vector<16x64xf32>
    %386 = arith.addf %384, %385 : vector<16x64xf32>
    %c14_158 = arith.constant 14 : index
    %c0_159 = arith.constant 0 : index
    %c0_160 = arith.constant 0 : index
    %387 = vector.load %arg3[%c14_158, %c0_159, %c0_160] : memref<16x64x64xf32, #tpu.memory_space<vmem>>, vector<1x64x64xf32>
    %388 = vector.shape_cast %387 : vector<1x64x64xf32> to vector<64x64xf32>
    %cst_161 = arith.constant dense<0.000000e+00> : vector<16x64xf32>
    %389 = tpu.matmul %386, %388, %cst_161 {dimension_numbers = #tpu.dot_dimension_numbers<[1], [0], [0], [1], [0, 0, 1, 1], [], []>} : vector<16x64xf32>, vector<64x64xf32>, vector<16x64xf32> -> vector<16x64xf32>
    %c19 = arith.constant 19 : index
    %c0_162 = arith.constant 0 : index
    %390 = vector.load %arg4[%c19, %c0_162] : memref<25x64xf32, #tpu.memory_space<vmem>>, vector<1x64xf32>
    %391 = vector.broadcast %390 : vector<1x64xf32> to vector<16x64xf32>
    %392 = arith.addf %389, %391 : vector<16x64xf32>
    %cst_163 = arith.constant 0.000000e+00 : f32
    %393 = vector.broadcast %cst_163 : f32 to vector<16x64xf32>
    %394 = arith.maximumf %392, %393 : vector<16x64xf32>
    %c15_164 = arith.constant 15 : index
    %c0_165 = arith.constant 0 : index
    %c0_166 = arith.constant 0 : index
    %395 = vector.load %arg3[%c15_164, %c0_165, %c0_166] : memref<16x64x64xf32, #tpu.memory_space<vmem>>, vector<1x64x64xf32>
    %396 = vector.shape_cast %395 : vector<1x64x64xf32> to vector<64x64xf32>
    %cst_167 = arith.constant dense<0.000000e+00> : vector<16x64xf32>
    %397 = tpu.matmul %394, %396, %cst_167 {dimension_numbers = #tpu.dot_dimension_numbers<[1], [0], [0], [1], [0, 0, 1, 1], [], []>} : vector<16x64xf32>, vector<64x64xf32>, vector<16x64xf32> -> vector<16x64xf32>
    %c20 = arith.constant 20 : index
    %c0_168 = arith.constant 0 : index
    %398 = vector.load %arg4[%c20, %c0_168] : memref<25x64xf32, #tpu.memory_space<vmem>>, vector<1x64xf32>
    %399 = vector.broadcast %398 : vector<1x64xf32> to vector<16x64xf32>
    %400 = arith.addf %397, %399 : vector<16x64xf32>
    %401 = arith.addf %386, %400 : vector<16x64xf32>
    %c23 = arith.constant 23 : index
    %c0_169 = arith.constant 0 : index
    %402 = vector.load %arg4[%c23, %c0_169] : memref<25x64xf32, #tpu.memory_space<vmem>>, vector<1x64xf32>
    %c24 = arith.constant 24 : index
    %c0_170 = arith.constant 0 : index
    %403 = vector.load %arg4[%c24, %c0_170] : memref<25x64xf32, #tpu.memory_space<vmem>>, vector<1x64xf32>
    %cst_171 = arith.constant dense<0.000000e+00> : vector<16xf32>
    %404 = vector.multi_reduction <add>, %401, %cst_171 [1] : vector<16x64xf32> to vector<16xf32>
    %405 = vector.shape_cast %404 : vector<16xf32> to vector<16x1xf32>
    %cst_172 = arith.constant 6.400000e+01 : f32
    %406 = vector.broadcast %cst_172 : f32 to vector<16x1xf32>
    %407 = arith.divf %405, %406 : vector<16x1xf32>
    %408 = vector.broadcast %407 : vector<16x1xf32> to vector<16x64xf32>
    %409 = arith.subf %401, %408 : vector<16x64xf32>
    %410 = arith.mulf %409, %409 : vector<16x64xf32>
    %cst_173 = arith.constant dense<0.000000e+00> : vector<16xf32>
    %411 = vector.multi_reduction <add>, %410, %cst_173 [1] : vector<16x64xf32> to vector<16xf32>
    %412 = vector.shape_cast %411 : vector<16xf32> to vector<16x1xf32>
    %cst_174 = arith.constant 6.400000e+01 : f32
    %413 = vector.broadcast %cst_174 : f32 to vector<16x1xf32>
    %414 = arith.divf %412, %413 : vector<16x1xf32>
    %415 = vector.broadcast %407 : vector<16x1xf32> to vector<16x64xf32>
    %416 = arith.subf %401, %415 : vector<16x64xf32>
    %cst_175 = arith.constant 9.99999974E-6 : f32
    %417 = vector.broadcast %cst_175 : f32 to vector<16x1xf32>
    %418 = arith.addf %414, %417 : vector<16x1xf32>
    %419 = math.rsqrt %418 : vector<16x1xf32>
    %420 = vector.broadcast %419 : vector<16x1xf32> to vector<16x64xf32>
    %421 = arith.mulf %416, %420 : vector<16x64xf32>
    %422 = vector.broadcast %402 : vector<1x64xf32> to vector<16x64xf32>
    %423 = arith.mulf %421, %422 : vector<16x64xf32>
    %424 = vector.broadcast %403 : vector<1x64xf32> to vector<16x64xf32>
    %425 = arith.addf %423, %424 : vector<16x64xf32>
    %426 = vector.shape_cast %425 : vector<16x64xf32> to vector<2x8x64xf32>
    %cst_176 = arith.constant dense<0.000000e+00> : vector<2x64xf32>
    %427 = vector.multi_reduction <add>, %426, %cst_176 [1] : vector<2x8x64xf32> to vector<2x64xf32>
    %cst_177 = arith.constant 8.000000e+00 : f32
    %428 = vector.broadcast %cst_177 : f32 to vector<2x64xf32>
    %429 = arith.divf %427, %428 : vector<2x64xf32>
    %c0_178 = arith.constant 0 : index
    %c0_179 = arith.constant 0 : index
    %c0_180 = arith.constant 0 : index
    %430 = vector.load %arg5[%c0_178, %c0_179, %c0_180] : memref<1x2x64xf32, #tpu.memory_space<vmem>>, vector<1x2x64xf32>
    %431 = vector.shape_cast %430 : vector<1x2x64xf32> to vector<2x64xf32>
    %432 = vector.shape_cast %429 : vector<2x64xf32> to vector<1x2x64xf32>
    tpu.vector_store %arg5[%c0_178, %c0_179, %c0_180], %432 {strides = array<i32>} : memref<1x2x64xf32, #tpu.memory_space<vmem>>, vector<1x2x64xf32>,
    return
  }
  func.func @transform_0(%arg0: i32) -> (i32, i32, i32) {
    %c0_i32 = arith.constant 0 : i32
    %c0_i32_0 = arith.constant 0 : i32
    %c0_i32_1 = arith.constant 0 : i32
    return %arg0, %c0_i32, %c0_i32_0 : i32, i32, i32
  }
  func.func @transform_1(%arg0: i32) -> (i32, i32) {
    %c0_i32 = arith.constant 0 : i32
    %c0_i32_0 = arith.constant 0 : i32
    %c0_i32_1 = arith.constant 0 : i32
    return %c0_i32, %c0_i32_0 : i32, i32
  }
  func.func @transform_2(%arg0: i32) -> (i32, i32, i32) {
    %c0_i32 = arith.constant 0 : i32
    %c0_i32_0 = arith.constant 0 : i32
    %c0_i32_1 = arith.constant 0 : i32
    %c0_i32_2 = arith.constant 0 : i32
    return %c0_i32, %c0_i32_0, %c0_i32_1 : i32, i32, i32
  }
  func.func @transform_3(%arg0: i32) -> (i32, i32) {
    %c0_i32 = arith.constant 0 : i32
    %c0_i32_0 = arith.constant 0 : i32
    %c0_i32_1 = arith.constant 0 : i32
    return %c0_i32, %c0_i32_0 : i32, i32
  }
  func.func @transform_4(%arg0: i32) -> (i32, i32, i32) {
    %c0_i32 = arith.constant 0 : i32
    %c0_i32_0 = arith.constant 0 : i32
    %c0_i32_1 = arith.constant 0 : i32
    return %arg0, %c0_i32, %c0_i32_0 : i32, i32, i32
  }
}

</mosaic_0001>

<bundles_post_ra>
// kernel: transformer_forward.1
= control target key start
LH: loop header
LB: loop body
LE: loop exit
PB: predicated region body
PF: predicated region fallthrough
CT: control target
= control target key end

     0   :  { %9 = vsyncpa [#allocation3], 0  ;;  %s8008_s0 = inlined_call_operand.hbm [shape: f32[2,8,16], index: 0, kind: input, shape index: {}]   ;;  %s8009_s1 = inlined_call_operand.hbm [shape: f32[16,64], index: 1, kind: input, shape index: {}]   ;;  %s8010_s2 = inlined_call_operand.hbm [shape: f32[16,64,64], index: 2, kind: input, shape index: {}]   ;;  %s8011_s3 = inlined_call_operand.hbm [shape: f32[25,64], index: 3, kind: input, shape index: {}]   ;;  %s8012_s4 = inlined_call_operand.vmem [shape: f32[1,2,64], index: 4, kind: output, shape index: {}]  }
   0x1   :  { %10 = vsyncpa [#allocation5], 0 }
   0x2   :  { %11 = vsyncpa [#allocation8], 0  ;;  %s7308_s15 = smov [#allocation4]   ;;  %s7309_s17 = smov [#allocation2]  }
   0x3   :  { %s29_s16 = sshll.u32 %s7308_s15, 4  ;;  %s17_s18 = sshll.u32 %s7309_s17, 4  ;;  %s30_s16 = int_to_ptr.vmem [resolvable:$true] %s29_s16  ;;  %s7347_s18 = int_to_ptr.vmem [resolvable:$true] %s17_s18 }
   0x4   :  { %s7214_s21 = scalar_lea.hbm %s8009_s1, 256 }
   0x5   :  { %p7215_p0 = scmp.ne.s32.totalorder %s8009_s1, %s7214_s21  ;;  %p7218_p1 = scmp.lt.u32.totalorder %s7214_s21, %s8009_s1 }
   0x7   :  { %p7220_p2 = pnand %p7218_p1, %p7215_p0 }
   0x9   :  { %7223 = shalt.err (!%p7220_p2)
}
   0xa   :  { %s7224_s26 = scalar_lea.vmem %s30_s16, 256  ;;  %p7229_p4 = scmp.lt.s32.totalorder %s30_s16, %s30_s16 }
   0xb   :  { %p7225_p3 = scmp.ne.s32.totalorder %s30_s16, %s7224_s26  ;;  %p7230_p5 = scmp.lt.s32.totalorder %s7224_s26, %s7224_s26 }
   0xd   :  { %p7231_p6 = por %p7230_p5, %p7229_p4 }
   0xf   :  { %p7232_p7 = pnand %p7231_p6, %p7225_p3 }
  0x11   :  { %7235 = shalt.err (!%p7232_p7)
}
  0x12   :  { %s7310_s27 = smov 128   ;;  %s7311_s28 = smov 8  }
  0x13   :  { %35 = dma.hbm_to_vmem [thread:$0]  %s8009_s1, 256, %s30_s16, [#allocation5], %s7310_s27, %s7310_s27, %s7311_s28  }
  0x14   :  { %s7236_s7 = scalar_lea.hbm %s8008_s0, 256 }
  0x15   :  { %p7237_p8 = scmp.ne.s32.totalorder %s8008_s0, %s7236_s7  ;;  %p7240_p9 = scmp.lt.u32.totalorder %s7236_s7, %s8008_s0 }
  0x17   :  { %p7242_p10 = pnand %p7240_p9, %p7237_p8 }
  0x19   :  { %7245 = shalt.err (!%p7242_p10)
}
  0x1a   :  { %s7246_s12 = scalar_lea.vmem %s7347_s18, 256  ;;  %p7251_p12 = scmp.lt.s32.totalorder %s7347_s18, %s7347_s18 }
  0x1b   :  { %p7247_p11 = scmp.ne.s32.totalorder %s7347_s18, %s7246_s12  ;;  %p7252_p13 = scmp.lt.s32.totalorder %s7246_s12, %s7246_s12 }
  0x1d   :  { %p7253_p0 = por %p7252_p13, %p7251_p12 }
  0x1f   :  { %p7254_p1 = pnand %p7253_p0, %p7247_p11 }
  0x21   :  { %7257 = shalt.err (!%p7254_p1)
}
  0x22   :  { %23 = dma.hbm_to_vmem [thread:$0]  %s8008_s0, 256, %s7347_s18, [#allocation3], %s7310_s27, %s7310_s27, %s7311_s28  }
  0x23   :  { %s7312_s14 = smov [#allocation6]   ;;  %s7313_s16 = smov [#allocation7]  }
  0x24   :  { %s41_s15 = sshll.u32 %s7312_s14, 4  ;;  %s53_s17 = sshll.u32 %s7313_s16, 4  ;;  %s42_s15 = int_to_ptr.vmem [resolvable:$true] %s41_s15  ;;  %s7384_s17 = int_to_ptr.vmem [resolvable:$true] %s53_s17 }
  0x25   :  { %s7258_s21 = scalar_lea.hbm %s8010_s2, 16384 }
  0x26   :  { %p7259_p2 = scmp.ne.s32.totalorder %s8010_s2, %s7258_s21  ;;  %p7262_p3 = scmp.lt.u32.totalorder %s7258_s21, %s8010_s2 }
  0x28   :  { %p7264_p4 = pnand %p7262_p3, %p7259_p2 }
  0x2a   :  { %7267 = shalt.err (!%p7264_p4)
}
  0x2b   :  { %s7268_s0 = scalar_lea.vmem %s42_s15, 16384  ;;  %p7273_p6 = scmp.lt.s32.totalorder %s42_s15, %s42_s15 }
  0x2c   :  { %p7269_p5 = scmp.ne.s32.totalorder %s42_s15, %s7268_s0  ;;  %p7274_p7 = scmp.lt.s32.totalorder %s7268_s0, %s7268_s0 }
  0x2e   :  { %p7275_p8 = por %p7274_p7, %p7273_p6 }
  0x30   :  { %p7276_p9 = pnand %p7275_p8, %p7269_p5 }
  0x32   :  { %7279 = shalt.err (!%p7276_p9)
}
  0x33   :  { %47 = dma.hbm_to_vmem [thread:$0]  %s8010_s2, 16384, %s42_s15, [#allocation5], %s7310_s27, %s7310_s27, %s7311_s28  }
  0x34   :  { %s7280_s5 = scalar_lea.hbm %s8011_s3, 512 }
  0x35   :  { %p7281_p10 = scmp.ne.s32.totalorder %s8011_s3, %s7280_s5  ;;  %p7284_p11 = scmp.lt.u32.totalorder %s7280_s5, %s8011_s3 }
  0x37   :  { %p7286_p12 = pnand %p7284_p11, %p7281_p10 }
  0x39   :  { %7289 = shalt.err (!%p7286_p12)
}
  0x3a   :  { %s7290_s10 = scalar_lea.vmem %s7384_s17, 512  ;;  %p7295_p0 = scmp.lt.s32.totalorder %s7384_s17, %s7384_s17 }
  0x3b   :  { %p7291_p13 = scmp.ne.s32.totalorder %s7384_s17, %s7290_s10  ;;  %p7296_p1 = scmp.lt.s32.totalorder %s7290_s10, %s7290_s10 }
  0x3d   :  { %p7297_p2 = por %p7296_p1, %p7295_p0 }
  0x3f   :  { %p7298_p3 = pnand %p7297_p2, %p7291_p13 }
  0x41   :  { %7301 = shalt.err (!%p7298_p3)
}
  0x42   :  { %59 = dma.hbm_to_vmem [thread:$0]  %s8011_s3, 512, %s7384_s17, [#allocation8], %s7310_s27, %s7310_s27, %s7311_s28  }
  0x43   :  { %7302 = dma.done.wait [#allocation3], 256  }
  0x44   :  { %7303 = vsyncadd [#allocation3], 4294967040 }
  0x45   :  { %7304 = dma.done.wait [#allocation5], 16640  }
  0x46   :  { %7305 = vsyncadd [#allocation5], 4294950656 }
  0x47   :  { %7306 = dma.done.wait [#allocation8], 512  }
  0x48   :  { %7307 = vsyncadd [#allocation8], 4294966784  ;;  %vm81_vm0 = vcmask 130048   ;;  %v74_v0 = vld [vmem:[#allocation4] sm:$0xff]  ;;  %v75_v1 = vld [vmem:[#allocation4 + $0x8] sm:$0xff]  ;;  %vm176_vm1 = vcmask 523264  }
  0x49   :  { %v72_v2 = vld [vmem:[#allocation2] sm:$0xff]  ;;  %v6828_v3 = vpack.c.bf16 %v75_v1, %v74_v0  ;;  %v164_v5 = vld [vmem:[#allocation6 + $0x8] sm:$0xff]  ;;  %v165_v9 = vld [vmem:[#allocation6 + $0x10] sm:$0xff]  ;;  %v7314_v46 = vmov 0.0   ;;  %vm7315_vm2 = vmmov 0   ;;  %s7316_s3 = smov 112  }
  0x4a   :  { %6281 = vmatprep.mubr.msk.f32.mxu0 %vm81_vm0, %v72_v2  ;;  %v163_v4 = vld [vmem:[#allocation6] sm:$0xff]  ;;  %v260_v8 = vld [vmem:[#allocation6 + $0x48] sm:$0xff]  ;;  %v166_v11 = vld [vmem:[#allocation6 + $0x18] sm:$0xff]  ;;  %vm590_vm3 = vcmask 64512   ;;  %s7317_s27 = smov 96   ;;  %s7318_s28 = smov 80  }
  0x4b   :  { %v6832_v6 = vpack.c.bf16 %v164_v5, %v163_v4  ;;  %v259_v7 = vld [vmem:[#allocation6 + $0x40] sm:$0xff]  ;;  %6829 = vmatprep.subr.bf16.mxu0 %v6828_v3  ;;  %v261_v12 = vld [vmem:[#allocation6 + $0x50] sm:$0xff]  ;;  %v262_v13 = vld [vmem:[#allocation6 + $0x58] sm:$0xff]  ;;  %v6836_v15 = vpack.c.bf16 %v166_v11, %v165_v9  ;;  %s7319_s12 = smov 16   ;;  %s7320_s1 = smov 32   ;;  %vm1780_vm4 = vcmask 392192  }
  0x4c   :  { %v6848_v10 = vpack.c.bf16 %v260_v8, %v259_v7  ;;  %6831 = vmatpush3.bf16.msra.mxu0 %v6828_v3  ;;  %v73_v14 = vld [vmem:[#allocation2 + $0x8] sm:$0xff]  ;;  %v167_v16 = vld [vmem:[#allocation6 + $0x20] sm:$0xff]  ;;  %v6852_v18 = vpack.c.bf16 %v262_v13, %v261_v12  ;;  %v169_v23 = vld [vmem:[#allocation6 + $0x30] sm:$0xff]  ;;  %s7321_s13 = smov 48   ;;  %vm1777_vm5 = vcmask 261120   ;;  %vm5874_vm6 = vcmask 1041409  }
  0x4d   :  { %6833 = vmatprep.subr.bf16.mxu1 %v6832_v6  ;;  %v168_v17 = vld [vmem:[#allocation6 + $0x28] sm:$0xff]  ;;  %v263_v20 = vld [vmem:[#allocation6 + $0x60] sm:$0xff]  ;;  %v170_v24 = vld [vmem:[#allocation6 + $0x38] sm:$0xff]  ;;  %vm5877_vm7 = vcmask 517120  }
  0x4e   :  { %6835 = vmatpush3.bf16.msra.mxu1 %v6832_v6  ;;  %6849 = vmatprep.subr.bf16.mxu0 %v6848_v10  ;;  %v6840_v19 = vpack.c.bf16 %v168_v17, %v167_v16  ;;  %v264_v21 = vld [vmem:[#allocation6 + $0x68] sm:$0xff]  ;;  %v6844_v25 = vpack.c.bf16 %v170_v24, %v169_v23  ;;  %v265_v26 = vld [vmem:[#allocation6 + $0x70] sm:$0xff]  ;;  %v266_v27 = vld [vmem:[#allocation6 + $0x78] sm:$0xff] }
  0x4f   :  { %6837 = vmatprep.subr.bf16.mxu1 %v6836_v15  ;;  %6282 = vmatmul.mubr.msk.f32.vlgmr.msra.gmra.mrb[0].mxu0 %vm81_vm0, %v73_v14  ;;  %v6856_v22 = vpack.c.bf16 %v264_v21, %v263_v20  ;;  %v6860_v28 = vpack.c.bf16 %v266_v27, %v265_v26  ;;  %v348_v29 = vld [vmem:[#allocation6 + $0x80] sm:$0xff]  ;;  %v349_v30 = vld [vmem:[#allocation6 + $0x88] sm:$0xff]  ;;  %v350_v34 = vld [vmem:[#allocation6 + $0x90] sm:$0xff] }
  0x50   :  { %6851 = vmatpush3.bf16.msra.mxu0 %v6848_v10  ;;  %v6864_v31 = vpack.c.bf16 %v349_v30, %v348_v29  ;;  %v5886_v32 = vld [vmem:[#allocation7] ss:$0 sm:$0xff]  ;;  %v351_v35 = vld [vmem:[#allocation6 + $0x98] sm:$0xff]  ;;  %v353_v41 = vld [vmem:[#allocation6 + $0xa8] sm:$0xff] }
  0x51   :  { %6853 = vmatprep.subr.bf16.mxu0 %v6852_v18  ;;  %v6868_v39 = vpack.c.bf16 %v351_v35, %v350_v34  ;;  %v352_v40 = vld [vmem:[#allocation6 + $0xa0] sm:$0xff]  ;;  %v354_v43 = vld [vmem:[#allocation6 + $0xb0] sm:$0xff]  ;;  %v355_v44 = vld [vmem:[#allocation6 + $0xb8] sm:$0xff] }
  0x52   :  { %6839 = vmatpush3.bf16.msra.mxu1 %v6836_v15  ;;  %v6872_v42 = vpack.c.bf16 %v353_v41, %v352_v40  ;;  %v6876_v45 = vpack.c.bf16 %v355_v44, %v354_v43  ;;  %v5889_v47 = vld [vmem:[#allocation7 + $0x1] ss:$0 sm:$0xff]  ;;  %v5892_v48 = vld [vmem:[#allocation7 + $0x2] ss:$0 sm:$0xff]  ;;  %v5895_v59 = vld [vmem:[#allocation7 + $0x3] ss:$0 sm:$0xff] }
  0x53   :  { %6841 = vmatprep.subr.bf16.mxu1 %v6840_v19 }
  0x54   :  { %6855 = vmatpush3.bf16.msra.mxu0 %v6852_v18 }
  0x55   :  { %6857 = vmatprep.subr.bf16.mxu0 %v6856_v22 }
  0x56   :  { %6843 = vmatpush3.bf16.msra.mxu1 %v6840_v19 }
  0x57   :  { %6845 = vmatprep.subr.bf16.mxu1 %v6844_v25 }
  0x58   :  { %6859 = vmatpush3.bf16.msra.mxu0 %v6856_v22 }
  0x59   :  { %6861 = vmatprep.subr.bf16.mxu0 %v6860_v28 }
  0x5a   :  { %6847 = vmatpush3.bf16.msra.mxu1 %v6844_v25 }
  0x5b   :  { %6865 = vmatprep.subr.bf16.mxu1 %v6864_v31 }
  0x5c   :  { %6863 = vmatpush3.bf16.msra.mxu0 %v6860_v28 }
  0x5d   :  { %6341 = vmatprep.subr.mxu0 %v7314_v46 }
 0x122   :  { %v6283_v33 = vpop.f32.mrb[0].mxu0 }
 0x123   :  { %v154_v36 = vpop.f32.mrb[1].mxu0  ;;  %v160_v38 = vadd.f32 %v6283_v33, %v5886_v32 }
 0x124   :  { %v155_v37 = vadd.f32 %v5886_v32, %v154_v36 }
 0x126   :  { %6300 = vmatprep.mubr.msk.f32.mxu1 %vm176_vm1, %v155_v37  ;;  %6319 = vmatprep.mubr.msk.f32.mxu0 %vm176_vm1, %v155_v37 }
 0x127   :  { %6301 = vmatmul.mubr.msk.f32.vlgmr.msra.gmra.mrb[0].mxu1 %vm176_vm1, %v160_v38  ;;  %6320 = vmatmul.mubr.msk.f32.vlgmr.msra.gmra.mrb[2].mxu0 %vm176_vm1, %v160_v38 }
 0x128   :  { %6867 = vmatpush3.bf16.msra.mxu1 %v6864_v31  ;;  %6338 = vmatprep.mubr.msk.f32.mxu1 %vm176_vm1, %v155_v37 }
 0x129   :  { %6869 = vmatprep.subr.bf16.mxu1 %v6868_v39  ;;  %6343 = vmatprep.mubr.msk.f32.mxu0 %vm7315_vm2, %v7314_v46 }
 0x12c   :  { %6871 = vmatpush3.bf16.msra.mxu1 %v6868_v39 }
 0x12d   :  { %6873 = vmatprep.subr.bf16.mxu1 %v6872_v42 }
 0x130   :  { %6875 = vmatpush3.bf16.msra.mxu1 %v6872_v42 }
 0x131   :  { %6877 = vmatprep.subr.bf16.mxu1 %v6876_v45 }
 0x134   :  { %6879 = vmatpush3.bf16.msra.mxu1 %v6876_v45 }
 0x135   :  { %6371 = vmatprep.subr.mxu1 %v7314_v46 }
 0x137   :  { %6339 = vmatmul.mubr.msk.f32.vlgmr.msra.gmra.mrb[2].mxu1 %vm176_vm1, %v160_v38 }
 0x138   :  { %6373 = vmatprep.mubr.msk.f32.mxu1 %vm7315_vm2, %v7314_v46 }
 0x1fa   :  { %v6302_v49 = vpop.f32.mrb[0].mxu1  ;;  %v6321_v50 = vpop.f32.mrb[2].mxu0 }
 0x1fb   :  { %v249_v51 = vpop.f32.mrb[1].mxu1  ;;  %v338_v52 = vpop.f32.mrb[3].mxu0  ;;  %v255_v56 = vadd.f32 %v6302_v49, %v5889_v47  ;;  %v7442_v57 = vadd.f32 %v6321_v50, %v5892_v48 }
 0x1fc   :  { %v250_v53 = vadd.f32 %v5889_v47, %v249_v51  ;;  %v7435_v54 = vadd.f32 %v5892_v48, %v338_v52 }
 0x1fd   :  { %v7452_v58 = vmul.f32 0.25, %v255_v56 }
 0x1fe   :  { %v7437_v55 = vmul.f32 0.25, %v250_v53  ;;  %6342 = vmatpush3.xpose.msk.msra.mxu0 %vm81_vm0, %v7435_v54 }
 0x1ff   :  { %6346 = vmatprep.subr.mxu0 %v7314_v46 }
 0x200   :  { %759 = vrot.lane.b32.xlu1 %v7437_v55, %s7316_s3 }
 0x201   :  { %6344 = vmatmul.mubr.msk.f32.vlgmr.msra.gmra.mrb[4].mxu0 %vm81_vm0, %v7437_v55 }
 0x202   :  { %6347 = vmatpush3.xpose.msk.msra.mxu0 %vm81_vm0, %v7442_v57  ;;  %6348 = vmatprep.mubr.msk.f32.mxu0 %vm7315_vm2, %v7314_v46 }
 0x203   :  { %6351 = vmatprep.subr.mxu0 %v7314_v46 }
 0x205   :  { %6349 = vmatmul.mubr.msk.f32.vlgmr.msra.gmra.mrb[6].mxu0 %vm81_vm0, %v7452_v58 }
 0x206   :  { %6353 = vmatprep.mubr.msk.f32.mxu0 %vm7315_vm2, %v7314_v46 }
 0x20a   :  { %v6340_v60 = vpop.f32.mrb[2].mxu1 }
 0x20b   :  { %v7459_v61 = vadd.f32 %v6340_v60, %v5895_v59  ;;  %v427_v62 = vpop.f32.mrb[3].mxu1 }
 0x20c   :  { %v7461_v63 = vadd.f32 %v5895_v59, %v427_v62 }
 0x20e   :  { %6352 = vmatpush3.msra.mxu0 %v7461_v63 }
 0x20f   :  { %6356 = vmatprep.subr.mxu0 %v7314_v46 }
 0x272   :  { %v760_v16 = vpop.permute.xlu1 %759 }
 0x2d4   :  { %v510_v0 = vpop.f32.mrb[4].mxu0 }
 0x2d5   :  { %v6345_v1 = vpop.f32.mrb[5].mxu0  ;;  %v591_v2 = vsel %vm590_vm3, %v510_v0, -inf }
 0x2d6   :  { %592 = vmax.xlane.f32.xlu0 %v591_v2 }
 0x2d8   :  { %v586_v3 = vpop.f32.mrb[6].mxu0 }
 0x2d9   :  { %v6350_v4 = vpop.f32.mrb[7].mxu0  ;;  %v594_v5 = vsel %vm590_vm3, %v586_v3, -inf }
 0x2da   :  { %595 = vmax.xlane.f32.xlu0 %v594_v5 }
 0x2f0   :  { %761 = vrot.lane.b32.xlu0 %v7435_v54, %s7316_s3 }
 0x363   :  { %v593_v6 = vpop.xlane.xlu0 %592 }
 0x364   :  { %v597_v7 = vsub.f32 %v510_v0, %v593_v6 }
 0x366   :  { %v599_v8 = vmul.f32 1.442695, %v597_v7 }
 0x367   :  { %v596_v11 = vpop.xlane.xlu0 %595 }
 0x368   :  { %7102 = vpow2.f32 %v599_v8  ;;  %v598_v12 = vsub.f32 %v586_v3, %v596_v11 }
 0x36a   :  { %v601_v13 = vmul.f32 1.442695, %v598_v12 }
 0x36b   :  { %v762_v24 = vpop.permute.xlu0 %761 }
 0x36c   :  { %7104 = vpow2.f32 %v601_v13 }
 0x372   :  { %v7103_v9 = vpop.eup %7102 }
 0x373   :  { %v603_v10 = vsel %vm590_vm3, %v7103_v9, 0.0 }
 0x374   :  { %604 = vadd.xlane.f32.xlu1 %v603_v10 }
 0x376   :  { %v7105_v14 = vpop.eup %7104 }
 0x377   :  { %v606_v15 = vsel %vm590_vm3, %v7105_v14, 0.0 }
 0x385   :  { %839 = vrot.lane.b32.xlu1 %v7442_v57, %s7316_s3 }
 0x3a9   :  { %607 = vadd.xlane.f32.xlu1 %v606_v15 }
 0x3ba   :  { %837 = vrot.lane.b32.xlu1 %v7452_v58, %s7316_s3 }
 0x401   :  { %v605_v17 = vpop.xlane.xlu1 %604 }
 0x402   :  { %7106 = vrcp.f32 %v605_v17 }
 0x405   :  { %v840_v20 = vpop.permute.xlu1 %839 }
 0x40c   :  { %v7107_v18 = vpop.eup %7106 }
 0x40d   :  { %v611_v19 = vmul.f32 %v7107_v18, %v7103_v9 }
 0x40f   :  { %6354 = vmatmul.mubr.msk.f32.vlgmr.msra.gmra.mrb[8].mxu0 %vm590_vm3, %v611_v19 }
 0x410   :  { %6357 = vmatpush3.msra.mxu0 %v7459_v61  ;;  %6358 = vmatprep.mubr.msk.f32.mxu0 %vm7315_vm2, %v7314_v46 }
 0x411   :  { %6361 = vmatprep.subr.mxu0 %v7314_v46 }
 0x436   :  { %v608_v21 = vpop.xlane.xlu1 %607 }
 0x437   :  { %7108 = vrcp.f32 %v608_v21 }
 0x43a   :  { %v838_v25 = vpop.permute.xlu1 %837 }
 0x441   :  { %v7109_v22 = vpop.eup %7108 }
 0x442   :  { %v612_v23 = vmul.f32 %v7109_v22, %v7105_v14 }
 0x444   :  { %6359 = vmatmul.mubr.msk.f32.vlgmr.msra.gmra.mrb[10].mxu0 %vm590_vm3, %v612_v23 }
 0x445   :  { %6362 = vmatpush3.xpose.msk.msra.mxu0 %vm81_vm0, %v762_v24  ;;  %6363 = vmatprep.mubr.msk.f32.mxu0 %vm7315_vm2, %v7314_v46 }
 0x446   :  { %6366 = vmatprep.subr.mxu0 %v7314_v46 }
 0x448   :  { %6364 = vmatmul.mubr.msk.f32.vlgmr.msra.gmra.mrb[12].mxu0 %vm81_vm0, %v760_v16 }
 0x449   :  { %6367 = vmatpush3.xpose.msk.msra.mxu0 %vm81_vm0, %v840_v20  ;;  %6368 = vmatprep.mubr.msk.f32.mxu0 %vm7315_vm2, %v7314_v46 }
 0x44a   :  { %6376 = vmatprep.subr.mxu0 %v7314_v46 }
 0x44c   :  { %6369 = vmatmul.mubr.msk.f32.vlgmr.msra.gmra.mrb[14].mxu0 %vm81_vm0, %v838_v25 }
 0x44d   :  { %6378 = vmatprep.mubr.msk.f32.mxu0 %vm7315_vm2, %v7314_v46 }
 0x4e2   :  { %v7493_v26 = vpop.f32.mrb[8].mxu0 }
 0x4e3   :  { %v6355_v27 = vpop.f32.mrb[9].mxu0 }
 0x517   :  { %v7495_v28 = vpop.f32.mrb[10].mxu0 }
 0x518   :  { %v6360_v29 = vpop.f32.mrb[11].mxu0 }
 0x51b   :  { %v833_v30 = vpop.f32.mrb[12].mxu0 }
 0x51c   :  { %v6365_v31 = vpop.f32.mrb[13].mxu0  ;;  %v915_v32 = vsel %vm590_vm3, %v833_v30, -inf }
 0x51d   :  { %916 = vmax.xlane.f32.xlu0 %v915_v32 }
 0x51f   :  { %v911_v33 = vpop.f32.mrb[14].mxu0 }
 0x520   :  { %v6370_v34 = vpop.f32.mrb[15].mxu0  ;;  %v918_v35 = vsel %vm590_vm3, %v911_v33, -inf }
 0x521   :  { %919 = vmax.xlane.f32.xlu1 %v918_v35 }
 0x532   :  { %1015 = vrot.lane.b32.xlu1 %v7459_v61, %s7316_s3 }
 0x533   :  { %938 = vrot.lane.b32.xlu0 %v7461_v63, %s7316_s3 }
 0x536   :  { %1093 = vrot.lane.b32.xlu1 %v7435_v54, %s7317_s27 }
 0x53a   :  { %1171 = vrot.lane.b32.xlu1 %v7442_v57, %s7317_s27 }
 0x53e   :  { %1169 = vrot.lane.b32.xlu1 %v7452_v58, %s7317_s27 }
 0x5aa   :  { %v917_v36 = vpop.xlane.xlu0 %916 }
 0x5ab   :  { %v921_v37 = vsub.f32 %v833_v30, %v917_v36 }
 0x5ad   :  { %v923_v38 = vmul.f32 1.442695, %v921_v37 }
 0x5ae   :  { %v939_v39 = vpop.permute.xlu0 %938  ;;  %v920_v40 = vpop.xlane.xlu1 %919 }
 0x5af   :  { %7110 = vpow2.f32 %v923_v38  ;;  %v922_v41 = vsub.f32 %v911_v33, %v920_v40  ;;  %6372 = vmatpush3.msra.mxu1 %v939_v39 }
 0x5b0   :  { %6381 = vmatprep.subr.mxu1 %v7314_v46 }
 0x5b1   :  { %v925_v42 = vmul.f32 1.442695, %v922_v41 }
 0x5b2   :  { %v1016_v43 = vpop.permute.xlu1 %1015 }
 0x5b3   :  { %7112 = vpow2.f32 %v925_v42  ;;  %6377 = vmatpush3.msra.mxu0 %v1016_v43 }
 0x5b4   :  { %6386 = vmatprep.subr.mxu0 %v7314_v46 }
 0x5b6   :  { %v1094_v51 = vpop.permute.xlu1 %1093 }
 0x5b9   :  { %v7111_v44 = vpop.eup %7110 }
 0x5ba   :  { %v927_v45 = vsel %vm590_vm3, %v7111_v44, 0.0  ;;  %v1172_v59 = vpop.permute.xlu1 %1171 }
 0x5bb   :  { %928 = vadd.xlane.f32.xlu0 %v927_v45 }
 0x5bd   :  { %v7113_v47 = vpop.eup %7112 }
 0x5be   :  { %v930_v48 = vsel %vm590_vm3, %v7113_v47, 0.0  ;;  %v1170_v0 = vpop.permute.xlu1 %1169 }
 0x5bf   :  { %931 = vadd.xlane.f32.xlu0 %v930_v48 }
 0x5d5   :  { %1091 = vrot.lane.b32.xlu0 %v7437_v55, %s7317_s27 }
 0x648   :  { %v929_v49 = vpop.xlane.xlu0 %928 }
 0x649   :  { %7114 = vrcp.f32 %v929_v49 }
 0x64c   :  { %v932_v50 = vpop.xlane.xlu0 %931 }
 0x64d   :  { %7116 = vrcp.f32 %v932_v50 }
 0x650   :  { %v1092_v62 = vpop.permute.xlu0 %1091 }
 0x653   :  { %v7115_v52 = vpop.eup %7114 }
 0x654   :  { %v935_v53 = vmul.f32 %v7115_v52, %v7111_v44 }
 0x656   :  { %6374 = vmatmul.mubr.msk.f32.vlgmr.msra.gmra.mrb[4].mxu1 %vm590_vm3, %v935_v53 }
 0x657   :  { %v7117_v56 = vpop.eup %7116  ;;  %6382 = vmatpush3.xpose.msk.msra.mxu1 %vm81_vm0, %v1094_v51  ;;  %6383 = vmatprep.mubr.msk.f32.mxu1 %vm7315_vm2, %v7314_v46 }
 0x658   :  { %v936_v60 = vmul.f32 %v7117_v56, %v7113_v47  ;;  %6391 = vmatprep.subr.mxu1 %v7314_v46 }
 0x65a   :  { %6379 = vmatmul.mubr.msk.f32.vlgmr.msra.gmra.mrb[16].mxu0 %vm590_vm3, %v936_v60  ;;  %6384 = vmatmul.mubr.msk.f32.vlgmr.msra.gmra.mrb[6].mxu1 %vm81_vm0, %v1092_v62 }
 0x65b   :  { %6387 = vmatpush3.xpose.msk.msra.mxu0 %vm81_vm0, %v1172_v59  ;;  %6388 = vmatprep.mubr.msk.f32.mxu0 %vm7315_vm2, %v7314_v46 }
 0x65c   :  { %6396 = vmatprep.subr.mxu0 %v7314_v46  ;;  %6393 = vmatprep.mubr.msk.f32.mxu1 %vm7315_vm2, %v7314_v46 }
 0x65e   :  { %6389 = vmatmul.mubr.msk.f32.vlgmr.msra.gmra.mrb[18].mxu0 %vm81_vm0, %v1170_v0 }
 0x65f   :  { %6398 = vmatprep.mubr.msk.f32.mxu0 %vm7315_vm2, %v7314_v46 }
 0x729   :  { %v7531_v1 = vpop.f32.mrb[4].mxu1 }
 0x72a   :  { %v6375_v2 = vpop.f32.mrb[5].mxu1 }
 0x72b   :  { %v1785_v2 = vld [vmem:[#allocation6 + $0x248] sm:$0xff] }
 0x72d   :  { %v7533_v3 = vpop.f32.mrb[16].mxu0  ;;  %v1165_v4 = vpop.f32.mrb[6].mxu1 }
 0x72e   :  { %v6380_v5 = vpop.f32.mrb[17].mxu0  ;;  %v6385_v6 = vpop.f32.mrb[7].mxu1  ;;  %v1247_v7 = vsel %vm590_vm3, %v1165_v4, -inf }
 0x72f   :  { %1248 = vmax.xlane.f32.xlu0 %v1247_v7  ;;  %v1788_v6 = vld [vmem:[#allocation6 + $0x260] sm:$0xff]  ;;  %v1789_v7 = vld [vmem:[#allocation6 + $0x268] sm:$0xff] }
 0x731   :  { %v1243_v8 = vpop.f32.mrb[18].mxu0 }
 0x732   :  { %v6390_v9 = vpop.f32.mrb[19].mxu0  ;;  %v1250_v10 = vsel %vm590_vm3, %v1243_v8, -inf }
 0x733   :  { %1251 = vmax.xlane.f32.xlu1 %v1250_v10  ;;  %v1790_v9 = vld [vmem:[#allocation6 + $0x270] sm:$0xff]  ;;  %v1791_v10 = vld [vmem:[#allocation6 + $0x278] sm:$0xff] }
 0x744   :  { %1345 = vrot.lane.b32.xlu1 %v7459_v61, %s7317_s27 }
 0x745   :  { %1269 = vrot.lane.b32.xlu0 %v7461_v63, %s7317_s27 }
 0x748   :  { %1423 = vrot.lane.b32.xlu1 %v7435_v54, %s7318_s28 }
 0x74c   :  { %1501 = vrot.lane.b32.xlu1 %v7442_v57, %s7318_s28 }
 0x750   :  { %1499 = vrot.lane.b32.xlu1 %v7452_v58, %s7318_s28 }
 0x7bc   :  { %v1249_v11 = vpop.xlane.xlu0 %1248 }
 0x7bd   :  { %v1253_v12 = vsub.f32 %v1165_v4, %v1249_v11  ;;  %v1787_v4 = vld [vmem:[#allocation6 + $0x258] sm:$0xff]  ;;  %v6892_v11 = vpack.c.bf16 %v1791_v10, %v1790_v9 }
 0x7bf   :  { %v1255_v13 = vmul.f32 1.442695, %v1253_v12  ;;  %v1879_v12 = vld [vmem:[#allocation6 + $0xc0] sm:$0xff] }
 0x7c0   :  { %v1270_v14 = vpop.permute.xlu0 %1269  ;;  %v1252_v15 = vpop.xlane.xlu1 %1251 }
 0x7c1   :  { %7118 = vpow2.f32 %v1255_v13  ;;  %v1254_v16 = vsub.f32 %v1243_v8, %v1252_v15  ;;  %6392 = vmatpush3.msra.mxu1 %v1270_v14  ;;  %v6888_v8 = vpack.c.bf16 %v1789_v7, %v1788_v6  ;;  %v1880_v13 = vld [vmem:[#allocation6 + $0xc8] sm:$0xff]  ;;  %v1974_v14 = vld [vmem:[#allocation6 + $0x100] sm:$0xff] }
 0x7c2   :  { %6401 = vmatprep.subr.mxu1 %v7314_v46  ;;  %v6896_v15 = vpack.c.bf16 %v1880_v13, %v1879_v12  ;;  %v5925_v6 = vld [vmem:[#allocation7 + $0x5] ss:$0 sm:$0xff]  ;;  %v5928_v7 = vld [vmem:[#allocation7 + $0x6] ss:$0 sm:$0xff] }
 0x7c3   :  { %v1257_v17 = vmul.f32 1.442695, %v1254_v16  ;;  %v1975_v16 = vld [vmem:[#allocation6 + $0x108] sm:$0xff] }
 0x7c4   :  { %v1346_v18 = vpop.permute.xlu1 %1345 }
 0x7c5   :  { %7120 = vpow2.f32 %v1257_v17  ;;  %6397 = vmatpush3.msra.mxu0 %v1346_v18  ;;  %v1881_v17 = vld [vmem:[#allocation6 + $0xd0] sm:$0xff]  ;;  %v1882_v18 = vld [vmem:[#allocation6 + $0xd8] sm:$0xff] }
 0x7c6   :  { %6406 = vmatprep.subr.mxu0 %v7314_v46 }
 0x7c8   :  { %v1424_v22 = vpop.permute.xlu1 %1423 }
 0x7cb   :  { %v7119_v54 = vpop.eup %7118 }
 0x7cc   :  { %v1259_v57 = vsel %vm590_vm3, %v7119_v54, 0.0  ;;  %v1502_v27 = vpop.permute.xlu1 %1501 }
 0x7cd   :  { %1260 = vadd.xlane.f32.xlu0 %v1259_v57  ;;  %v6900_v57 = vpack.c.bf16 %v1882_v18, %v1881_v17  ;;  %v5931_v18 = vld [vmem:[#allocation7 + $0x7] ss:$0 sm:$0xff] }
 0x7cf   :  { %v7121_v58 = vpop.eup %7120 }
 0x7d0   :  { %v1262_v19 = vsel %vm590_vm3, %v7121_v58, 0.0  ;;  %v1500_v30 = vpop.permute.xlu1 %1499 }
 0x7d1   :  { %1263 = vadd.xlane.f32.xlu0 %v1262_v19  ;;  %v1884_v19 = vld [vmem:[#allocation6 + $0xe8] sm:$0xff] }
 0x7e7   :  { %1421 = vrot.lane.b32.xlu0 %v7437_v55, %s7318_s28 }
 0x85a   :  { %v1261_v20 = vpop.xlane.xlu0 %1260 }
 0x85b   :  { %7122 = vrcp.f32 %v1261_v20 }
 0x85e   :  { %v1264_v21 = vpop.xlane.xlu0 %1263 }
 0x85f   :  { %7124 = vrcp.f32 %v1264_v21 }
 0x862   :  { %v1422_v55 = vpop.permute.xlu0 %1421 }
 0x865   :  { %v7123_v23 = vpop.eup %7122 }
 0x866   :  { %v1267_v24 = vmul.f32 %v7123_v23, %v7119_v54  ;;  %v6912_v54 = vpack.c.bf16 %v1975_v16, %v1974_v14 }
 0x868   :  { %6394 = vmatmul.mubr.msk.f32.vlgmr.msra.gmra.mrb[8].mxu1 %vm590_vm3, %v1267_v24 }
 0x869   :  { %v7125_v25 = vpop.eup %7124  ;;  %6402 = vmatpush3.xpose.msk.msra.mxu1 %vm81_vm0, %v1424_v22  ;;  %6403 = vmatprep.mubr.msk.f32.mxu1 %vm7315_vm2, %v7314_v46 }
 0x86a   :  { %v1268_v29 = vmul.f32 %v7125_v25, %v7121_v58  ;;  %6411 = vmatprep.subr.mxu1 %v7314_v46  ;;  %v1883_v58 = vld [vmem:[#allocation6 + $0xe0] sm:$0xff] }
 0x86b   :  { %v6904_v20 = vpack.c.bf16 %v1884_v19, %v1883_v58 }
 0x86c   :  { %6399 = vmatmul.mubr.msk.f32.vlgmr.msra.gmra.mrb[20].mxu0 %vm590_vm3, %v1268_v29  ;;  %6404 = vmatmul.mubr.msk.f32.vlgmr.msra.gmra.mrb[10].mxu1 %vm81_vm0, %v1422_v55 }
 0x86d   :  { %6407 = vmatpush3.xpose.msk.msra.mxu0 %vm81_vm0, %v1502_v27  ;;  %6408 = vmatprep.mubr.msk.f32.mxu0 %vm7315_vm2, %v7314_v46 }
 0x86e   :  { %6416 = vmatprep.subr.mxu0 %v7314_v46  ;;  %6413 = vmatprep.mubr.msk.f32.mxu1 %vm7315_vm2, %v7314_v46 }
 0x870   :  { %6409 = vmatmul.mubr.msk.f32.vlgmr.msra.gmra.mrb[22].mxu0 %vm81_vm0, %v1500_v30 }
 0x871   :  { %6418 = vmatprep.mubr.msk.f32.mxu0 %vm7315_vm2, %v7314_v46 }
 0x93b   :  { %v1341_v31 = vpop.f32.mrb[8].mxu1 }
 0x93c   :  { %v6395_v32 = vpop.f32.mrb[9].mxu1 }
 0x93f   :  { %v1417_v33 = vpop.f32.mrb[20].mxu0  ;;  %v1495_v34 = vpop.f32.mrb[10].mxu1 }
 0x940   :  { %v6400_v35 = vpop.f32.mrb[21].mxu0  ;;  %v6405_v36 = vpop.f32.mrb[11].mxu1  ;;  %v1577_v37 = vsel %vm590_vm3, %v1495_v34, -inf }
 0x941   :  { %1578 = vmax.xlane.f32.xlu0 %v1577_v37  ;;  %v1977_v35 = vld [vmem:[#allocation6 + $0x118] sm:$0xff] }
 0x943   :  { %v1573_v38 = vpop.f32.mrb[22].mxu0 }
 0x944   :  { %v6410_v39 = vpop.f32.mrb[23].mxu0  ;;  %v1580_v40 = vsel %vm590_vm3, %v1573_v38, -inf }
 0x945   :  { %1581 = vmax.xlane.f32.xlu1 %v1580_v40  ;;  %v1978_v40 = vld [vmem:[#allocation6 + $0x120] sm:$0xff] }
 0x956   :  { %1675 = vrot.lane.b32.xlu1 %v7459_v61, %s7318_s28 }
 0x95a   :  { %1753 = vrot.lane.b32.xlu1 %v7531_v1, %s7319_s12  ;;  %v1784_v1 = vld [vmem:[#allocation6 + $0x240] sm:$0xff] }
 0x95e   :  { %1755 = vrot.lane.b32.xlu1 %v7533_v3, %s7319_s12  ;;  %v1786_v3 = vld [vmem:[#allocation6 + $0x250] sm:$0xff] }
 0x95f   :  { %v6884_v5 = vpack.c.bf16 %v1787_v4, %v1786_v3  ;;  %v2070_v4 = vld [vmem:[#allocation6 + $0x178] sm:$0xff] }
 0x962   :  { %1763 = vrot.lane.b32.xlu1 %v1417_v33, %s7320_s1 }
 0x9ce   :  { %v1579_v41 = vpop.xlane.xlu0 %1578 }
 0x9cf   :  { %v1583_v42 = vsub.f32 %v1495_v34, %v1579_v41  ;;  %v1976_v34 = vld [vmem:[#allocation6 + $0x110] sm:$0xff]  ;;  %v1979_v41 = vld [vmem:[#allocation6 + $0x128] sm:$0xff] }
 0x9d0   :  { %v6916_v39 = vpack.c.bf16 %v1977_v35, %v1976_v34 }
 0x9d1   :  { %v1585_v43 = vmul.f32 1.442695, %v1583_v42  ;;  %v6920_v42 = vpack.c.bf16 %v1979_v41, %v1978_v40 }
 0x9d2   :  { %v1582_v44 = vpop.xlane.xlu1 %1581 }
 0x9d3   :  { %7126 = vpow2.f32 %v1585_v43  ;;  %v1584_v45 = vsub.f32 %v1573_v38, %v1582_v44  ;;  %v1885_v43 = vld [vmem:[#allocation6 + $0xf0] sm:$0xff]  ;;  %v1886_v44 = vld [vmem:[#allocation6 + $0xf8] sm:$0xff] }
 0x9d5   :  { %v1587_v47 = vmul.f32 1.442695, %v1584_v45  ;;  %v6908_v45 = vpack.c.bf16 %v1886_v44, %v1885_v43 }
 0x9d6   :  { %v1676_v48 = vpop.permute.xlu1 %1675 }
 0x9d7   :  { %7128 = vpow2.f32 %v1587_v47  ;;  %6417 = vmatpush3.msra.mxu0 %v1676_v48  ;;  %v1981_v47 = vld [vmem:[#allocation6 + $0x138] sm:$0xff] }
 0x9d8   :  { %6897 = vmatprep.subr.bf16.mxu0 %v6896_v15 }
 0x9da   :  { %v1754_v25 = vpop.permute.xlu1 %1753 }
 0x9db   :  { %v1775_v55 = vsel %vm81_vm0, %v7493_v26, %v1754_v25 }
 0x9dd   :  { %v7127_v61 = vpop.eup %7126 }
 0x9de   :  { %v1589_v49 = vsel %vm590_vm3, %v7127_v61, 0.0  ;;  %v1756_v27 = vpop.permute.xlu1 %1755 }
 0x9df   :  { %1590 = vadd.xlane.f32.xlu0 %v1589_v49  ;;  %v1776_v36 = vsel %vm81_vm0, %v7495_v28, %v1756_v27  ;;  %v1980_v28 = vld [vmem:[#allocation6 + $0x130] sm:$0xff]  ;;  %v2064_v49 = vld [vmem:[#allocation6 + $0x148] sm:$0xff] }
 0x9e0   :  { %v6924_v48 = vpack.c.bf16 %v1981_v47, %v1980_v28 }
 0x9e1   :  { %v7129_v50 = vpop.eup %7128 }
 0x9e2   :  { %v1592_v51 = vsel %vm590_vm3, %v7129_v50, 0.0  ;;  %v1764_v30 = vpop.permute.xlu1 %1763 }
 0x9e3   :  { %1593 = vadd.xlane.f32.xlu0 %v1592_v51  ;;  %v1779_v37 = vsel %vm1777_vm5, %v1776_v36, %v1764_v30  ;;  %v5922_v51 = vld [vmem:[#allocation7 + $0x4] ss:$0 sm:$0xff] }
 0x9f9   :  { %1599 = vrot.lane.b32.xlu0 %v7461_v63, %s7318_s28  ;;  %v6880_v63 = vpack.c.bf16 %v1785_v2, %v1784_v1  ;;  %v2067_v1 = vld [vmem:[#allocation6 + $0x160] sm:$0xff]  ;;  %v2068_v2 = vld [vmem:[#allocation6 + $0x168] sm:$0xff] }
 0x9fa   :  { %v6936_v3 = vpack.c.bf16 %v2068_v2, %v2067_v1 }
 0x9fd   :  { %1761 = vrot.lane.b32.xlu0 %v1341_v31, %s7320_s1 }
 0xa6c   :  { %v1591_v52 = vpop.xlane.xlu0 %1590 }
 0xa6d   :  { %7130 = vrcp.f32 %v1591_v52 }
 0xa70   :  { %v1594_v53 = vpop.xlane.xlu0 %1593 }
 0xa71   :  { %7132 = vrcp.f32 %v1594_v53  ;;  %v2065_v53 = vld [vmem:[#allocation6 + $0x150] sm:$0xff] }
 0xa74   :  { %v1600_v56 = vpop.permute.xlu0 %1599 }
 0xa75   :  { %6412 = vmatpush3.msra.mxu1 %v1600_v56  ;;  %v2066_v56 = vld [vmem:[#allocation6 + $0x158] sm:$0xff] }
 0xa76   :  { %6881 = vmatprep.subr.bf16.mxu1 %v6880_v63 }
 0xa77   :  { %v7131_v59 = vpop.eup %7130 }
 0xa78   :  { %v1597_v60 = vmul.f32 %v7131_v59, %v7127_v61  ;;  %v1762_v29 = vpop.permute.xlu0 %1761  ;;  %v2063_v61 = vld [vmem:[#allocation6 + $0x140] sm:$0xff] }
 0xa79   :  { %v1778_v31 = vsel %vm1777_vm5, %v1775_v55, %v1762_v29 }
 0xa7a   :  { %6414 = vmatmul.mubr.msk.f32.vlgmr.msra.gmra.mrb[12].mxu1 %vm590_vm3, %v1597_v60 }
 0xa7b   :  { %v7133_v62 = vpop.eup %7132  ;;  %6883 = vmatpush3.bf16.msra.mxu1 %v6880_v63  ;;  %v2069_v63 = vld [vmem:[#allocation6 + $0x170] sm:$0xff] }
 0xa7c   :  { %v1598_v0 = vmul.f32 %v7133_v62, %v7129_v50  ;;  %6885 = vmatprep.subr.bf16.mxu1 %v6884_v5  ;;  %v6928_v50 = vpack.c.bf16 %v2064_v49, %v2063_v61 }
 0xa7e   :  { %6419 = vmatmul.mubr.msk.f32.vlgmr.msra.gmra.mrb[24].mxu0 %vm590_vm3, %v1598_v0  ;;  %v6932_v0 = vpack.c.bf16 %v2066_v56, %v2065_v53 }
 0xa7f   :  { %6887 = vmatpush3.bf16.msra.mxu1 %v6884_v5  ;;  %6899 = vmatpush3.bf16.msra.mxu0 %v6896_v15  ;;  %v6940_v5 = vpack.c.bf16 %v2070_v4, %v2069_v63 }
 0xa80   :  { %6889 = vmatprep.subr.bf16.mxu1 %v6888_v8  ;;  %6901 = vmatprep.subr.bf16.mxu0 %v6900_v57 }
 0xa83   :  { %6891 = vmatpush3.bf16.msra.mxu1 %v6888_v8  ;;  %6903 = vmatpush3.bf16.msra.mxu0 %v6900_v57 }
 0xa84   :  { %6893 = vmatprep.subr.bf16.mxu1 %v6892_v11  ;;  %6905 = vmatprep.subr.bf16.mxu0 %v6904_v20 }
 0xa87   :  { %6895 = vmatpush3.bf16.msra.mxu1 %v6892_v11  ;;  %6907 = vmatpush3.bf16.msra.mxu0 %v6904_v20 }
 0xa88   :  { %6913 = vmatprep.subr.bf16.mxu1 %v6912_v54  ;;  %6909 = vmatprep.subr.bf16.mxu0 %v6908_v45 }
 0xa8b   :  { %6911 = vmatpush3.bf16.msra.mxu0 %v6908_v45 }
 0xa8c   :  { %6929 = vmatprep.subr.bf16.mxu0 %v6928_v50 }
 0xb4d   :  { %v1671_v21 = vpop.f32.mrb[12].mxu1 }
 0xb4e   :  { %1769 = vrot.lane.b32.xlu0 %v1671_v21, %s7321_s13  ;;  %v6415_v22 = vpop.f32.mrb[13].mxu1 }
 0xb51   :  { %v1747_v23 = vpop.f32.mrb[24].mxu0 }
 0xb52   :  { %1771 = vrot.lane.b32.xlu1 %v1747_v23, %s7321_s13  ;;  %v6420_v24 = vpop.f32.mrb[25].mxu0 }
 0xbc0   :  { %v1770_v32 = vpop.permute.xlu0 %1769 }
 0xbc1   :  { %v1781_v33 = vsel %vm1780_vm4, %v1778_v31, %v1770_v32 }
 0xbc2   :  { %6437 = vmatprep.mubr.msk.f32.mxu1 %vm176_vm1, %v1781_v33 }
 0xbc4   :  { %v1772_v38 = vpop.permute.xlu1 %1771 }
 0xbc5   :  { %v1782_v26 = vsel %vm1780_vm4, %v1779_v37, %v1772_v38 }
 0xbc6   :  { %6438 = vmatmul.mubr.msk.f32.vlgmr.msra.gmra.mrb[14].mxu1 %vm176_vm1, %v1782_v26 }
 0xbc7   :  { %6915 = vmatpush3.bf16.msra.mxu1 %v6912_v54 }
 0xbc8   :  { %6917 = vmatprep.subr.bf16.mxu1 %v6916_v39 }
 0xbcb   :  { %6919 = vmatpush3.bf16.msra.mxu1 %v6916_v39 }
 0xbcc   :  { %6921 = vmatprep.subr.bf16.mxu1 %v6920_v42 }
 0xbcf   :  { %6923 = vmatpush3.bf16.msra.mxu1 %v6920_v42 }
 0xbd0   :  { %6925 = vmatprep.subr.bf16.mxu1 %v6924_v48 }
 0xbd3   :  { %6927 = vmatpush3.bf16.msra.mxu1 %v6924_v48 }
 0xbd4   :  { %6497 = vmatprep.subr.mxu1 %v7314_v46 }
 0xc99   :  { %v6439_v52 = vpop.f32.mrb[14].mxu1 }
 0xc9a   :  { %v1869_v59 = vpop.f32.mrb[15].mxu1  ;;  %v7600_v62 = vadd.f32 %v6439_v52, %v5922_v51 }
 0xc9b   :  { %v7598_v60 = vadd.f32 %v5922_v51, %v1869_v59 }
 0xc9d   :  { %6456 = vmatprep.mubr.msk.f32.mxu0 %vm176_vm1, %v7598_v60  ;;  %6475 = vmatprep.mubr.msk.f32.mxu1 %vm176_vm1, %v7598_v60 }
 0xc9e   :  { %6457 = vmatmul.mubr.msk.f32.vlgmr.msra.gmra.mrb[26].mxu0 %vm176_vm1, %v7600_v62  ;;  %6476 = vmatmul.mubr.msk.f32.vlgmr.msra.gmra.mrb[16].mxu1 %vm176_vm1, %v7600_v62 }
 0xc9f   :  { %6931 = vmatpush3.bf16.msra.mxu0 %v6928_v50  ;;  %6494 = vmatprep.mubr.msk.f32.mxu0 %vm176_vm1, %v7598_v60 }
 0xca0   :  { %6933 = vmatprep.subr.bf16.mxu0 %v6932_v0  ;;  %6499 = vmatprep.mubr.msk.f32.mxu1 %vm7315_vm2, %v7314_v46 }
 0xca3   :  { %6935 = vmatpush3.bf16.msra.mxu0 %v6932_v0 }
 0xca4   :  { %6937 = vmatprep.subr.bf16.mxu0 %v6936_v3 }
 0xca7   :  { %6939 = vmatpush3.bf16.msra.mxu0 %v6936_v3 }
 0xca8   :  { %6941 = vmatprep.subr.bf16.mxu0 %v6940_v5 }
 0xcab   :  { %6943 = vmatpush3.bf16.msra.mxu0 %v6940_v5 }
 0xcac   :  { %6502 = vmatprep.subr.mxu0 %v7314_v46 }
 0xcae   :  { %6495 = vmatmul.mubr.msk.f32.vlgmr.msra.gmra.mrb[28].mxu0 %vm176_vm1, %v7600_v62 }
 0xcaf   :  { %6504 = vmatprep.mubr.msk.f32.mxu0 %vm7315_vm2, %v7314_v46 }
 0xd71   :  { %v6458_v8 = vpop.f32.mrb[26].mxu0  ;;  %v6477_v9 = vpop.f32.mrb[16].mxu1 }
 0xd72   :  { %v1970_v10 = vadd.f32 %v6458_v8, %v5925_v6  ;;  %v7619_v11 = vadd.f32 %v6477_v9, %v5928_v7  ;;  %v1964_v12 = vpop.f32.mrb[27].mxu0  ;;  %v2053_v13 = vpop.f32.mrb[17].mxu1 }
 0xd73   :  { %v1965_v14 = vadd.f32 %v5925_v6, %v1964_v12  ;;  %v7621_v15 = vadd.f32 %v5928_v7, %v2053_v13 }
 0xd74   :  { %v7623_v16 = vmul.f32 0.25, %v1970_v10  ;;  %6503 = vmatpush3.xpose.msk.msra.mxu0 %vm81_vm0, %v7619_v11 }
 0xd75   :  { %v7627_v17 = vmul.f32 0.25, %v1965_v14  ;;  %6498 = vmatpush3.xpose.msk.msra.mxu1 %vm81_vm0, %v7621_v15  ;;  %6512 = vmatprep.subr.mxu0 %v7314_v46 }
 0xd76   :  { %6507 = vmatprep.subr.mxu1 %v7314_v46 }
 0xd77   :  { %6505 = vmatmul.mubr.msk.f32.vlgmr.msra.gmra.mrb[30].mxu0 %vm81_vm0, %v7623_v16 }
 0xd78   :  { %6500 = vmatmul.mubr.msk.f32.vlgmr.msra.gmra.mrb[18].mxu1 %vm81_vm0, %v7627_v17  ;;  %6514 = vmatprep.mubr.msk.f32.mxu0 %vm7315_vm2, %v7314_v46 }
 0xd79   :  { %6509 = vmatprep.mubr.msk.f32.mxu1 %vm7315_vm2, %v7314_v46 }
 0xd81   :  { %v6496_v54 = vpop.f32.mrb[28].mxu0 }
 0xd82   :  { %v7641_v57 = vadd.f32 %v6496_v54, %v5931_v18  ;;  %v2142_v58 = vpop.f32.mrb[29].mxu0 }
 0xd83   :  { %v7643_v19 = vadd.f32 %v5931_v18, %v2142_v58 }
 0xd84   :  { %6513 = vmatpush3.msra.mxu0 %v7641_v57 }
 0xd85   :  { %6508 = vmatpush3.msra.mxu1 %v7643_v19  ;;  %6522 = vmatprep.subr.mxu0 %v7314_v46 }
 0xd86   :  { %6517 = vmatprep.subr.mxu1 %v7314_v46 }
 0xe4a   :  { %v2301_v20 = vpop.f32.mrb[30].mxu0 }
 0xe4b   :  { %v2225_v21 = vpop.f32.mrb[18].mxu1  ;;  %v6506_v22 = vpop.f32.mrb[31].mxu0  ;;  %v2308_v23 = vsel %vm590_vm3, %v2301_v20, -inf }
 0xe4c   :  { %2309 = vmax.xlane.f32.xlu1 %v2308_v23  ;;  %v6501_v24 = vpop.f32.mrb[19].mxu1  ;;  %v2305_v25 = vsel %vm590_vm3, %v2225_v21, -inf }
 0xe4d   :  { %2306 = vmax.xlane.f32.xlu0 %v2305_v25 }
 0xe5d   :  { %2553 = vrot.lane.b32.xlu1 %v7619_v11, %s7316_s3 }
 0xe61   :  { %2473 = vrot.lane.b32.xlu1 %v7627_v17, %s7316_s3 }
 0xe65   :  { %2551 = vrot.lane.b32.xlu1 %v7623_v16, %s7316_s3 }
 0xed9   :  { %v2310_v27 = vpop.xlane.xlu1 %2309 }
 0xeda   :  { %v2312_v29 = vsub.f32 %v2301_v20, %v2310_v27  ;;  %v2307_v55 = vpop.xlane.xlu0 %2306 }
 0xedb   :  { %v2311_v30 = vsub.f32 %v2225_v21, %v2307_v55 }
 0xedc   :  { %v2315_v31 = vmul.f32 1.442695, %v2312_v29 }
 0xedd   :  { %v2313_v32 = vmul.f32 1.442695, %v2311_v30  ;;  %v2554_v39 = vpop.permute.xlu1 %2553 }
 0xede   :  { %7134 = vpow2.f32 %v2315_v31 }
 0xedf   :  { %7136 = vpow2.f32 %v2313_v32 }
 0xee1   :  { %v2474_v40 = vpop.permute.xlu1 %2473 }
 0xee5   :  { %v2552_v44 = vpop.permute.xlu1 %2551 }
 0xee8   :  { %v7135_v33 = vpop.eup %7134 }
 0xee9   :  { %v2320_v34 = vsel %vm590_vm3, %v7135_v33, 0.0  ;;  %v7137_v35 = vpop.eup %7136 }
 0xeea   :  { %2321 = vadd.xlane.f32.xlu0 %v2320_v34  ;;  %v2317_v36 = vsel %vm590_vm3, %v7137_v35, 0.0 }
 0xeee   :  { %2318 = vadd.xlane.f32.xlu0 %v2317_v36 }
 0xf04   :  { %2475 = vrot.lane.b32.xlu0 %v7621_v15, %s7316_s3 }
 0xf77   :  { %v2322_v37 = vpop.xlane.xlu0 %2321 }
 0xf78   :  { %7138 = vrcp.f32 %v2322_v37 }
 0xf7b   :  { %v2319_v38 = vpop.xlane.xlu0 %2318 }
 0xf7c   :  { %7140 = vrcp.f32 %v2319_v38 }
 0xf7f   :  { %v2476_v45 = vpop.permute.xlu0 %2475 }
 0xf82   :  { %v7139_v26 = vpop.eup %7138 }
 0xf83   :  { %v2326_v41 = vmul.f32 %v7139_v26, %v7135_v33 }
 0xf85   :  { %6515 = vmatmul.mubr.msk.f32.vlgmr.msra.gmra.mrb[32].mxu0 %vm590_vm3, %v2326_v41 }
 0xf86   :  { %v7141_v42 = vpop.eup %7140  ;;  %6523 = vmatpush3.xpose.msk.msra.mxu0 %vm81_vm0, %v2554_v39  ;;  %6524 = vmatprep.mubr.msk.f32.mxu0 %vm7315_vm2, %v7314_v46 }
 0xf87   :  { %v2325_v43 = vmul.f32 %v7141_v42, %v7137_v35  ;;  %6532 = vmatprep.subr.mxu0 %v7314_v46 }
 0xf89   :  { %6510 = vmatmul.mubr.msk.f32.vlgmr.msra.gmra.mrb[20].mxu1 %vm590_vm3, %v2325_v43  ;;  %6525 = vmatmul.mubr.msk.f32.vlgmr.msra.gmra.mrb[34].mxu0 %vm81_vm0, %v2552_v44 }
 0xf8a   :  { %6518 = vmatpush3.xpose.msk.msra.mxu1 %vm81_vm0, %v2476_v45  ;;  %6519 = vmatprep.mubr.msk.f32.mxu1 %vm7315_vm2, %v7314_v46 }
 0xf8b   :  { %6527 = vmatprep.subr.mxu1 %v7314_v46  ;;  %6534 = vmatprep.mubr.msk.f32.mxu0 %vm7315_vm2, %v7314_v46 }
 0xf8d   :  { %6520 = vmatmul.mubr.msk.f32.vlgmr.msra.gmra.mrb[22].mxu1 %vm81_vm0, %v2474_v40 }
 0xf8e   :  { %6529 = vmatprep.mubr.msk.f32.mxu1 %vm7315_vm2, %v7314_v46 }
0x1058   :  { %v7677_v28 = vpop.f32.mrb[32].mxu0 }
0x1059   :  { %v6516_v47 = vpop.f32.mrb[33].mxu0 }
0x105c   :  { %v7679_v48 = vpop.f32.mrb[20].mxu1  ;;  %v2625_v61 = vpop.f32.mrb[34].mxu0 }
0x105d   :  { %v6511_v49 = vpop.f32.mrb[21].mxu1  ;;  %v6526_v50 = vpop.f32.mrb[35].mxu0  ;;  %v2632_v51 = vsel %vm590_vm3, %v2625_v61, -inf }
0x105e   :  { %2633 = vmax.xlane.f32.xlu1 %v2632_v51 }
0x1060   :  { %v2547_v52 = vpop.f32.mrb[22].mxu1 }
0x1061   :  { %v6521_v53 = vpop.f32.mrb[23].mxu1  ;;  %v2629_v56 = vsel %vm590_vm3, %v2547_v52, -inf }
0x1062   :  { %2630 = vmax.xlane.f32.xlu0 %v2629_v56 }
0x106f   :  { %2729 = vrot.lane.b32.xlu1 %v7641_v57, %s7316_s3 }
0x1073   :  { %2807 = vrot.lane.b32.xlu1 %v7621_v15, %s7317_s27 }
0x1077   :  { %2885 = vrot.lane.b32.xlu1 %v7619_v11, %s7317_s27 }
0x1078   :  { %2652 = vrot.lane.b32.xlu0 %v7643_v19, %s7316_s3 }
0x107b   :  { %2883 = vrot.lane.b32.xlu1 %v7623_v16, %s7317_s27 }
0x10eb   :  { %v2634_v59 = vpop.xlane.xlu1 %2633 }
0x10ec   :  { %v2636_v0 = vsub.f32 %v2625_v61, %v2634_v59 }
0x10ee   :  { %v2639_v1 = vmul.f32 1.442695, %v2636_v0 }
0x10ef   :  { %v2730_v2 = vpop.permute.xlu1 %2729  ;;  %v2631_v3 = vpop.xlane.xlu0 %2630 }
0x10f0   :  { %7142 = vpow2.f32 %v2639_v1  ;;  %v2635_v63 = vsub.f32 %v2547_v52, %v2631_v3  ;;  %6533 = vmatpush3.msra.mxu0 %v2730_v2 }
0x10f1   :  { %6542 = vmatprep.subr.mxu0 %v7314_v46 }
0x10f2   :  { %v2637_v4 = vmul.f32 1.442695, %v2635_v63 }
0x10f3   :  { %v2653_v5 = vpop.permute.xlu0 %2652  ;;  %v2808_v13 = vpop.permute.xlu1 %2807 }
0x10f4   :  { %7144 = vpow2.f32 %v2637_v4  ;;  %6528 = vmatpush3.msra.mxu1 %v2653_v5 }
0x10f5   :  { %6537 = vmatprep.subr.mxu1 %v7314_v46 }
0x10f7   :  { %v2886_v18 = vpop.permute.xlu1 %2885 }
0x10fa   :  { %v7143_v6 = vpop.eup %7142 }
0x10fb   :  { %v2644_v7 = vsel %vm590_vm3, %v7143_v6, 0.0  ;;  %v2884_v21 = vpop.permute.xlu1 %2883 }
0x10fc   :  { %2645 = vadd.xlane.f32.xlu0 %v2644_v7 }
0x10fe   :  { %v7145_v8 = vpop.eup %7144 }
0x10ff   :  { %v2641_v9 = vsel %vm590_vm3, %v7145_v8, 0.0 }
0x1100   :  { %2642 = vadd.xlane.f32.xlu0 %v2641_v9 }
0x1116   :  { %2805 = vrot.lane.b32.xlu0 %v7627_v17, %s7317_s27 }
0x1189   :  { %v2646_v10 = vpop.xlane.xlu0 %2645 }
0x118a   :  { %7146 = vrcp.f32 %v2646_v10 }
0x118d   :  { %v2643_v12 = vpop.xlane.xlu0 %2642 }
0x118e   :  { %7148 = vrcp.f32 %v2643_v12 }
0x1191   :  { %v2806_v22 = vpop.permute.xlu0 %2805 }
0x1194   :  { %v7147_v14 = vpop.eup %7146 }
0x1195   :  { %v2650_v54 = vmul.f32 %v7147_v14, %v7143_v6 }
0x1197   :  { %6535 = vmatmul.mubr.msk.f32.vlgmr.msra.gmra.mrb[36].mxu0 %vm590_vm3, %v2650_v54 }
0x1198   :  { %v7149_v58 = vpop.eup %7148  ;;  %6543 = vmatpush3.xpose.msk.msra.mxu0 %vm81_vm0, %v2886_v18  ;;  %6544 = vmatprep.mubr.msk.f32.mxu0 %vm7315_vm2, %v7314_v46 }
0x1199   :  { %v2649_v20 = vmul.f32 %v7149_v58, %v7145_v8  ;;  %6552 = vmatprep.subr.mxu0 %v7314_v46 }
0x119b   :  { %6530 = vmatmul.mubr.msk.f32.vlgmr.msra.gmra.mrb[24].mxu1 %vm590_vm3, %v2649_v20  ;;  %6545 = vmatmul.mubr.msk.f32.vlgmr.msra.gmra.mrb[38].mxu0 %vm81_vm0, %v2884_v21 }
0x119c   :  { %6538 = vmatpush3.xpose.msk.msra.mxu1 %vm81_vm0, %v2808_v13  ;;  %6539 = vmatprep.mubr.msk.f32.mxu1 %vm7315_vm2, %v7314_v46 }
0x119d   :  { %6547 = vmatprep.subr.mxu1 %v7314_v46  ;;  %6554 = vmatprep.mubr.msk.f32.mxu0 %vm7315_vm2, %v7314_v46 }
0x119f   :  { %6540 = vmatmul.mubr.msk.f32.vlgmr.msra.gmra.mrb[26].mxu1 %vm81_vm0, %v2806_v22 }
0x11a0   :  { %6549 = vmatprep.mubr.msk.f32.mxu1 %vm7315_vm2, %v7314_v46 }
0x126a   :  { %v7715_v23 = vpop.f32.mrb[36].mxu0 }
0x126b   :  { %v6536_v24 = vpop.f32.mrb[37].mxu0 }
0x126e   :  { %v7717_v25 = vpop.f32.mrb[24].mxu1  ;;  %v2957_v27 = vpop.f32.mrb[38].mxu0 }
0x126f   :  { %v6531_v29 = vpop.f32.mrb[25].mxu1  ;;  %v6546_v55 = vpop.f32.mrb[39].mxu0  ;;  %v2964_v30 = vsel %vm590_vm3, %v2957_v27, -inf }
0x1270   :  { %2965 = vmax.xlane.f32.xlu1 %v2964_v30  ;;  %v3498_v29 = vld [vmem:[#allocation6 + $0x290] sm:$0xff]  ;;  %v3499_v55 = vld [vmem:[#allocation6 + $0x298] sm:$0xff] }
0x1271   :  { %v6948_v30 = vpack.c.bf16 %v3499_v55, %v3498_v29  ;;  %v3735_v29 = vld [vmem:[#allocation6 + $0x360] sm:$0xff] }
0x1272   :  { %v2879_v31 = vpop.f32.mrb[26].mxu1 }
0x1273   :  { %v6541_v32 = vpop.f32.mrb[27].mxu1  ;;  %v2961_v33 = vsel %vm590_vm3, %v2879_v31, -inf }
0x1274   :  { %2962 = vmax.xlane.f32.xlu0 %v2961_v33  ;;  %v3501_v32 = vld [vmem:[#allocation6 + $0x2a8] sm:$0xff] }
0x1281   :  { %3059 = vrot.lane.b32.xlu1 %v7641_v57, %s7317_s27 }
0x1285   :  { %3137 = vrot.lane.b32.xlu1 %v7621_v15, %s7318_s28 }
0x1289   :  { %3215 = vrot.lane.b32.xlu1 %v7619_v11, %s7318_s28 }
0x128a   :  { %2983 = vrot.lane.b32.xlu0 %v7643_v19, %s7317_s27 }
0x128d   :  { %3213 = vrot.lane.b32.xlu1 %v7623_v16, %s7318_s28 }
0x12fd   :  { %v2966_v34 = vpop.xlane.xlu1 %2965 }
0x12fe   :  { %v2968_v35 = vsub.f32 %v2957_v27, %v2966_v34  ;;  %v3497_v27 = vld [vmem:[#allocation6 + $0x288] sm:$0xff]  ;;  %v3502_v34 = vld [vmem:[#allocation6 + $0x2b0] sm:$0xff] }
0x1300   :  { %v2971_v36 = vmul.f32 1.442695, %v2968_v35  ;;  %v3503_v35 = vld [vmem:[#allocation6 + $0x2b8] sm:$0xff] }
0x1301   :  { %v3060_v37 = vpop.permute.xlu1 %3059  ;;  %v2963_v38 = vpop.xlane.xlu0 %2962 }
0x1302   :  { %7150 = vpow2.f32 %v2971_v36  ;;  %v2967_v39 = vsub.f32 %v2879_v31, %v2963_v38  ;;  %6553 = vmatpush3.msra.mxu0 %v3060_v37  ;;  %v3500_v31 = vld [vmem:[#allocation6 + $0x2a0] sm:$0xff]  ;;  %v6956_v36 = vpack.c.bf16 %v3503_v35, %v3502_v34 }
0x1303   :  { %6562 = vmatprep.subr.mxu0 %v7314_v46  ;;  %v6952_v33 = vpack.c.bf16 %v3501_v32, %v3500_v31 }
0x1304   :  { %v2969_v15 = vmul.f32 1.442695, %v2967_v39 }
0x1305   :  { %v2984_v26 = vpop.permute.xlu0 %2983  ;;  %v3138_v44 = vpop.permute.xlu1 %3137 }
0x1306   :  { %7152 = vpow2.f32 %v2969_v15  ;;  %6548 = vmatpush3.msra.mxu1 %v2984_v26 }
0x1307   :  { %6557 = vmatprep.subr.mxu1 %v7314_v46 }
0x1309   :  { %v3216_v47 = vpop.permute.xlu1 %3215 }
0x130c   :  { %v7151_v11 = vpop.eup %7150 }
0x130d   :  { %v2976_v40 = vsel %vm590_vm3, %v7151_v11, 0.0 }
0x130e   :  { %2977 = vadd.xlane.f32.xlu0 %v2976_v40 }
0x1310   :  { %v7153_v16 = vpop.eup %7152 }
0x1311   :  { %v2973_v41 = vsel %vm590_vm3, %v7153_v16, 0.0 }
0x1312   :  { %2974 = vadd.xlane.f32.xlu0 %v2973_v41 }
0x1328   :  { %3135 = vrot.lane.b32.xlu0 %v7627_v17, %s7318_s28  ;;  %v3214_v17 = vpop.permute.xlu1 %3213 }
0x139b   :  { %v2978_v42 = vpop.xlane.xlu0 %2977 }
0x139c   :  { %7154 = vrcp.f32 %v2978_v42 }
0x139f   :  { %v2975_v43 = vpop.xlane.xlu0 %2974 }
0x13a0   :  { %7156 = vrcp.f32 %v2975_v43 }
0x13a3   :  { %v3136_v51 = vpop.permute.xlu0 %3135 }
0x13a6   :  { %v7155_v45 = vpop.eup %7154 }
0x13a7   :  { %v2982_v61 = vmul.f32 %v7155_v45, %v7151_v11 }
0x13a9   :  { %6555 = vmatmul.mubr.msk.f32.vlgmr.msra.gmra.mrb[40].mxu0 %vm590_vm3, %v2982_v61 }
0x13aa   :  { %v7157_v49 = vpop.eup %7156  ;;  %6563 = vmatpush3.xpose.msk.msra.mxu0 %vm81_vm0, %v3216_v47  ;;  %6564 = vmatprep.mubr.msk.f32.mxu0 %vm7315_vm2, %v7314_v46 }
0x13ab   :  { %v2981_v50 = vmul.f32 %v7157_v49, %v7153_v16  ;;  %6572 = vmatprep.subr.mxu0 %v7314_v46 }
0x13ad   :  { %6550 = vmatmul.mubr.msk.f32.vlgmr.msra.gmra.mrb[28].mxu1 %vm590_vm3, %v2981_v50  ;;  %6565 = vmatmul.mubr.msk.f32.vlgmr.msra.gmra.mrb[42].mxu0 %vm81_vm0, %v3214_v17  ;;  %v5958_v50 = vld [vmem:[#allocation7 + $0x8] ss:$0 sm:$0xff] }
0x13ae   :  { %6558 = vmatpush3.xpose.msk.msra.mxu1 %vm81_vm0, %v3138_v44  ;;  %6559 = vmatprep.mubr.msk.f32.mxu1 %vm7315_vm2, %v7314_v46 }
0x13af   :  { %6567 = vmatprep.subr.mxu1 %v7314_v46  ;;  %6574 = vmatprep.mubr.msk.f32.mxu0 %vm7315_vm2, %v7314_v46 }
0x13b1   :  { %6560 = vmatmul.mubr.msk.f32.vlgmr.msra.gmra.mrb[30].mxu1 %vm81_vm0, %v3136_v51 }
0x13b2   :  { %6569 = vmatprep.mubr.msk.f32.mxu1 %vm7315_vm2, %v7314_v46 }
0x147c   :  { %v3131_v52 = vpop.f32.mrb[40].mxu0 }
0x147d   :  { %v6556_v53 = vpop.f32.mrb[41].mxu0 }
0x1480   :  { %v3055_v56 = vpop.f32.mrb[28].mxu1  ;;  %v3287_v59 = vpop.f32.mrb[42].mxu0 }
0x1481   :  { %v6551_v0 = vpop.f32.mrb[29].mxu1  ;;  %v6566_v1 = vpop.f32.mrb[43].mxu0  ;;  %v3294_v2 = vsel %vm590_vm3, %v3287_v59, -inf }
0x1482   :  { %3295 = vmax.xlane.f32.xlu1 %v3294_v2 }
0x1484   :  { %v3209_v3 = vpop.f32.mrb[30].mxu1 }
0x1485   :  { %v6561_v63 = vpop.f32.mrb[31].mxu1  ;;  %v3291_v4 = vsel %vm590_vm3, %v3209_v3, -inf }
0x1486   :  { %3292 = vmax.xlane.f32.xlu0 %v3291_v4 }
0x1493   :  { %3389 = vrot.lane.b32.xlu1 %v7641_v57, %s7318_s28 }
0x1497   :  { %3467 = vrot.lane.b32.xlu1 %v7717_v25, %s7319_s12  ;;  %v3496_v25 = vld [vmem:[#allocation6 + $0x280] sm:$0xff] }
0x149b   :  { %3469 = vrot.lane.b32.xlu1 %v7715_v23, %s7319_s12 }
0x149f   :  { %3477 = vrot.lane.b32.xlu1 %v3131_v52, %s7320_s1 }
0x150f   :  { %v3296_v5 = vpop.xlane.xlu1 %3295 }
0x1510   :  { %v3298_v6 = vsub.f32 %v3287_v59, %v3296_v5 }
0x1512   :  { %v3301_v7 = vmul.f32 1.442695, %v3298_v6 }
0x1513   :  { %v3390_v8 = vpop.permute.xlu1 %3389  ;;  %v3293_v9 = vpop.xlane.xlu0 %3292 }
0x1514   :  { %7158 = vpow2.f32 %v3301_v7  ;;  %v3297_v10 = vsub.f32 %v3209_v3, %v3293_v9  ;;  %6573 = vmatpush3.msra.mxu0 %v3390_v8  ;;  %v3635_v8 = vld [vmem:[#allocation6 + $0x308] sm:$0xff] }
0x1516   :  { %v3299_v12 = vmul.f32 1.442695, %v3297_v10  ;;  %v3636_v10 = vld [vmem:[#allocation6 + $0x310] sm:$0xff] }
0x1517   :  { %v3468_v26 = vpop.permute.xlu1 %3467 }
0x1518   :  { %7160 = vpow2.f32 %v3299_v12  ;;  %v3489_v41 = vsel %vm81_vm0, %v7679_v48, %v3468_v26  ;;  %v3637_v12 = vld [vmem:[#allocation6 + $0x318] sm:$0xff] }
0x151b   :  { %v3470_v11 = vpop.permute.xlu1 %3469 }
0x151c   :  { %v3490_v43 = vsel %vm81_vm0, %v7677_v28, %v3470_v11 }
0x151e   :  { %v7159_v13 = vpop.eup %7158 }
0x151f   :  { %v3306_v57 = vsel %vm590_vm3, %v7159_v13, 0.0  ;;  %v3478_v40 = vpop.permute.xlu1 %3477 }
0x1520   :  { %3307 = vadd.xlane.f32.xlu0 %v3306_v57  ;;  %v3492_v47 = vsel %vm1777_vm5, %v3490_v43, %v3478_v40  ;;  %v3638_v57 = vld [vmem:[#allocation6 + $0x320] sm:$0xff]  ;;  %v3738_v43 = vld [vmem:[#allocation6 + $0x378] sm:$0xff] }
0x1522   :  { %v7161_v14 = vpop.eup %7160 }
0x1523   :  { %v3303_v18 = vsel %vm590_vm3, %v7161_v14, 0.0 }
0x1524   :  { %3304 = vadd.xlane.f32.xlu0 %v3303_v18 }
0x153a   :  { %3313 = vrot.lane.b32.xlu0 %v7643_v19, %s7318_s28  ;;  %v6944_v19 = vpack.c.bf16 %v3497_v27, %v3496_v25  ;;  %v3734_v25 = vld [vmem:[#allocation6 + $0x358] sm:$0xff] }
0x153e   :  { %3475 = vrot.lane.b32.xlu0 %v3055_v56, %s7320_s1 }
0x15ad   :  { %v3308_v54 = vpop.xlane.xlu0 %3307 }
0x15ae   :  { %7162 = vrcp.f32 %v3308_v54  ;;  %v3640_v54 = vld [vmem:[#allocation6 + $0x330] sm:$0xff] }
0x15b1   :  { %v3305_v58 = vpop.xlane.xlu0 %3304 }
0x15b2   :  { %7164 = vrcp.f32 %v3305_v58  ;;  %v3641_v58 = vld [vmem:[#allocation6 + $0x338] sm:$0xff] }
0x15b5   :  { %v3314_v20 = vpop.permute.xlu0 %3313 }
0x15b6   :  { %6568 = vmatpush3.msra.mxu1 %v3314_v20  ;;  %v6972_v20 = vpack.c.bf16 %v3641_v58, %v3640_v54  ;;  %v3870_v54 = vld [vmem:[#allocation6 + $0x190] sm:$0xff]  ;;  %v3871_v58 = vld [vmem:[#allocation6 + $0x198] sm:$0xff] }
0x15b7   :  { %6945 = vmatprep.subr.bf16.mxu1 %v6944_v19 }
0x15b8   :  { %v7163_v21 = vpop.eup %7162 }
0x15b9   :  { %v3312_v22 = vmul.f32 %v7163_v21, %v7159_v13  ;;  %v3476_v16 = vpop.permute.xlu0 %3475  ;;  %v6964_v13 = vpack.c.bf16 %v3637_v12, %v3636_v10  ;;  %v3731_v21 = vld [vmem:[#allocation6 + $0x340] sm:$0xff]  ;;  %v3869_v12 = vld [vmem:[#allocation6 + $0x188] sm:$0xff] }
0x15ba   :  { %v3491_v44 = vsel %vm1777_vm5, %v3489_v41, %v3476_v16  ;;  %v3868_v10 = vld [vmem:[#allocation6 + $0x180] sm:$0xff] }
0x15bb   :  { %6575 = vmatmul.mubr.msk.f32.vlgmr.msra.gmra.mrb[44].mxu0 %vm590_vm3, %v3312_v22  ;;  %v3732_v22 = vld [vmem:[#allocation6 + $0x348] sm:$0xff] }
0x15bc   :  { %v7165_v23 = vpop.eup %7164 }
0x15bd   :  { %v3311_v24 = vmul.f32 %v7165_v23, %v7161_v14  ;;  %v3639_v14 = vld [vmem:[#allocation6 + $0x328] sm:$0xff]  ;;  %v3733_v23 = vld [vmem:[#allocation6 + $0x350] sm:$0xff] }
0x15be   :  { %v6968_v18 = vpack.c.bf16 %v3639_v14, %v3638_v57  ;;  %v6980_v27 = vpack.c.bf16 %v3734_v25, %v3733_v23  ;;  %v3963_v57 = vld [vmem:[#allocation6 + $0x1c0] sm:$0xff]  ;;  %v3964_v14 = vld [vmem:[#allocation6 + $0x1c8] sm:$0xff] }
0x15bf   :  { %6570 = vmatmul.mubr.msk.f32.vlgmr.msra.gmra.mrb[32].mxu1 %vm590_vm3, %v3311_v24  ;;  %v6976_v24 = vpack.c.bf16 %v3732_v22, %v3731_v21  ;;  %v3965_v21 = vld [vmem:[#allocation6 + $0x1d0] sm:$0xff]  ;;  %v3966_v22 = vld [vmem:[#allocation6 + $0x1d8] sm:$0xff]  ;;  %v3873_v25 = vld [vmem:[#allocation6 + $0x1a8] sm:$0xff] }
0x15c0   :  { %6947 = vmatpush3.bf16.msra.mxu1 %v6944_v19  ;;  %v3736_v19 = vld [vmem:[#allocation6 + $0x368] sm:$0xff]  ;;  %v7012_v23 = vpack.c.bf16 %v3966_v22, %v3965_v21 }
0x15c1   :  { %6949 = vmatprep.subr.bf16.mxu1 %v6948_v30  ;;  %v6984_v55 = vpack.c.bf16 %v3736_v19, %v3735_v29  ;;  %v3967_v29 = vld [vmem:[#allocation6 + $0x1e0] sm:$0xff]  ;;  %v3968_v19 = vld [vmem:[#allocation6 + $0x1e8] sm:$0xff] }
0x15c4   :  { %6951 = vmatpush3.bf16.msra.mxu1 %v6948_v30 }
0x15c5   :  { %6953 = vmatprep.subr.bf16.mxu1 %v6952_v33 }
0x15c8   :  { %6955 = vmatpush3.bf16.msra.mxu1 %v6952_v33 }
0x15c9   :  { %6957 = vmatprep.subr.bf16.mxu1 %v6956_v36 }
0x15cc   :  { %6959 = vmatpush3.bf16.msra.mxu1 %v6956_v36 }
0x15cd   :  { %6977 = vmatprep.subr.bf16.mxu1 %v6976_v24 }
0x168e   :  { %v3461_v37 = vpop.f32.mrb[44].mxu0 }
0x168f   :  { %3485 = vrot.lane.b32.xlu1 %v3461_v37, %s7321_s13  ;;  %v6576_v38 = vpop.f32.mrb[45].mxu0  ;;  %v5961_v37 = vld [vmem:[#allocation7 + $0xf] ss:$0 sm:$0xff] }
0x1692   :  { %v3385_v39 = vpop.f32.mrb[32].mxu1 }
0x1693   :  { %3483 = vrot.lane.b32.xlu0 %v3385_v39, %s7321_s13  ;;  %v6571_v15 = vpop.f32.mrb[33].mxu1  ;;  %v5962_v39 = vld [vmem:[#allocation7 + $0x10] ss:$0 sm:$0xff] }
0x1701   :  { %v3486_v42 = vpop.permute.xlu1 %3485 }
0x1702   :  { %v3494_v49 = vsel %vm1780_vm4, %v3492_v47, %v3486_v42  ;;  %v3737_v42 = vld [vmem:[#allocation6 + $0x370] sm:$0xff] }
0x1705   :  { %v3484_v45 = vpop.permute.xlu0 %3483 }
0x1706   :  { %v3493_v61 = vsel %vm1780_vm4, %v3491_v44, %v3484_v45  ;;  %v6988_v44 = vpack.c.bf16 %v3738_v43, %v3737_v42  ;;  %v5963_v45 = vld [vmem:[#allocation7 + $0xd] ss:$0 sm:$0xff]  ;;  %v5969_v42 = vld [vmem:[#allocation7 + $0x11] ss:$0 sm:$0xff] }
0x1707   :  { %6593 = vmatprep.mubr.msk.f32.mxu1 %vm176_vm1, %v3493_v61 }
0x1708   :  { %6594 = vmatmul.mubr.msk.f32.vlgmr.msra.gmra.mrb[34].mxu1 %vm176_vm1, %v3494_v49 }
0x1709   :  { %6979 = vmatpush3.bf16.msra.mxu1 %v6976_v24  ;;  %v3872_v24 = vld [vmem:[#allocation6 + $0x1a0] sm:$0xff] }
0x170a   :  { %6981 = vmatprep.subr.bf16.mxu1 %v6980_v27 }
0x170d   :  { %6983 = vmatpush3.bf16.msra.mxu1 %v6980_v27  ;;  %v7000_v27 = vpack.c.bf16 %v3873_v25, %v3872_v24 }
0x170e   :  { %6985 = vmatprep.subr.bf16.mxu1 %v6984_v55 }
0x1711   :  { %6987 = vmatpush3.bf16.msra.mxu1 %v6984_v55  ;;  %v7016_v55 = vpack.c.bf16 %v3968_v19, %v3967_v29 }
0x1712   :  { %6989 = vmatprep.subr.bf16.mxu1 %v6988_v44 }
0x1715   :  { %6991 = vmatpush3.bf16.msra.mxu1 %v6988_v44 }
0x17db   :  { %v6595_v17 = vpop.f32.mrb[34].mxu1 }
0x17dc   :  { %v3587_v48 = vadd.f32 %v6595_v17, %v5958_v50  ;;  %v3581_v51 = vpop.f32.mrb[35].mxu1 }
0x17dd   :  { %v3582_v52 = vadd.f32 %v5958_v50, %v3581_v51  ;;  %v5966_v51 = vld [vmem:[#allocation7 + $0xe] ss:$0 sm:$0xff] }
0x17de   :  { %v3591_v28 = vadd.f32 %v3587_v48, %v7600_v62 }
0x17df   :  { %v3590_v53 = vadd.f32 %v3582_v52, %v7598_v60  ;;  %v3634_v60 = vld [vmem:[#allocation6 + $0x300] sm:$0xff] }
0x17e0   :  { %v3597_v56 = vsel %vm176_vm1, %v3591_v28, 0.0  ;;  %v6960_v9 = vpack.c.bf16 %v3635_v8, %v3634_v60 }
0x17e1   :  { %3598 = vadd.xlane.f32.xlu1 %v3597_v56  ;;  %v3594_v59 = vsel %vm176_vm1, %v3590_v53, 0.0 }
0x17e2   :  { %3595 = vadd.xlane.f32.xlu0 %v3594_v59  ;;  %6961 = vmatprep.subr.bf16.mxu0 %v6960_v9 }
0x17e3   :  { %6963 = vmatpush3.bf16.msra.mxu0 %v6960_v9 }
0x17e4   :  { %6965 = vmatprep.subr.bf16.mxu0 %v6964_v13 }
0x17e7   :  { %6967 = vmatpush3.bf16.msra.mxu0 %v6964_v13  ;;  %v6992_v13 = vpack.c.bf16 %v3869_v12, %v3868_v10  ;;  %v5977_v12 = vld [vmem:[#allocation7 + $0xb] ss:$0 sm:$0xff] }
0x17e8   :  { %6969 = vmatprep.subr.bf16.mxu0 %v6968_v18 }
0x17eb   :  { %6971 = vmatpush3.bf16.msra.mxu0 %v6968_v18  ;;  %v7008_v18 = vpack.c.bf16 %v3964_v14, %v3963_v57 }
0x17ec   :  { %6973 = vmatprep.subr.bf16.mxu0 %v6972_v20 }
0x17ed   :  { %7009 = vmatprep.subr.bf16.mxu1 %v7008_v18 }
0x17ef   :  { %6975 = vmatpush3.bf16.msra.mxu0 %v6972_v20  ;;  %v6996_v20 = vpack.c.bf16 %v3871_v58, %v3870_v54 }
0x17f0   :  { %6993 = vmatprep.subr.bf16.mxu0 %v6992_v13 }
0x186e   :  { %v3599_v0 = vpop.xlane.xlu1 %3598 }
0x186f   :  { %v3602_v1 = vmul.f32 0.015625, %v3599_v0  ;;  %v3596_v2 = vpop.xlane.xlu0 %3595 }
0x1870   :  { %v3601_v3 = vmul.f32 0.015625, %v3596_v2 }
0x1871   :  { %v3604_v63 = vsub.f32 %v3591_v28, %v3602_v1 }
0x1872   :  { %v3603_v4 = vsub.f32 %v3590_v53, %v3601_v3 }
0x1873   :  { %v3606_v7 = vmul.f32 %v3604_v63, %v3604_v63 }
0x1874   :  { %v3605_v5 = vmul.f32 %v3603_v4, %v3603_v4 }
0x1875   :  { %v3610_v62 = vsel %vm176_vm1, %v3606_v7, 0.0 }
0x1876   :  { %v3607_v6 = vsel %vm176_vm1, %v3605_v5, 0.0 }
0x1877   :  { %3608 = vadd.xlane.f32.xlu0 %v3607_v6 }
0x187b   :  { %3611 = vadd.xlane.f32.xlu0 %v3610_v62 }
0x1904   :  { %v3609_v30 = vpop.xlane.xlu0 %3608 }
0x1905   :  { %v3613_v31 = vmul.f32 0.015625, %v3609_v30  ;;  %v3874_v30 = vld [vmem:[#allocation6 + $0x1b0] sm:$0xff] }
0x1907   :  { %v3615_v32 = vadd.f32 1e-05, %v3613_v31  ;;  %v3875_v31 = vld [vmem:[#allocation6 + $0x1b8] sm:$0xff] }
0x1908   :  { %v3612_v33 = vpop.xlane.xlu0 %3611 }
0x1909   :  { %7166 = vrsqrt.f32 %v3615_v32  ;;  %v3614_v34 = vmul.f32 0.015625, %v3612_v33  ;;  %v3969_v32 = vld [vmem:[#allocation6 + $0x1f0] sm:$0xff]  ;;  %v7004_v33 = vpack.c.bf16 %v3875_v31, %v3874_v30 }
0x190b   :  { %v3616_v35 = vadd.f32 1e-05, %v3614_v34  ;;  %v3970_v34 = vld [vmem:[#allocation6 + $0x1f8] sm:$0xff] }
0x190d   :  { %7168 = vrsqrt.f32 %v3616_v35  ;;  %v7020_v35 = vpack.c.bf16 %v3970_v34, %v3969_v32 }
0x1913   :  { %v7167_v36 = vpop.eup %7166 }
0x1914   :  { %v3619_v38 = vmul.f32 %v7167_v36, %v3603_v4  ;;  %v4052_v36 = vld [vmem:[#allocation6 + $0x200] sm:$0xff] }
0x1916   :  { %v3625_v15 = vmul.f32 %v5961_v37, %v3619_v38 }
0x1917   :  { %v7169_v26 = vpop.eup %7168 }
0x1918   :  { %v3620_v11 = vmul.f32 %v7169_v26, %v3604_v63  ;;  %v3631_v40 = vadd.f32 %v5962_v39, %v3625_v15 }
0x191a   :  { %v3626_v16 = vmul.f32 %v5961_v37, %v3620_v11  ;;  %6612 = vmatprep.mubr.msk.f32.mxu0 %vm176_vm1, %v3631_v40  ;;  %v4053_v37 = vld [vmem:[#allocation6 + $0x208] sm:$0xff] }
0x191b   :  { %v7024_v38 = vpack.c.bf16 %v4053_v37, %v4052_v36 }
0x191c   :  { %v3632_v41 = vadd.f32 %v5962_v39, %v3626_v16 }
0x191e   :  { %6613 = vmatmul.mubr.msk.f32.vlgmr.msra.gmra.mrb[46].mxu0 %vm176_vm1, %v3632_v41 }
0x191f   :  { %6995 = vmatpush3.bf16.msra.mxu0 %v6992_v13 }
0x1920   :  { %6997 = vmatprep.subr.bf16.mxu0 %v6996_v20 }
0x1923   :  { %6999 = vmatpush3.bf16.msra.mxu0 %v6996_v20 }
0x1924   :  { %7001 = vmatprep.subr.bf16.mxu0 %v7000_v27 }
0x1927   :  { %7003 = vmatpush3.bf16.msra.mxu0 %v7000_v27 }
0x1928   :  { %7005 = vmatprep.subr.bf16.mxu0 %v7004_v33 }
0x192b   :  { %7007 = vmatpush3.bf16.msra.mxu0 %v7004_v33 }
0x192c   :  { %7025 = vmatprep.subr.bf16.mxu0 %v7024_v38 }
0x19f1   :  { %v6614_v47 = vpop.f32.mrb[46].mxu0 }
0x19f2   :  { %v3725_v61 = vadd.f32 %v6614_v47, %v5963_v45  ;;  %v3719_v49 = vpop.f32.mrb[47].mxu0  ;;  %v5970_v47 = vld [vmem:[#allocation7 + $0x12] ss:$0 sm:$0xff] }
0x19f3   :  { %v3720_v50 = vadd.f32 %v5963_v45, %v3719_v49 }
0x19f4   :  { %v3729_v48 = vmax.f32 %v3725_v61, 0.0 }
0x19f5   :  { %v3728_v17 = vmax.f32 %v3720_v50, 0.0  ;;  %v4054_v50 = vld [vmem:[#allocation6 + $0x210] sm:$0xff] }
0x19f7   :  { %6631 = vmatprep.mubr.msk.f32.mxu1 %vm176_vm1, %v3728_v17  ;;  %v4055_v17 = vld [vmem:[#allocation6 + $0x218] sm:$0xff] }
0x19f8   :  { %6632 = vmatmul.mubr.msk.f32.vlgmr.msra.gmra.mrb[36].mxu1 %vm176_vm1, %v3729_v48 }
0x19f9   :  { %7011 = vmatpush3.bf16.msra.mxu1 %v7008_v18 }
0x19fa   :  { %7013 = vmatprep.subr.bf16.mxu1 %v7012_v23 }
0x19fd   :  { %7015 = vmatpush3.bf16.msra.mxu1 %v7012_v23 }
0x19fe   :  { %7017 = vmatprep.subr.bf16.mxu1 %v7016_v55 }
0x1a01   :  { %7019 = vmatpush3.bf16.msra.mxu1 %v7016_v55 }
0x1a02   :  { %7021 = vmatprep.subr.bf16.mxu1 %v7020_v35 }
0x1a05   :  { %7023 = vmatpush3.bf16.msra.mxu1 %v7020_v35 }
0x1a06   :  { %6691 = vmatprep.subr.mxu1 %v7314_v46 }
0x1acb   :  { %v6633_v52 = vpop.f32.mrb[36].mxu1 }
0x1acc   :  { %v3822_v28 = vadd.f32 %v6633_v52, %v5966_v51  ;;  %v3816_v53 = vpop.f32.mrb[37].mxu1  ;;  %v7028_v52 = vpack.c.bf16 %v4055_v17, %v4054_v50 }
0x1acd   :  { %v3817_v56 = vadd.f32 %v5966_v51, %v3816_v53  ;;  %v4057_v53 = vld [vmem:[#allocation6 + $0x228] sm:$0xff] }
0x1ace   :  { %v3826_v59 = vadd.f32 %v3822_v28, %v3632_v41  ;;  %v4056_v28 = vld [vmem:[#allocation6 + $0x220] sm:$0xff] }
0x1acf   :  { %v3825_v0 = vadd.f32 %v3817_v56, %v3631_v40  ;;  %v7032_v56 = vpack.c.bf16 %v4057_v53, %v4056_v28 }
0x1ad0   :  { %v3832_v1 = vsel %vm176_vm1, %v3826_v59, 0.0 }
0x1ad1   :  { %3833 = vadd.xlane.f32.xlu1 %v3832_v1  ;;  %v3829_v2 = vsel %vm176_vm1, %v3825_v0, 0.0 }
0x1ad2   :  { %3830 = vadd.xlane.f32.xlu0 %v3829_v2  ;;  %v5971_v2 = vld [vmem:[#allocation7 + $0x9] ss:$0 sm:$0xff] }
0x1b5e   :  { %v3834_v3 = vpop.xlane.xlu1 %3833 }
0x1b5f   :  { %v3836_v63 = vmul.f32 0.015625, %v3834_v3  ;;  %v3831_v4 = vpop.xlane.xlu0 %3830  ;;  %v5974_v3 = vld [vmem:[#allocation7 + $0xa] ss:$0 sm:$0xff] }
0x1b60   :  { %v3835_v5 = vmul.f32 0.015625, %v3831_v4 }
0x1b61   :  { %v7793_v6 = vsub.f32 %v3826_v59, %v3836_v63  ;;  %v4058_v59 = vld [vmem:[#allocation6 + $0x230] sm:$0xff] }
0x1b62   :  { %v7795_v7 = vsub.f32 %v3825_v0, %v3835_v5  ;;  %v4059_v0 = vld [vmem:[#allocation6 + $0x238] sm:$0xff] }
0x1b63   :  { %v3840_v62 = vmul.f32 %v7793_v6, %v7793_v6  ;;  %v7036_v1 = vpack.c.bf16 %v4059_v0, %v4058_v59 }
0x1b64   :  { %v3839_v60 = vmul.f32 %v7795_v7, %v7795_v7 }
0x1b65   :  { %v3844_v8 = vsel %vm176_vm1, %v3840_v62, 0.0 }
0x1b66   :  { %3845 = vadd.xlane.f32.xlu1 %v3844_v8  ;;  %v3841_v9 = vsel %vm176_vm1, %v3839_v60, 0.0 }
0x1b67   :  { %3842 = vadd.xlane.f32.xlu0 %v3841_v9 }
0x1bf3   :  { %v3846_v39 = vpop.xlane.xlu1 %3845 }
0x1bf4   :  { %v3848_v15 = vmul.f32 0.015625, %v3846_v39  ;;  %v3843_v26 = vpop.xlane.xlu0 %3842 }
0x1bf5   :  { %v3847_v11 = vmul.f32 0.015625, %v3843_v26 }
0x1bf6   :  { %v3850_v40 = vadd.f32 1e-05, %v3848_v15 }
0x1bf7   :  { %v3849_v16 = vadd.f32 1e-05, %v3847_v11 }
0x1bf8   :  { %7170 = vrsqrt.f32 %v3850_v40 }
0x1bf9   :  { %7172 = vrsqrt.f32 %v3849_v16 }
0x1c02   :  { %v7171_v41 = vpop.eup %7170 }
0x1c03   :  { %v7173_v43 = vpop.eup %7172  ;;  %v3854_v44 = vmul.f32 %v7171_v41, %v7793_v6 }
0x1c04   :  { %v3853_v45 = vmul.f32 %v7173_v43, %v7795_v7 }
0x1c05   :  { %v3860_v61 = vmul.f32 %v5969_v42, %v3854_v44 }
0x1c06   :  { %v3859_v49 = vmul.f32 %v5969_v42, %v3853_v45 }
0x1c07   :  { %v7808_v51 = vadd.f32 %v5970_v47, %v3860_v61 }
0x1c08   :  { %v7806_v48 = vadd.f32 %v5970_v47, %v3859_v49 }
0x1c0a   :  { %6650 = vmatprep.mubr.msk.f32.mxu0 %vm176_vm1, %v7806_v48  ;;  %6669 = vmatprep.mubr.msk.f32.mxu1 %vm176_vm1, %v7806_v48 }
0x1c0b   :  { %6651 = vmatmul.mubr.msk.f32.vlgmr.msra.gmra.mrb[48].mxu0 %vm176_vm1, %v7808_v51  ;;  %6670 = vmatmul.mubr.msk.f32.vlgmr.msra.gmra.mrb[38].mxu1 %vm176_vm1, %v7808_v51 }
0x1c0c   :  { %7027 = vmatpush3.bf16.msra.mxu0 %v7024_v38  ;;  %6688 = vmatprep.mubr.msk.f32.mxu0 %vm176_vm1, %v7806_v48 }
0x1c0d   :  { %7029 = vmatprep.subr.bf16.mxu0 %v7028_v52  ;;  %6693 = vmatprep.mubr.msk.f32.mxu1 %vm7315_vm2, %v7314_v46 }
0x1c10   :  { %7031 = vmatpush3.bf16.msra.mxu0 %v7028_v52 }
0x1c11   :  { %7033 = vmatprep.subr.bf16.mxu0 %v7032_v56 }
0x1c14   :  { %7035 = vmatpush3.bf16.msra.mxu0 %v7032_v56 }
0x1c15   :  { %7037 = vmatprep.subr.bf16.mxu0 %v7036_v1 }
0x1c18   :  { %7039 = vmatpush3.bf16.msra.mxu0 %v7036_v1 }
0x1c19   :  { %6696 = vmatprep.subr.mxu0 %v7314_v46 }
0x1c1b   :  { %6689 = vmatmul.mubr.msk.f32.vlgmr.msra.gmra.mrb[50].mxu0 %vm176_vm1, %v7808_v51 }
0x1c1c   :  { %6698 = vmatprep.mubr.msk.f32.mxu0 %vm7315_vm2, %v7314_v46 }
0x1cde   :  { %v6652_v63 = vpop.f32.mrb[48].mxu0  ;;  %v6671_v4 = vpop.f32.mrb[38].mxu1 }
0x1cdf   :  { %v3959_v5 = vadd.f32 %v6652_v63, %v5971_v2  ;;  %v7827_v6 = vadd.f32 %v6671_v4, %v5974_v3  ;;  %v3953_v7 = vpop.f32.mrb[49].mxu0  ;;  %v4042_v62 = vpop.f32.mrb[39].mxu1 }
0x1ce0   :  { %v3954_v60 = vadd.f32 %v5971_v2, %v3953_v7  ;;  %v7829_v8 = vadd.f32 %v5974_v3, %v4042_v62 }
0x1ce1   :  { %v7831_v9 = vmul.f32 0.25, %v3959_v5  ;;  %6697 = vmatpush3.xpose.msk.msra.mxu0 %vm81_vm0, %v7827_v6 }
0x1ce2   :  { %v7835_v10 = vmul.f32 0.25, %v3954_v60  ;;  %6692 = vmatpush3.xpose.msk.msra.mxu1 %vm81_vm0, %v7829_v8  ;;  %6706 = vmatprep.subr.mxu0 %v7314_v46 }
0x1ce3   :  { %6701 = vmatprep.subr.mxu1 %v7314_v46 }
0x1ce4   :  { %6699 = vmatmul.mubr.msk.f32.vlgmr.msra.gmra.mrb[52].mxu0 %vm81_vm0, %v7831_v9 }
0x1ce5   :  { %6694 = vmatmul.mubr.msk.f32.vlgmr.msra.gmra.mrb[40].mxu1 %vm81_vm0, %v7835_v10  ;;  %6708 = vmatprep.mubr.msk.f32.mxu0 %vm7315_vm2, %v7314_v46 }
0x1ce6   :  { %6703 = vmatprep.mubr.msk.f32.mxu1 %vm7315_vm2, %v7314_v46 }
0x1cee   :  { %v6690_v13 = vpop.f32.mrb[50].mxu0 }
0x1cef   :  { %v7849_v57 = vadd.f32 %v6690_v13, %v5977_v12  ;;  %v4131_v14 = vpop.f32.mrb[51].mxu0 }
0x1cf0   :  { %v7851_v18 = vadd.f32 %v5977_v12, %v4131_v14 }
0x1cf1   :  { %6707 = vmatpush3.msra.mxu0 %v7849_v57 }
0x1cf2   :  { %6702 = vmatpush3.msra.mxu1 %v7851_v18  ;;  %6716 = vmatprep.subr.mxu0 %v7314_v46 }
0x1cf3   :  { %6711 = vmatprep.subr.mxu1 %v7314_v46 }
0x1db7   :  { %v4290_v54 = vpop.f32.mrb[52].mxu0 }
0x1db8   :  { %v4214_v58 = vpop.f32.mrb[40].mxu1  ;;  %v6700_v20 = vpop.f32.mrb[53].mxu0  ;;  %v4297_v21 = vsel %vm590_vm3, %v4290_v54, -inf }
0x1db9   :  { %4298 = vmax.xlane.f32.xlu1 %v4297_v21  ;;  %v6695_v22 = vpop.f32.mrb[41].mxu1  ;;  %v4294_v23 = vsel %vm590_vm3, %v4214_v58, -inf }
0x1dba   :  { %4295 = vmax.xlane.f32.xlu0 %v4294_v23 }
0x1e46   :  { %v4299_v24 = vpop.xlane.xlu1 %4298 }
0x1e47   :  { %v4301_v25 = vsub.f32 %v4290_v54, %v4299_v24  ;;  %v4296_v27 = vpop.xlane.xlu0 %4295 }
0x1e48   :  { %v4300_v29 = vsub.f32 %v4214_v58, %v4296_v27 }
0x1e49   :  { %v4304_v19 = vmul.f32 1.442695, %v4301_v25 }
0x1e4a   :  { %v4302_v55 = vmul.f32 1.442695, %v4300_v29 }
0x1e4b   :  { %7174 = vpow2.f32 %v4304_v19 }
0x1e4c   :  { %7176 = vpow2.f32 %v4302_v55 }
0x1e55   :  { %v7175_v30 = vpop.eup %7174 }
0x1e56   :  { %v7177_v31 = vpop.eup %7176  ;;  %v4309_v32 = vsel %vm590_vm3, %v7175_v30, 0.0 }
0x1e57   :  { %4310 = vadd.xlane.f32.xlu1 %v4309_v32  ;;  %v4306_v33 = vsel %vm590_vm3, %v7177_v31, 0.0 }
0x1e58   :  { %4307 = vadd.xlane.f32.xlu0 %v4306_v33 }
0x1e68   :  { %4542 = vrot.lane.b32.xlu1 %v7827_v6, %s7316_s3 }
0x1e6c   :  { %4462 = vrot.lane.b32.xlu1 %v7835_v10, %s7316_s3 }
0x1e6e   :  { %4464 = vrot.lane.b32.xlu0 %v7829_v8, %s7316_s3 }
0x1e70   :  { %4540 = vrot.lane.b32.xlu1 %v7831_v9, %s7316_s3 }
0x1ee4   :  { %v4311_v34 = vpop.xlane.xlu1 %4310 }
0x1ee5   :  { %7178 = vrcp.f32 %v4311_v34  ;;  %v4308_v35 = vpop.xlane.xlu0 %4307 }
0x1ee6   :  { %7180 = vrcp.f32 %v4308_v35 }
0x1ee8   :  { %v4543_v36 = vpop.permute.xlu1 %4542 }
0x1ee9   :  { %v4465_v11 = vpop.permute.xlu0 %4464 }
0x1eec   :  { %v4463_v38 = vpop.permute.xlu1 %4462 }
0x1eef   :  { %v7179_v37 = vpop.eup %7178 }
0x1ef0   :  { %v7181_v39 = vpop.eup %7180  ;;  %v4315_v15 = vmul.f32 %v7179_v37, %v7175_v30  ;;  %v4541_v40 = vpop.permute.xlu1 %4540 }
0x1ef1   :  { %v4314_v26 = vmul.f32 %v7181_v39, %v7177_v31 }
0x1ef2   :  { %6709 = vmatmul.mubr.msk.f32.vlgmr.msra.gmra.mrb[54].mxu0 %vm590_vm3, %v4315_v15 }
0x1ef3   :  { %6717 = vmatpush3.xpose.msk.msra.mxu0 %vm81_vm0, %v4543_v36  ;;  %6704 = vmatmul.mubr.msk.f32.vlgmr.msra.gmra.mrb[42].mxu1 %vm590_vm3, %v4314_v26 }
0x1ef4   :  { %6712 = vmatpush3.xpose.msk.msra.mxu1 %vm81_vm0, %v4465_v11  ;;  %6718 = vmatprep.mubr.msk.f32.mxu0 %vm7315_vm2, %v7314_v46 }
0x1ef5   :  { %6713 = vmatprep.mubr.msk.f32.mxu1 %vm7315_vm2, %v7314_v46  ;;  %6726 = vmatprep.subr.mxu0 %v7314_v46 }
0x1ef6   :  { %6719 = vmatmul.mubr.msk.f32.vlgmr.msra.gmra.mrb[56].mxu0 %vm81_vm0, %v4541_v40  ;;  %6721 = vmatprep.subr.mxu1 %v7314_v46 }
0x1ef7   :  { %6714 = vmatmul.mubr.msk.f32.vlgmr.msra.gmra.mrb[44].mxu1 %vm81_vm0, %v4463_v38  ;;  %6728 = vmatprep.mubr.msk.f32.mxu0 %vm7315_vm2, %v7314_v46 }
0x1ef8   :  { %6723 = vmatprep.mubr.msk.f32.mxu1 %vm7315_vm2, %v7314_v46 }
0x1fc5   :  { %v7885_v16 = vpop.f32.mrb[54].mxu0 }
0x1fc6   :  { %v7887_v41 = vpop.f32.mrb[42].mxu1  ;;  %v6710_v42 = vpop.f32.mrb[55].mxu0 }
0x1fc7   :  { %v6705_v43 = vpop.f32.mrb[43].mxu1 }
0x1fc9   :  { %v4614_v44 = vpop.f32.mrb[56].mxu0 }
0x1fca   :  { %v4536_v45 = vpop.f32.mrb[44].mxu1  ;;  %v6720_v47 = vpop.f32.mrb[57].mxu0  ;;  %v4621_v61 = vsel %vm590_vm3, %v4614_v44, -inf }
0x1fcb   :  { %4622 = vmax.xlane.f32.xlu1 %v4621_v61  ;;  %v6715_v49 = vpop.f32.mrb[45].mxu1  ;;  %v4618_v50 = vsel %vm590_vm3, %v4536_v45, -inf }
0x1fcc   :  { %4619 = vmax.xlane.f32.xlu0 %v4618_v50 }
0x1fdc   :  { %4718 = vrot.lane.b32.xlu1 %v7849_v57, %s7316_s3 }
0x1fe0   :  { %4796 = vrot.lane.b32.xlu1 %v7829_v8, %s7317_s27 }
0x1fe2   :  { %4641 = vrot.lane.b32.xlu0 %v7851_v18, %s7316_s3 }
0x1fe4   :  { %4874 = vrot.lane.b32.xlu1 %v7827_v6, %s7317_s27 }
0x1fe8   :  { %4872 = vrot.lane.b32.xlu1 %v7831_v9, %s7317_s27 }
0x2058   :  { %v4623_v17 = vpop.xlane.xlu1 %4622 }
0x2059   :  { %v4625_v52 = vsub.f32 %v4614_v44, %v4623_v17  ;;  %v4620_v28 = vpop.xlane.xlu0 %4619 }
0x205a   :  { %v4624_v53 = vsub.f32 %v4536_v45, %v4620_v28 }
0x205b   :  { %v4628_v56 = vmul.f32 1.442695, %v4625_v52 }
0x205c   :  { %v4626_v59 = vmul.f32 1.442695, %v4624_v53  ;;  %v4719_v0 = vpop.permute.xlu1 %4718 }
0x205d   :  { %7182 = vpow2.f32 %v4628_v56  ;;  %6727 = vmatpush3.msra.mxu0 %v4719_v0  ;;  %v4642_v1 = vpop.permute.xlu0 %4641 }
0x205e   :  { %6722 = vmatpush3.msra.mxu1 %v4642_v1  ;;  %6736 = vmatprep.subr.mxu0 %v7314_v46  ;;  %7184 = vpow2.f32 %v4626_v59 }
0x205f   :  { %6731 = vmatprep.subr.mxu1 %v7314_v46 }
0x2060   :  { %v4797_v62 = vpop.permute.xlu1 %4796 }
0x2064   :  { %v4875_v12 = vpop.permute.xlu1 %4874 }
0x2067   :  { %v7183_v2 = vpop.eup %7182 }
0x2068   :  { %v4633_v3 = vsel %vm590_vm3, %v7183_v2, 0.0  ;;  %v7185_v63 = vpop.eup %7184  ;;  %v4873_v58 = vpop.permute.xlu1 %4872 }
0x2069   :  { %4634 = vadd.xlane.f32.xlu0 %v4633_v3  ;;  %v4630_v4 = vsel %vm590_vm3, %v7185_v63, 0.0 }
0x206d   :  { %4631 = vadd.xlane.f32.xlu0 %v4630_v4 }
0x2083   :  { %4794 = vrot.lane.b32.xlu0 %v7835_v10, %s7317_s27 }
0x20f6   :  { %v4635_v5 = vpop.xlane.xlu0 %4634 }
0x20f7   :  { %7186 = vrcp.f32 %v4635_v5 }
0x20fa   :  { %v4632_v7 = vpop.xlane.xlu0 %4631 }
0x20fb   :  { %7188 = vrcp.f32 %v4632_v7 }
0x20fe   :  { %v4795_v20 = vpop.permute.xlu0 %4794 }
0x2101   :  { %v7187_v60 = vpop.eup %7186 }
0x2102   :  { %v4639_v13 = vmul.f32 %v7187_v60, %v7183_v2 }
0x2104   :  { %6729 = vmatmul.mubr.msk.f32.vlgmr.msra.gmra.mrb[58].mxu0 %vm590_vm3, %v4639_v13 }
0x2105   :  { %v7189_v14 = vpop.eup %7188  ;;  %6737 = vmatpush3.xpose.msk.msra.mxu0 %vm81_vm0, %v4875_v12  ;;  %6738 = vmatprep.mubr.msk.f32.mxu0 %vm7315_vm2, %v7314_v46 }
0x2106   :  { %v4638_v54 = vmul.f32 %v7189_v14, %v7185_v63  ;;  %6746 = vmatprep.subr.mxu0 %v7314_v46 }
0x2108   :  { %6724 = vmatmul.mubr.msk.f32.vlgmr.msra.gmra.mrb[46].mxu1 %vm590_vm3, %v4638_v54  ;;  %6739 = vmatmul.mubr.msk.f32.vlgmr.msra.gmra.mrb[60].mxu0 %vm81_vm0, %v4873_v58 }
0x2109   :  { %6732 = vmatpush3.xpose.msk.msra.mxu1 %vm81_vm0, %v4797_v62  ;;  %6733 = vmatprep.mubr.msk.f32.mxu1 %vm7315_vm2, %v7314_v46 }
0x210a   :  { %6741 = vmatprep.subr.mxu1 %v7314_v46  ;;  %6748 = vmatprep.mubr.msk.f32.mxu0 %vm7315_vm2, %v7314_v46 }
0x210c   :  { %6734 = vmatmul.mubr.msk.f32.vlgmr.msra.gmra.mrb[48].mxu1 %vm81_vm0, %v4795_v20 }
0x210d   :  { %6743 = vmatprep.mubr.msk.f32.mxu1 %vm7315_vm2, %v7314_v46 }
0x21d7   :  { %v7923_v21 = vpop.f32.mrb[58].mxu0 }
0x21d8   :  { %v6730_v22 = vpop.f32.mrb[59].mxu0 }
0x21d9   :  { %v5485_v22 = vld [vmem:[#allocation6 + $0x2c0] sm:$0xff] }
0x21db   :  { %v7925_v23 = vpop.f32.mrb[46].mxu1  ;;  %v4946_v24 = vpop.f32.mrb[60].mxu0 }
0x21dc   :  { %v6725_v25 = vpop.f32.mrb[47].mxu1  ;;  %v6740_v27 = vpop.f32.mrb[61].mxu0  ;;  %v4953_v29 = vsel %vm590_vm3, %v4946_v24, -inf }
0x21dd   :  { %4954 = vmax.xlane.f32.xlu1 %v4953_v29  ;;  %v5488_v25 = vld [vmem:[#allocation6 + $0x2d8] sm:$0xff]  ;;  %v5489_v29 = vld [vmem:[#allocation6 + $0x2e0] sm:$0xff] }
0x21df   :  { %v4868_v19 = vpop.f32.mrb[48].mxu1 }
0x21e0   :  { %v6735_v55 = vpop.f32.mrb[49].mxu1  ;;  %v4950_v30 = vsel %vm590_vm3, %v4868_v19, -inf }
0x21e1   :  { %4951 = vmax.xlane.f32.xlu0 %v4950_v30  ;;  %v5491_v30 = vld [vmem:[#allocation6 + $0x2f0] sm:$0xff] }
0x21ee   :  { %5048 = vrot.lane.b32.xlu1 %v7849_v57, %s7317_s27 }
0x21f2   :  { %5126 = vrot.lane.b32.xlu1 %v7829_v8, %s7318_s28 }
0x21f6   :  { %5204 = vrot.lane.b32.xlu1 %v7827_v6, %s7318_s28 }
0x21f7   :  { %4972 = vrot.lane.b32.xlu0 %v7851_v18, %s7317_s27 }
0x21fa   :  { %5202 = vrot.lane.b32.xlu1 %v7831_v9, %s7318_s28 }
0x226a   :  { %v4955_v31 = vpop.xlane.xlu1 %4954 }
0x226b   :  { %v4957_v32 = vsub.f32 %v4946_v24, %v4955_v31  ;;  %v5487_v24 = vld [vmem:[#allocation6 + $0x2d0] sm:$0xff]  ;;  %v5492_v31 = vld [vmem:[#allocation6 + $0x2f8] sm:$0xff] }
0x226c   :  { %v7044_v27 = vpack.c.bf16 %v5488_v25, %v5487_v24  ;;  %v5724_v24 = vld [vmem:[#allocation6 + $0x3e8] sm:$0xff] }
0x226d   :  { %v4960_v33 = vmul.f32 1.442695, %v4957_v32  ;;  %v7052_v32 = vpack.c.bf16 %v5492_v31, %v5491_v30 }
0x226e   :  { %v5049_v34 = vpop.permute.xlu1 %5048  ;;  %v4952_v35 = vpop.xlane.xlu0 %4951 }
0x226f   :  { %7190 = vpow2.f32 %v4960_v33  ;;  %v4956_v36 = vsub.f32 %v4868_v19, %v4952_v35  ;;  %6747 = vmatpush3.msra.mxu0 %v5049_v34  ;;  %v5490_v19 = vld [vmem:[#allocation6 + $0x2e8] sm:$0xff] }
0x2270   :  { %6756 = vmatprep.subr.mxu0 %v7314_v46  ;;  %v7048_v55 = vpack.c.bf16 %v5490_v19, %v5489_v29 }
0x2271   :  { %v4958_v8 = vmul.f32 1.442695, %v4956_v36 }
0x2272   :  { %v4973_v37 = vpop.permute.xlu0 %4972  ;;  %v5127_v11 = vpop.permute.xlu1 %5126 }
0x2273   :  { %7192 = vpow2.f32 %v4958_v8  ;;  %6742 = vmatpush3.msra.mxu1 %v4973_v37 }
0x2274   :  { %6751 = vmatprep.subr.mxu1 %v7314_v46 }
0x2276   :  { %v5205_v42 = vpop.permute.xlu1 %5204 }
0x2279   :  { %v7191_v6 = vpop.eup %7190 }
0x227a   :  { %v4965_v38 = vsel %vm590_vm3, %v7191_v6, 0.0 }
0x227b   :  { %4966 = vadd.xlane.f32.xlu0 %v4965_v38 }
0x227d   :  { %v7193_v9 = vpop.eup %7192 }
0x227e   :  { %v4962_v39 = vsel %vm590_vm3, %v7193_v9, 0.0 }
0x227f   :  { %4963 = vadd.xlane.f32.xlu0 %v4962_v39 }
0x2295   :  { %5124 = vrot.lane.b32.xlu0 %v7835_v10, %s7318_s28  ;;  %v5203_v10 = vpop.permute.xlu1 %5202 }
0x2308   :  { %v4967_v15 = vpop.xlane.xlu0 %4966 }
0x2309   :  { %7194 = vrcp.f32 %v4967_v15 }
0x230c   :  { %v4964_v26 = vpop.xlane.xlu0 %4963 }
0x230d   :  { %7196 = vrcp.f32 %v4964_v26 }
0x2310   :  { %v5125_v47 = vpop.permute.xlu0 %5124 }
0x2313   :  { %v7195_v40 = vpop.eup %7194 }
0x2314   :  { %v4971_v43 = vmul.f32 %v7195_v40, %v7191_v6 }
0x2316   :  { %6749 = vmatmul.mubr.msk.f32.vlgmr.msra.gmra.mrb[62].mxu0 %vm590_vm3, %v4971_v43 }
0x2317   :  { %v7197_v44 = vpop.eup %7196  ;;  %6757 = vmatpush3.xpose.msk.msra.mxu0 %vm81_vm0, %v5205_v42  ;;  %6758 = vmatprep.mubr.msk.f32.mxu0 %vm7315_vm2, %v7314_v46 }
0x2318   :  { %v4970_v45 = vmul.f32 %v7197_v44, %v7193_v9  ;;  %6766 = vmatprep.subr.mxu0 %v7314_v46  ;;  %v6004_v44 = vld [vmem:[#allocation7 + $0xc] ss:$0 sm:$0xff] }
0x231a   :  { %6744 = vmatmul.mubr.msk.f32.vlgmr.msra.gmra.mrb[50].mxu1 %vm590_vm3, %v4970_v45  ;;  %6759 = vmatmul.mubr.msk.f32.vlgmr.msra.gmra.mrb[64].mxu0 %vm81_vm0, %v5203_v10 }
0x231b   :  { %6752 = vmatpush3.xpose.msk.msra.mxu1 %vm81_vm0, %v5127_v11  ;;  %6753 = vmatprep.mubr.msk.f32.mxu1 %vm7315_vm2, %v7314_v46 }
0x231c   :  { %6761 = vmatprep.subr.mxu1 %v7314_v46  ;;  %6768 = vmatprep.mubr.msk.f32.mxu0 %vm7315_vm2, %v7314_v46 }
0x231e   :  { %6754 = vmatmul.mubr.msk.f32.vlgmr.msra.gmra.mrb[52].mxu1 %vm81_vm0, %v5125_v47 }
0x231f   :  { %6763 = vmatprep.mubr.msk.f32.mxu1 %vm7315_vm2, %v7314_v46 }
0x23e9   :  { %v5120_v61 = vpop.f32.mrb[62].mxu0 }
0x23ea   :  { %v6750_v49 = vpop.f32.mrb[63].mxu0 }
0x23ed   :  { %v5044_v50 = vpop.f32.mrb[50].mxu1  ;;  %v5276_v17 = vpop.f32.mrb[64].mxu0 }
0x23ee   :  { %v6745_v52 = vpop.f32.mrb[51].mxu1  ;;  %v6760_v28 = vpop.f32.mrb[65].mxu0  ;;  %v5283_v53 = vsel %vm590_vm3, %v5276_v17, -inf }
0x23ef   :  { %5284 = vmax.xlane.f32.xlu1 %v5283_v53 }
0x23f1   :  { %v5198_v56 = vpop.f32.mrb[52].mxu1 }
0x23f2   :  { %v6755_v59 = vpop.f32.mrb[53].mxu1  ;;  %v5280_v0 = vsel %vm590_vm3, %v5198_v56, -inf }
0x23f3   :  { %5281 = vmax.xlane.f32.xlu0 %v5280_v0 }
0x2400   :  { %5378 = vrot.lane.b32.xlu1 %v7849_v57, %s7318_s28 }
0x2404   :  { %5456 = vrot.lane.b32.xlu1 %v7925_v23, %s7319_s12  ;;  %v5486_v23 = vld [vmem:[#allocation6 + $0x2c8] sm:$0xff] }
0x2408   :  { %5458 = vrot.lane.b32.xlu1 %v7923_v21, %s7319_s12 }
0x240c   :  { %5466 = vrot.lane.b32.xlu1 %v5120_v61, %s7320_s1 }
0x247c   :  { %v5285_v46 = vpop.xlane.xlu1 %5284 }
0x247d   :  { %v5287_v1 = vsub.f32 %v5276_v17, %v5285_v46 }
0x247f   :  { %v5290_v2 = vmul.f32 1.442695, %v5287_v1 }
0x2480   :  { %v5379_v3 = vpop.permute.xlu1 %5378  ;;  %v5282_v63 = vpop.xlane.xlu0 %5281 }
0x2481   :  { %7198 = vpow2.f32 %v5290_v2  ;;  %v5286_v4 = vsub.f32 %v5198_v56, %v5282_v63  ;;  %6767 = vmatpush3.msra.mxu0 %v5379_v3  ;;  %v5623_v2 = vld [vmem:[#allocation6 + $0x388] sm:$0xff]  ;;  %v5624_v63 = vld [vmem:[#allocation6 + $0x390] sm:$0xff] }
0x2483   :  { %v5288_v5 = vmul.f32 1.442695, %v5286_v4  ;;  %v5625_v4 = vld [vmem:[#allocation6 + $0x398] sm:$0xff] }
0x2484   :  { %v5457_v8 = vpop.permute.xlu1 %5456 }
0x2485   :  { %7200 = vpow2.f32 %v5288_v5  ;;  %v5478_v9 = vsel %vm81_vm0, %v7887_v41, %v5457_v8  ;;  %v7060_v5 = vpack.c.bf16 %v5625_v4, %v5624_v63 }
0x2488   :  { %v5459_v37 = vpop.permute.xlu1 %5458 }
0x2489   :  { %v5479_v15 = vsel %vm81_vm0, %v7885_v16, %v5459_v37 }
0x248b   :  { %v7199_v7 = vpop.eup %7198 }
0x248c   :  { %v5295_v57 = vsel %vm590_vm3, %v7199_v7, 0.0  ;;  %v5467_v6 = vpop.permute.xlu1 %5466 }
0x248d   :  { %5296 = vadd.xlane.f32.xlu0 %v5295_v57  ;;  %v5481_v40 = vsel %vm1777_vm5, %v5479_v15, %v5467_v6  ;;  %v5627_v57 = vld [vmem:[#allocation6 + $0x3a8] sm:$0xff] }
0x248f   :  { %v7201_v62 = vpop.eup %7200 }
0x2490   :  { %v5292_v60 = vsel %vm590_vm3, %v7201_v62, 0.0 }
0x2491   :  { %5293 = vadd.xlane.f32.xlu0 %v5292_v60  ;;  %v5628_v60 = vld [vmem:[#allocation6 + $0x3b0] sm:$0xff] }
0x24a7   :  { %5302 = vrot.lane.b32.xlu0 %v7851_v18, %s7318_s28  ;;  %v7040_v18 = vpack.c.bf16 %v5486_v23, %v5485_v22  ;;  %v5723_v23 = vld [vmem:[#allocation6 + $0x3e0] sm:$0xff] }
0x24ab   :  { %5464 = vrot.lane.b32.xlu0 %v5044_v50, %s7320_s1 }
0x251a   :  { %v5297_v12 = vpop.xlane.xlu0 %5296 }
0x251b   :  { %7202 = vrcp.f32 %v5297_v12  ;;  %v5629_v12 = vld [vmem:[#allocation6 + $0x3b8] sm:$0xff] }
0x251e   :  { %v5294_v13 = vpop.xlane.xlu0 %5293 }
0x251f   :  { %7204 = vrcp.f32 %v5294_v13  ;;  %v7068_v13 = vpack.c.bf16 %v5629_v12, %v5628_v60  ;;  %v6015_v60 = vld [vmem:[#allocation7 + $0x17] ss:$0 sm:$0xff] }
0x2522   :  { %v5303_v14 = vpop.permute.xlu0 %5302 }
0x2523   :  { %6762 = vmatpush3.msra.mxu1 %v5303_v14  ;;  %v5719_v14 = vld [vmem:[#allocation6 + $0x3c0] sm:$0xff] }
0x2524   :  { %7041 = vmatprep.subr.bf16.mxu1 %v7040_v18 }
0x2525   :  { %v7203_v54 = vpop.eup %7202 }
0x2526   :  { %v5301_v58 = vmul.f32 %v7203_v54, %v7199_v7  ;;  %v5465_v38 = vpop.permute.xlu0 %5464  ;;  %v5626_v7 = vld [vmem:[#allocation6 + $0x3a0] sm:$0xff]  ;;  %v5720_v54 = vld [vmem:[#allocation6 + $0x3c8] sm:$0xff] }
0x2527   :  { %v5480_v26 = vsel %vm1777_vm5, %v5478_v9, %v5465_v38  ;;  %v5725_v9 = vld [vmem:[#allocation6 + $0x3f0] sm:$0xff] }
0x2528   :  { %6769 = vmatmul.mubr.msk.f32.vlgmr.msra.gmra.mrb[66].mxu0 %vm590_vm3, %v5301_v58  ;;  %v5721_v58 = vld [vmem:[#allocation6 + $0x3d0] sm:$0xff] }
0x2529   :  { %v7205_v20 = vpop.eup %7204 }
0x252a   :  { %v5300_v21 = vmul.f32 %v7205_v20, %v7201_v62  ;;  %v7064_v62 = vpack.c.bf16 %v5627_v57, %v5626_v7  ;;  %v7072_v20 = vpack.c.bf16 %v5720_v54, %v5719_v14  ;;  %v6016_v14 = vld [vmem:[#allocation7 + $0x18] ss:$0 sm:$0xff] }
0x252c   :  { %6764 = vmatmul.mubr.msk.f32.vlgmr.msra.gmra.mrb[54].mxu1 %vm590_vm3, %v5300_v21  ;;  %v5722_v21 = vld [vmem:[#allocation6 + $0x3d8] sm:$0xff] }
0x252d   :  { %7043 = vmatpush3.bf16.msra.mxu1 %v7040_v18  ;;  %v7076_v22 = vpack.c.bf16 %v5722_v21, %v5721_v58  ;;  %v7080_v18 = vpack.c.bf16 %v5724_v24, %v5723_v23 }
0x252e   :  { %7045 = vmatprep.subr.bf16.mxu1 %v7044_v27 }
0x2531   :  { %7047 = vmatpush3.bf16.msra.mxu1 %v7044_v27 }
0x2532   :  { %7049 = vmatprep.subr.bf16.mxu1 %v7048_v55 }
0x2535   :  { %7051 = vmatpush3.bf16.msra.mxu1 %v7048_v55 }
0x2536   :  { %7053 = vmatprep.subr.bf16.mxu1 %v7052_v32 }
0x2539   :  { %7055 = vmatpush3.bf16.msra.mxu1 %v7052_v32  ;;  %v6007_v32 = vld [vmem:[#allocation7 + $0x15] ss:$0 sm:$0xff] }
0x253a   :  { %7073 = vmatprep.subr.bf16.mxu1 %v7072_v20 }
0x25fb   :  { %v5450_v33 = vpop.f32.mrb[66].mxu0 }
0x25fc   :  { %5474 = vrot.lane.b32.xlu1 %v5450_v33, %s7321_s13  ;;  %v6770_v34 = vpop.f32.mrb[67].mxu0 }
0x25fd   :  { %v6008_v34 = vld [vmem:[#allocation7 + $0x16] ss:$0 sm:$0xff] }
0x25ff   :  { %v5374_v35 = vpop.f32.mrb[54].mxu1 }
0x2600   :  { %5472 = vrot.lane.b32.xlu0 %v5374_v35, %s7321_s13  ;;  %v6765_v36 = vpop.f32.mrb[55].mxu1 }
0x266e   :  { %v5475_v39 = vpop.permute.xlu1 %5474 }
0x266f   :  { %v5483_v43 = vsel %vm1780_vm4, %v5481_v40, %v5475_v39  ;;  %v5726_v39 = vld [vmem:[#allocation6 + $0x3f8] sm:$0xff] }
0x2670   :  { %v7084_v15 = vpack.c.bf16 %v5726_v39, %v5725_v9 }
0x2672   :  { %v5473_v11 = vpop.permute.xlu0 %5472 }
0x2673   :  { %v5482_v42 = vsel %vm1780_vm4, %v5480_v26, %v5473_v11  ;;  %v6009_v26 = vld [vmem:[#allocation7 + $0x13] ss:$0 sm:$0xff] }
0x2674   :  { %6787 = vmatprep.mubr.msk.f32.mxu1 %vm176_vm1, %v5482_v42 }
0x2675   :  { %6788 = vmatmul.mubr.msk.f32.vlgmr.msra.gmra.mrb[56].mxu1 %vm176_vm1, %v5483_v43 }
0x2676   :  { %7075 = vmatpush3.bf16.msra.mxu1 %v7072_v20 }
0x2677   :  { %7077 = vmatprep.subr.bf16.mxu1 %v7076_v22 }
0x267a   :  { %7079 = vmatpush3.bf16.msra.mxu1 %v7076_v22 }
0x267b   :  { %7081 = vmatprep.subr.bf16.mxu1 %v7080_v18 }
0x267e   :  { %7083 = vmatpush3.bf16.msra.mxu1 %v7080_v18 }
0x267f   :  { %7085 = vmatprep.subr.bf16.mxu1 %v7084_v15 }
0x2682   :  { %7087 = vmatpush3.bf16.msra.mxu1 %v7084_v15 }
0x2748   :  { %v6789_v45 = vpop.f32.mrb[56].mxu1 }
0x2749   :  { %v5576_v41 = vadd.f32 %v6789_v45, %v6004_v44  ;;  %v5570_v10 = vpop.f32.mrb[57].mxu1 }
0x274a   :  { %v5571_v47 = vadd.f32 %v6004_v44, %v5570_v10 }
0x274b   :  { %v5580_v16 = vadd.f32 %v5576_v41, %v7808_v51  ;;  %v6012_v41 = vld [vmem:[#allocation7 + $0x14] ss:$0 sm:$0xff] }
0x274c   :  { %v5579_v61 = vadd.f32 %v5571_v47, %v7806_v48  ;;  %v5622_v48 = vld [vmem:[#allocation6 + $0x380] sm:$0xff] }
0x274d   :  { %v5586_v49 = vsel %vm176_vm1, %v5580_v16, 0.0  ;;  %v7056_v3 = vpack.c.bf16 %v5623_v2, %v5622_v48 }
0x274e   :  { %5587 = vadd.xlane.f32.xlu1 %v5586_v49  ;;  %v5583_v50 = vsel %vm176_vm1, %v5579_v61, 0.0 }
0x274f   :  { %5584 = vadd.xlane.f32.xlu0 %v5583_v50  ;;  %7057 = vmatprep.subr.bf16.mxu0 %v7056_v3 }
0x2750   :  { %7059 = vmatpush3.bf16.msra.mxu0 %v7056_v3 }
0x2751   :  { %7061 = vmatprep.subr.bf16.mxu0 %v7060_v5 }
0x2754   :  { %7063 = vmatpush3.bf16.msra.mxu0 %v7060_v5 }
0x2755   :  { %7065 = vmatprep.subr.bf16.mxu0 %v7064_v62 }
0x2758   :  { %7067 = vmatpush3.bf16.msra.mxu0 %v7064_v62 }
0x2759   :  { %7069 = vmatprep.subr.bf16.mxu0 %v7068_v13 }
0x275c   :  { %7071 = vmatpush3.bf16.msra.mxu0 %v7068_v13 }
0x27db   :  { %v5588_v17 = vpop.xlane.xlu1 %5587 }
0x27dc   :  { %v5590_v52 = vmul.f32 0.015625, %v5588_v17  ;;  %v5585_v28 = vpop.xlane.xlu0 %5584 }
0x27dd   :  { %v5589_v53 = vmul.f32 0.015625, %v5585_v28 }
0x27de   :  { %v5592_v56 = vsub.f32 %v5580_v16, %v5590_v52 }
0x27df   :  { %v5591_v59 = vsub.f32 %v5579_v61, %v5589_v53 }
0x27e0   :  { %v5594_v1 = vmul.f32 %v5592_v56, %v5592_v56 }
0x27e1   :  { %v5593_v0 = vmul.f32 %v5591_v59, %v5591_v59 }
0x27e2   :  { %v5598_v51 = vsel %vm176_vm1, %v5594_v1, 0.0 }
0x27e3   :  { %v5595_v46 = vsel %vm176_vm1, %v5593_v0, 0.0 }
0x27e4   :  { %5596 = vadd.xlane.f32.xlu0 %v5595_v46 }
0x27e8   :  { %5599 = vadd.xlane.f32.xlu0 %v5598_v51 }
0x2871   :  { %v5597_v25 = vpop.xlane.xlu0 %5596 }
0x2872   :  { %v5601_v27 = vmul.f32 0.015625, %v5597_v25 }
0x2874   :  { %v5603_v29 = vadd.f32 1e-05, %v5601_v27 }
0x2875   :  { %v5600_v19 = vpop.xlane.xlu0 %5599 }
0x2876   :  { %7206 = vrsqrt.f32 %v5603_v29  ;;  %v5602_v55 = vmul.f32 0.015625, %v5600_v19 }
0x2878   :  { %v5604_v30 = vadd.f32 1e-05, %v5602_v55 }
0x287a   :  { %7208 = vrsqrt.f32 %v5604_v30 }
0x2880   :  { %v7207_v31 = vpop.eup %7206 }
0x2881   :  { %v5607_v33 = vmul.f32 %v7207_v31, %v5591_v59 }
0x2883   :  { %v5613_v35 = vmul.f32 %v6007_v32, %v5607_v33 }
0x2884   :  { %v7209_v36 = vpop.eup %7208 }
0x2885   :  { %v5608_v8 = vmul.f32 %v7209_v36, %v5592_v56  ;;  %v5619_v37 = vadd.f32 %v6008_v34, %v5613_v35 }
0x2887   :  { %v5614_v6 = vmul.f32 %v6007_v32, %v5608_v8  ;;  %6806 = vmatprep.mubr.msk.f32.mxu0 %vm176_vm1, %v5619_v37 }
0x2889   :  { %v5620_v38 = vadd.f32 %v6008_v34, %v5614_v6 }
0x288b   :  { %6807 = vmatmul.mubr.msk.f32.vlgmr.msra.gmra.mrb[68].mxu0 %vm176_vm1, %v5620_v38 }
0x295e   :  { %v6808_v11 = vpop.f32.mrb[68].mxu0 }
0x295f   :  { %v5713_v40 = vadd.f32 %v6808_v11, %v6009_v26  ;;  %v5707_v42 = vpop.f32.mrb[69].mxu0 }
0x2960   :  { %v5708_v43 = vadd.f32 %v6009_v26, %v5707_v42 }
0x2961   :  { %v5717_v45 = vmax.f32 %v5713_v40, 0.0 }
0x2962   :  { %v5716_v44 = vmax.f32 %v5708_v43, 0.0 }
0x2964   :  { %6825 = vmatprep.mubr.msk.f32.mxu1 %vm176_vm1, %v5716_v44 }
0x2965   :  { %6826 = vmatmul.mubr.msk.f32.vlgmr.msra.gmra.mrb[58].mxu1 %vm176_vm1, %v5717_v45 }
0x2a38   :  { %v6827_v10 = vpop.f32.mrb[58].mxu1 }
0x2a39   :  { %v5810_v47 = vadd.f32 %v6827_v10, %v6012_v41  ;;  %v5804_v16 = vpop.f32.mrb[59].mxu1 }
0x2a3a   :  { %v5805_v61 = vadd.f32 %v6012_v41, %v5804_v16 }
0x2a3b   :  { %v5814_v49 = vadd.f32 %v5810_v47, %v5620_v38 }
0x2a3c   :  { %v5813_v50 = vadd.f32 %v5805_v61, %v5619_v37 }
0x2a3d   :  { %v5820_v17 = vsel %vm176_vm1, %v5814_v49, 0.0 }
0x2a3e   :  { %5821 = vadd.xlane.f32.xlu1 %v5820_v17  ;;  %v5817_v52 = vsel %vm176_vm1, %v5813_v50, 0.0 }
0x2a3f   :  { %5818 = vadd.xlane.f32.xlu0 %v5817_v52 }
0x2acb   :  { %v5822_v28 = vpop.xlane.xlu1 %5821 }
0x2acc   :  { %v5824_v53 = vmul.f32 0.015625, %v5822_v28  ;;  %v5819_v56 = vpop.xlane.xlu0 %5818 }
0x2acd   :  { %v5823_v59 = vmul.f32 0.015625, %v5819_v56 }
0x2ace   :  { %v5826_v0 = vsub.f32 %v5814_v49, %v5824_v53 }
0x2acf   :  { %v5825_v46 = vsub.f32 %v5813_v50, %v5823_v59 }
0x2ad0   :  { %v5828_v1 = vmul.f32 %v5826_v0, %v5826_v0 }
0x2ad1   :  { %v5827_v51 = vmul.f32 %v5825_v46, %v5825_v46 }
0x2ad2   :  { %v5832_v48 = vsel %vm176_vm1, %v5828_v1, 0.0 }
0x2ad3   :  { %5833 = vadd.xlane.f32.xlu1 %v5832_v48  ;;  %v5829_v2 = vsel %vm176_vm1, %v5827_v51, 0.0 }
0x2ad4   :  { %5830 = vadd.xlane.f32.xlu0 %v5829_v2 }
0x2b60   :  { %v5834_v3 = vpop.xlane.xlu1 %5833 }
0x2b61   :  { %v5836_v63 = vmul.f32 0.015625, %v5834_v3  ;;  %v5831_v4 = vpop.xlane.xlu0 %5830 }
0x2b62   :  { %v5835_v5 = vmul.f32 0.015625, %v5831_v4 }
0x2b63   :  { %v5838_v7 = vadd.f32 1e-05, %v5836_v63 }
0x2b64   :  { %v5837_v57 = vadd.f32 1e-05, %v5835_v5 }
0x2b65   :  { %7210 = vrsqrt.f32 %v5838_v7 }
0x2b66   :  { %7212 = vrsqrt.f32 %v5837_v57 }
0x2b6f   :  { %v7211_v62 = vpop.eup %7210 }
0x2b70   :  { %v7213_v12 = vpop.eup %7212  ;;  %v5842_v13 = vmul.f32 %v7211_v62, %v5826_v0 }
0x2b71   :  { %v5841_v54 = vmul.f32 %v7213_v12, %v5825_v46 }
0x2b72   :  { %v5848_v58 = vmul.f32 %v6015_v60, %v5842_v13 }
0x2b73   :  { %v5847_v20 = vmul.f32 %v6015_v60, %v5841_v54 }
0x2b74   :  { %v5854_v21 = vadd.f32 %v6016_v14, %v5848_v58 }
0x2b75   :  { %v5853_v22 = vadd.f32 %v6016_v14, %v5847_v20 }
0x2b76   :  { %v5862_v23 = vsel %vm176_vm1, %v5854_v21, 0.0 }
0x2b77   :  { %v5863_v24 = vrot.slane %v5862_v23, 4  ;;  %v5855_v18 = vsel %vm176_vm1, %v5853_v22, 0.0 }
0x2b78   :  { %v5856_v25 = vrot.slane %v5855_v18, 4 }
0x2b79   :  { %v5864_v27 = vadd.f32 %v5863_v24, %v5862_v23 }
0x2b7a   :  { %v5857_v29 = vadd.f32 %v5856_v25, %v5855_v18 }
0x2b7b   :  { %v5865_v19 = vrot.slane %v5864_v27, 2 }
0x2b7c   :  { %v5858_v55 = vrot.slane %v5857_v29, 2 }
0x2b7d   :  { %v5866_v30 = vadd.f32 %v5865_v19, %v5864_v27 }
0x2b7e   :  { %v5859_v31 = vadd.f32 %v5858_v55, %v5857_v29 }
0x2b7f   :  { %v5867_v32 = vrot.slane %v5866_v30, 1 }
0x2b80   :  { %v5860_v33 = vrot.slane %v5859_v31, 1 }
0x2b81   :  { %v5868_v34 = vadd.f32 %v5867_v32, %v5866_v30 }
0x2b82   :  { %v5861_v35 = vadd.f32 %v5860_v33, %v5859_v31 }
0x2b83   :  { %v5871_v36 = vmul.f32 0.125, %v5868_v34 }
0x2b84   :  { %v5870_v8 = vmul.f32 0.125, %v5861_v35 }
0x2b86   :  { %v5875_v37 = vsel %vm5874_vm6, %v5871_v36, %v5870_v8 }
0x2b87   :  { %5878 = vst.msk [vmem:[%s8012_s4] sm:$0x3] %vm5877_vm7, %v5875_v37 }
0x2b88   :  { %5883 = vsyncpa [#allocation3], 1 }
0x2b89   :  { %5884 = vsyncpa [#allocation5], 1 }
0x2b8a   :  { %5885 = vsyncpa [#allocation8], 1 }

</bundles_post_ra>
